<compile_context>
chip_gen: v6e
topology: v6e:2x2x1
jax: 0.10.0
libtpu: 0.0.40
codegen_flags: <defaults>
</compile_context>

<pallas_src>
import math

import jax
import jax.numpy as jnp
from jax.experimental import pallas as pl
from jax.experimental.pallas import tpu as pltpu

# Cached (single_buffer_weights, use_ctx_scratch) config that compiled on this
# JAX build / chip; used to avoid repeating fallback attempts on later calls.
_GOOD_CONFIG = None


def make_attention_kernel(num_heads: int, head_dim: int, vis: bool,
                          seq_valid: int, use_ctx_scratch: bool):
    hidden = num_heads * head_dim

    def kernel(x_ref, wqkv_ref, bqkv_ref, wo_ref, bo_ref, *rest):
        if use_ctx_scratch:
            if vis:
                out_ref, probs_ref, ctx_ref = rest
            else:
                out_ref, ctx_ref = rest
                probs_ref = None
        else:
            if vis:
                out_ref, probs_ref = rest
            else:
                (out_ref,) = rest
                probs_ref = None
            ctx_ref = None

        bt, s, h = x_ref.shape          # batch-block, (padded) seq, hidden (static)
        cdtype = x_ref.dtype            # compute dtype for MXU operands (f32/bf16)

        # ---- fused Q/K/V projection: one wide MXU matmul (K = H, N = 3H) ----
        # 1/sqrt(head_dim) is already folded into the Q columns of wqkv/bqkv.
        x2 = x_ref[...].reshape(bt * s, h)                      # free leading merge
        qkv = jnp.dot(x2, wqkv_ref[...], preferred_element_type=jnp.float32)
        qkv = (qkv + bqkv_ref[...]).astype(cdtype)              # (bt*s, 3H)

        # Static key-padding mask (only materialized when the wrapper padded S).
        if s > seq_valid:
            key_ok = jax.lax.broadcasted_iota(jnp.int32, (1, 1, s), 2) < seq_valid
            key_bias = jnp.where(key_ok, 0.0, -1e30)            # (1,1,s) f32
        else:
            key_bias = None

        # ---- per-head attention core, batched over the batch-block ----
        ctx_pieces = []
        for hh in range(num_heads):     # num_heads is small & static: unrolled
            q_h = qkv[:, hh * head_dim:(hh + 1) * head_dim].reshape(bt, s, head_dim)
            k_h = qkv[:, hidden + hh * head_dim:
                         hidden + (hh + 1) * head_dim].reshape(bt, s, head_dim)
            v_h = qkv[:, 2 * hidden + hh * head_dim:
                         2 * hidden + (hh + 1) * head_dim].reshape(bt, s, head_dim)

            # scores = (Q*scale) K^T : contract head_dim of both operands
            # directly (no materialized transpose of K, no XLU transpose).
            scores = jnp.einsum('bqd,bkd->bqk', q_h, k_h,
                                preferred_element_type=jnp.float32)
            if key_bias is not None:
                scores = scores + key_bias

            # numerically-stable softmax, exact normalization, all in f32
            m = jnp.max(scores, axis=-1, keepdims=True)
            e = jnp.exp(scores - m)
            probs = e / jnp.sum(e, axis=-1, keepdims=True)      # (bt, s, s) f32

            if vis:
                # lane-dense writeback when the wrapper padded s to 128-multiple
                probs_ref[:, hh, :, :] = probs.astype(probs_ref.dtype)

            piece = jnp.einsum('bqk,bkd->bqd', probs.astype(cdtype), v_h,
                               preferred_element_type=jnp.float32).astype(cdtype)
            if use_ctx_scratch:
                # portability fallback: per-head column slab store into scratch
                ctx_ref[:, hh * head_dim:(hh + 1) * head_dim] = (
                    piece.reshape(bt * s, head_dim))
            else:
                ctx_pieces.append(piece)

        if use_ctx_scratch:
            ctx2 = ctx_ref[...]
        else:
            ctx = (ctx_pieces[0] if num_heads == 1
                   else jnp.concatenate(ctx_pieces, axis=-1))   # (bt, s, H)
            ctx2 = ctx.reshape(bt * s, h)

        # ---- output projection: single K=H MXU matmul, lane-dense store ----
        out = jnp.dot(ctx2, wo_ref[...],
                      preferred_element_type=jnp.float32) + bo_ref[...]
        out_ref[...] = out.reshape(bt, s, h).astype(out_ref.dtype)

    return kernel


def attention_forward(x, params, num_heads, *, vis=True, compute_dtype=None,
                      probs_dtype=jnp.float32, batch_block=None, seq_align=None):
    """x: (B, S, H).  Returns (attention_output (B,S,H), weights (B,nh,S,S) or None)."""
    global _GOOD_CONFIG

    B, S, H = x.shape
    assert H % num_heads == 0
    head_dim = H // num_heads
    wq, bq, wk, bk, wv, bv, wo, bo = params

    # ---- fold 1/sqrt(head_dim) into the Q projection; fuse QKV into one matmul
    scale = 1.0 / math.sqrt(head_dim)
    wqkv = jnp.concatenate([wq * scale, wk, wv], axis=1)   # (H, 3H)
    bqkv = jnp.concatenate([bq * scale, bk, bv], axis=1)   # (1, 3H)

    cdtype = jnp.dtype(compute_dtype) if compute_dtype is not None else x.dtype
    out_dtype = x.dtype

    # ---- pad S so scores/probs tiles and the probs writeback are lane-dense.
    # Padded keys are masked with -inf in-kernel; padded rows sliced off below.
    if seq_align is None:
        seq_align = 128 if S >= 64 else 8
    S_pad = ((S + seq_align - 1) // seq_align) * seq_align
    x_c = x.astype(cdtype)
    if S_pad != S:
        x_c = jnp.pad(x_c, ((0, 0), (0, S_pad - S), (0, 0)))

    wqkv = wqkv.astype(cdtype)
    bqkv = bqkv.astype(cdtype)
    wo_c = wo.astype(cdtype)
    bo_c = bo.astype(cdtype)

    # ---- VMEM budget from the actual chip (v5e/v6e 128 MiB, v7x 64 MiB/TC) ----
    vmem_limit = None
    try:
        cap = int(getattr(pltpu.get_tpu_info(), "vmem_capacity_bytes", 0) or 0)
        if 8 * 2**20 <= cap <= 256 * 2**20:
            vmem_limit = min(int(0.75 * cap), 100 * 2**20)
    except Exception:
        vmem_limit = None
    budget = vmem_limit if vmem_limit is not None else 48 * 2**20

    c_isz = jnp.dtype(cdtype).itemsize
    p_isz = jnp.dtype(probs_dtype).itemsize
    o_isz = jnp.dtype(out_dtype).itemsize

    def per_step_bytes(bt):
        n = 2 * bt * S_pad * H * c_isz                    # x block (double buffered)
        n += 2 * bt * S_pad * H * o_isz                   # y block (double buffered)
        n += (3 * H * H + 3 * H + H * H + H) * c_isz      # weights/biases (resident)
        if vis:
            n += 2 * bt * num_heads * S_pad * S_pad * p_isz
        n += bt * S_pad * 3 * H * 4                       # qkv f32 intermediate
        n += 4 * bt * S_pad * S_pad * 4                   # scores/exp/probs temps
        n += bt * S_pad * H * 4                           # ctx pieces
        return n

    # ---- batch block: prefer >=2 grid steps (both v7x TensorCores busy), then
    # shrink until the per-step footprint fits comfortably within the budget.
    if batch_block is None:
        divs = [d for d in range(1, B + 1) if B % d == 0]
        cands = [d for d in divs if d <= max(1, B // 2)] or [1]
        Bt = max(cands)
        while Bt > 1 and per_step_bytes(Bt) > budget // 2:
            Bt = max(d for d in divs if d < Bt)
    else:
        Bt = batch_block
    assert B % Bt == 0, "batch_block must divide batch size"
    grid = (B // Bt,)

    y_spec = pl.BlockSpec((Bt, S_pad, H), lambda b: (b, 0, 0))
    if vis:
        out_shape = (jax.ShapeDtypeStruct((B, S_pad, H), out_dtype),
                     jax.ShapeDtypeStruct((B, num_heads, S_pad, S_pad), probs_dtype))
        out_specs = (y_spec,
                     pl.BlockSpec((Bt, num_heads, S_pad, S_pad),
                                  lambda b: (b, 0, 0, 0)))
    else:
        out_shape = jax.ShapeDtypeStruct((B, S_pad, H), out_dtype)
        out_specs = y_spec

    cp_kwargs = dict(dimension_semantics=("parallel",))
    if vmem_limit is not None:
        cp_kwargs["vmem_limit_bytes"] = vmem_limit

    # Preferred config first: single-buffered constant weights + concat-assembled
    # context.  The other configs are portability fallbacks only.
    configs = []
    if _GOOD_CONFIG is not None:
        configs.append(_GOOD_CONFIG)
    for cfg in [(True, False), (False, False), (True, True), (False, True)]:
        if cfg not in configs:
            configs.append(cfg)

    result, last_err = None, None
    for single_buf, use_scratch in configs:
        try:
            kernel = make_attention_kernel(num_heads, head_dim, vis, S, use_scratch)
            wkw = {"pipeline_mode": pl.Buffered(1)} if single_buf else {}
            in_specs = [
                pl.BlockSpec((Bt, S_pad, H), lambda b: (b, 0, 0)),   # x block
                pl.BlockSpec((H, 3 * H), lambda b: (0, 0), **wkw),   # fused QKV weight
                pl.BlockSpec((1, 3 * H), lambda b: (0, 0), **wkw),   # fused QKV bias
                pl.BlockSpec((H, H), lambda b: (0, 0), **wkw),       # out-proj weight
                pl.BlockSpec((1, H), lambda b: (0, 0), **wkw),       # out-proj bias
            ]
            scratch_shapes = ([pltpu.VMEM((Bt * S_pad, H), cdtype)]
                              if use_scratch else [])
            result = pl.pallas_call(
                kernel,
                out_shape=out_shape,
                grid_spec=pltpu.PrefetchScalarGridSpec(
                    num_scalar_prefetch=0,
                    grid=grid,
                    in_specs=in_specs,
                    out_specs=out_specs,
                    scratch_shapes=scratch_shapes,
                ),
                compiler_params=pltpu.CompilerParams(**cp_kwargs),
            )(x_c, wqkv, bqkv, wo_c, bo_c)
            _GOOD_CONFIG = (single_buf, use_scratch)
            break
        except Exception as e:          # noqa: BLE001 - fallback, re-raised below
            last_err = e
            continue
    if result is None:
        raise last_err

    if vis:
        out_pad, probs_pad = result
        return out_pad[:, :S, :], probs_pad[:, :, :S, :S]
    return result[:, :S, :], None


def reference_attention(x, params, num_heads):
    """Plain-JAX reference mirroring the PyTorch forward (eval mode)."""
    B, S, H = x.shape
    hd = H // num_heads
    wq, bq, wk, bk, wv, bv, wo, bo = params

    def split_heads(t):  # (B,S,H) -> (B,nh,S,hd)
        return t.reshape(B, S, num_heads, hd).transpose(0, 2, 1, 3)

    q = split_heads(x @ wq + bq)
    k = split_heads(x @ wk + bk)
    v = split_heads(x @ wv + bv)
    scores = jnp.einsum("bhqd,bhkd->bhqk", q, k) / math.sqrt(hd)
    probs = jax.nn.softmax(scores, axis=-1)
    ctx = jnp.einsum("bhqk,bhkd->bhqd", probs, v)
    ctx = ctx.transpose(0, 2, 1, 3).reshape(B, S, H)
    out = ctx @ wo + bo
    return out, probs


if __name__ == "__main__":
    # Small config consistent with the module: hidden_size=32, num_heads=4
    B, S, H, NUM_HEADS = 2, 8, 32, 4

    key = jax.random.PRNGKey(0)
    keys = jax.random.split(key, 10)
    x = jax.random.normal(keys[0], (B, S, H), dtype=jnp.float32)

    init = 0.05
    params = (
        jax.random.normal(keys[1], (H, H), jnp.float32) * init,  # wq (in, out)
        jax.random.normal(keys[2], (1, H), jnp.float32) * init,  # bq
        jax.random.normal(keys[3], (H, H), jnp.float32) * init,  # wk
        jax.random.normal(keys[4], (1, H), jnp.float32) * init,  # bk
        jax.random.normal(keys[5], (H, H), jnp.float32) * init,  # wv
        jax.random.normal(keys[6], (1, H), jnp.float32) * init,  # bv
        jax.random.normal(keys[7], (H, H), jnp.float32) * init,  # wo
        jax.random.normal(keys[8], (1, H), jnp.float32) * init,  # bo
    )

    ref_out, ref_w = reference_attention(x, params, NUM_HEADS)

    # 1) f32, vis=True (S=8 already sublane-aligned -> no padding, no mask).
    out, weights = attention_forward(x, params, NUM_HEADS, vis=True)
    out, weights = jax.block_until_ready((out, weights))
    assert out.shape == (B, S, H)
    assert weights.shape == (B, NUM_HEADS, S, S)
    assert jnp.allclose(out, ref_out, atol=1e-3, rtol=1e-3)
    assert jnp.allclose(weights, ref_w, atol=1e-3, rtol=1e-3)

    # 2) vis=False: no (B,nh,S,S) probability writeback to HBM at all.
    out_nv, w_none = attention_forward(x, params, NUM_HEADS, vis=False)
    out_nv = jax.block_until_ready(out_nv)
    assert w_none is None
    assert jnp.allclose(out_nv, ref_out, atol=1e-3, rtol=1e-3)

    # 3) lane-dense padded path: S padded 8 -> 128, padded keys masked in-kernel.
    out_p, w_p = attention_forward(x, params, NUM_HEADS, vis=True, seq_align=128)
    out_p, w_p = jax.block_until_ready((out_p, w_p))
    assert out_p.shape == (B, S, H) and w_p.shape == (B, NUM_HEADS, S, S)
    assert jnp.allclose(out_p, ref_out, atol=1e-3, rtol=1e-3)
    assert jnp.allclose(w_p, ref_w, atol=1e-3, rtol=1e-3)

    # 4) bf16 MXU operands (f32 accumulation + f32 softmax) and bf16 vis probs
    #    (halves the dominant HBM writeback on v5e); loose tolerance.
    out_bf, w_bf = attention_forward(x, params, NUM_HEADS, vis=True,
                                     compute_dtype=jnp.bfloat16,
                                     probs_dtype=jnp.bfloat16)
    out_bf, w_bf = jax.block_until_ready((out_bf, w_bf))
    assert jnp.allclose(out_bf.astype(jnp.float32), ref_out, atol=3e-2, rtol=3e-2)
    assert jnp.allclose(w_bf.astype(jnp.float32), ref_w, atol=3e-2, rtol=3e-2)

    print("KERNEL_OK")
</pallas_src>

<mosaic_0001>
module attributes {stable_mosaic.version = 11 : i64} {
  func.func @kernel(%arg0: i32, %arg1: memref<1x8x32xf32, #tpu.memory_space<vmem>>, %arg2: memref<32x96xf32, #tpu.memory_space<vmem>>, %arg3: memref<1x96xf32, #tpu.memory_space<vmem>>, %arg4: memref<32x32xf32, #tpu.memory_space<vmem>>, %arg5: memref<1x32xf32, #tpu.memory_space<vmem>>, %arg6: memref<1x8x32xf32, #tpu.memory_space<vmem>>, %arg7: memref<1x4x8x8xf32, #tpu.memory_space<vmem>>) attributes {dimension_semantics = [#tpu.dimension_semantics<parallel>], iteration_bounds = array<i64: 2>, scalar_prefetch = 0 : i64, scratch_operands = 0 : i64, tpu.core_type = #tpu.core_type<tc>, window_params = [{transform_indices = @transform_0, window_bounds = array<i64: 1, 8, 32>}, {pipeline_mode = #tpu.pipeline_mode<synchronous>, transform_indices = @transform_1, window_bounds = array<i64: 32, 96>}, {pipeline_mode = #tpu.pipeline_mode<synchronous>, transform_indices = @transform_2, window_bounds = array<i64: 1, 96>}, {pipeline_mode = #tpu.pipeline_mode<synchronous>, transform_indices = @transform_3, window_bounds = array<i64: 32, 32>}, {pipeline_mode = #tpu.pipeline_mode<synchronous>, transform_indices = @transform_4, window_bounds = array<i64: 1, 32>}, {transform_indices = @transform_5, window_bounds = array<i64: 1, 8, 32>}, {transform_indices = @transform_6, window_bounds = array<i64: 1, 4, 8, 8>}]} {
    %c0 = arith.constant 0 : index
    %c0_0 = arith.constant 0 : index
    %c0_1 = arith.constant 0 : index
    %0 = vector.load %arg1[%c0, %c0_0, %c0_1] : memref<1x8x32xf32, #tpu.memory_space<vmem>>, vector<1x8x32xf32>
    %1 = vector.shape_cast %0 : vector<1x8x32xf32> to vector<8x32xf32>
    %c0_2 = arith.constant 0 : index
    %c0_3 = arith.constant 0 : index
    %2 = vector.load %arg2[%c0_2, %c0_3] : memref<32x96xf32, #tpu.memory_space<vmem>>, vector<32x96xf32>
    %cst = arith.constant dense<0.000000e+00> : vector<8x96xf32>
    %3 = tpu.matmul %1, %2, %cst {dimension_numbers = #tpu.dot_dimension_numbers<[1], [0], [0], [1], [0, 0, 1, 1], [], []>} : vector<8x32xf32>, vector<32x96xf32>, vector<8x96xf32> -> vector<8x96xf32>
    %c0_4 = arith.constant 0 : index
    %c0_5 = arith.constant 0 : index
    %4 = vector.load %arg3[%c0_4, %c0_5] : memref<1x96xf32, #tpu.memory_space<vmem>>, vector<1x96xf32>
    %5 = vector.broadcast %4 : vector<1x96xf32> to vector<8x96xf32>
    %6 = arith.addf %3, %5 : vector<8x96xf32>
    %7 = vector.extract_strided_slice %6 {offsets = [0, 0], sizes = [8, 8], strides = [1, 1]} : vector<8x96xf32> to vector<8x8xf32>
    %8 = vector.shape_cast %7 : vector<8x8xf32> to vector<1x8x8xf32>
    %9 = vector.extract_strided_slice %6 {offsets = [0, 32], sizes = [8, 8], strides = [1, 1]} : vector<8x96xf32> to vector<8x8xf32>
    %10 = vector.shape_cast %9 : vector<8x8xf32> to vector<1x8x8xf32>
    %11 = vector.extract_strided_slice %6 {offsets = [0, 64], sizes = [8, 8], strides = [1, 1]} : vector<8x96xf32> to vector<8x8xf32>
    %12 = vector.shape_cast %11 : vector<8x8xf32> to vector<1x8x8xf32>
    "tpu.trace_start"() <{level = 10 : i32, message = "bqd,bkd->bqk"}> : () -> ()
    %cst_6 = arith.constant dense<0.000000e+00> : vector<1x8x8xf32>
    %13 = tpu.matmul %8, %10, %cst_6 {dimension_numbers = #tpu.dot_dimension_numbers<[2], [2], [1], [1], [0, 0, 0, 1, 1, 1], [0], [0]>} : vector<1x8x8xf32>, vector<1x8x8xf32>, vector<1x8x8xf32> -> vector<1x8x8xf32>
    "tpu.trace_stop"() : () -> ()
    %cst_7 = arith.constant dense<0xFF800000> : vector<1x8xf32>
    %14 = vector.multi_reduction <maximumf>, %13, %cst_7 [2] : vector<1x8x8xf32> to vector<1x8xf32>
    %15 = vector.shape_cast %14 : vector<1x8xf32> to vector<1x8x1xf32>
    %16 = vector.broadcast %15 : vector<1x8x1xf32> to vector<1x8x8xf32>
    %17 = arith.subf %13, %16 : vector<1x8x8xf32>
    %18 = math.exp %17 : vector<1x8x8xf32>
    %cst_8 = arith.constant dense<0.000000e+00> : vector<1x8xf32>
    %19 = vector.multi_reduction <add>, %18, %cst_8 [2] : vector<1x8x8xf32> to vector<1x8xf32>
    %20 = vector.shape_cast %19 : vector<1x8xf32> to vector<1x8x1xf32>
    %21 = vector.broadcast %20 : vector<1x8x1xf32> to vector<1x8x8xf32>
    %22 = arith.divf %18, %21 : vector<1x8x8xf32>
    %c0_9 = arith.constant 0 : index
    %c0_10 = arith.constant 0 : index
    %c0_11 = arith.constant 0 : index
    %c0_12 = arith.constant 0 : index
    %23 = vector.load %arg7[%c0_9, %c0_10, %c0_11, %c0_12] : memref<1x4x8x8xf32, #tpu.memory_space<vmem>>, vector<1x1x8x8xf32>
    %24 = vector.shape_cast %23 : vector<1x1x8x8xf32> to vector<1x8x8xf32>
    %25 = vector.shape_cast %22 : vector<1x8x8xf32> to vector<1x1x8x8xf32>
    tpu.vector_store %arg7[%c0_9, %c0_10, %c0_11, %c0_12], %25 {strides = array<i32>} : memref<1x4x8x8xf32, #tpu.memory_space<vmem>>, vector<1x1x8x8xf32>,
    "tpu.trace_start"() <{level = 10 : i32, message = "bqk,bkd->bqd"}> : () -> ()
    %cst_13 = arith.constant dense<0.000000e+00> : vector<1x8x8xf32>
    %26 = tpu.matmul %22, %12, %cst_13 {dimension_numbers = #tpu.dot_dimension_numbers<[2], [1], [1], [2], [0, 0, 0, 1, 1, 2], [0], [0]>} : vector<1x8x8xf32>, vector<1x8x8xf32>, vector<1x8x8xf32> -> vector<1x8x8xf32>
    "tpu.trace_stop"() : () -> ()
    %27 = vector.extract_strided_slice %6 {offsets = [0, 8], sizes = [8, 8], strides = [1, 1]} : vector<8x96xf32> to vector<8x8xf32>
    %28 = vector.shape_cast %27 : vector<8x8xf32> to vector<1x8x8xf32>
    %29 = vector.extract_strided_slice %6 {offsets = [0, 40], sizes = [8, 8], strides = [1, 1]} : vector<8x96xf32> to vector<8x8xf32>
    %30 = vector.shape_cast %29 : vector<8x8xf32> to vector<1x8x8xf32>
    %31 = vector.extract_strided_slice %6 {offsets = [0, 72], sizes = [8, 8], strides = [1, 1]} : vector<8x96xf32> to vector<8x8xf32>
    %32 = vector.shape_cast %31 : vector<8x8xf32> to vector<1x8x8xf32>
    "tpu.trace_start"() <{level = 10 : i32, message = "bqd,bkd->bqk"}> : () -> ()
    %cst_14 = arith.constant dense<0.000000e+00> : vector<1x8x8xf32>
    %33 = tpu.matmul %28, %30, %cst_14 {dimension_numbers = #tpu.dot_dimension_numbers<[2], [2], [1], [1], [0, 0, 0, 1, 1, 1], [0], [0]>} : vector<1x8x8xf32>, vector<1x8x8xf32>, vector<1x8x8xf32> -> vector<1x8x8xf32>
    "tpu.trace_stop"() : () -> ()
    %cst_15 = arith.constant dense<0xFF800000> : vector<1x8xf32>
    %34 = vector.multi_reduction <maximumf>, %33, %cst_15 [2] : vector<1x8x8xf32> to vector<1x8xf32>
    %35 = vector.shape_cast %34 : vector<1x8xf32> to vector<1x8x1xf32>
    %36 = vector.broadcast %35 : vector<1x8x1xf32> to vector<1x8x8xf32>
    %37 = arith.subf %33, %36 : vector<1x8x8xf32>
    %38 = math.exp %37 : vector<1x8x8xf32>
    %cst_16 = arith.constant dense<0.000000e+00> : vector<1x8xf32>
    %39 = vector.multi_reduction <add>, %38, %cst_16 [2] : vector<1x8x8xf32> to vector<1x8xf32>
    %40 = vector.shape_cast %39 : vector<1x8xf32> to vector<1x8x1xf32>
    %41 = vector.broadcast %40 : vector<1x8x1xf32> to vector<1x8x8xf32>
    %42 = arith.divf %38, %41 : vector<1x8x8xf32>
    %c0_17 = arith.constant 0 : index
    %c1 = arith.constant 1 : index
    %c0_18 = arith.constant 0 : index
    %c0_19 = arith.constant 0 : index
    %43 = vector.load %arg7[%c0_17, %c1, %c0_18, %c0_19] : memref<1x4x8x8xf32, #tpu.memory_space<vmem>>, vector<1x1x8x8xf32>
    %44 = vector.shape_cast %43 : vector<1x1x8x8xf32> to vector<1x8x8xf32>
    %45 = vector.shape_cast %42 : vector<1x8x8xf32> to vector<1x1x8x8xf32>
    tpu.vector_store %arg7[%c0_17, %c1, %c0_18, %c0_19], %45 {strides = array<i32>} : memref<1x4x8x8xf32, #tpu.memory_space<vmem>>, vector<1x1x8x8xf32>,
    "tpu.trace_start"() <{level = 10 : i32, message = "bqk,bkd->bqd"}> : () -> ()
    %cst_20 = arith.constant dense<0.000000e+00> : vector<1x8x8xf32>
    %46 = tpu.matmul %42, %32, %cst_20 {dimension_numbers = #tpu.dot_dimension_numbers<[2], [1], [1], [2], [0, 0, 0, 1, 1, 2], [0], [0]>} : vector<1x8x8xf32>, vector<1x8x8xf32>, vector<1x8x8xf32> -> vector<1x8x8xf32>
    "tpu.trace_stop"() : () -> ()
    %47 = vector.extract_strided_slice %6 {offsets = [0, 16], sizes = [8, 8], strides = [1, 1]} : vector<8x96xf32> to vector<8x8xf32>
    %48 = vector.shape_cast %47 : vector<8x8xf32> to vector<1x8x8xf32>
    %49 = vector.extract_strided_slice %6 {offsets = [0, 48], sizes = [8, 8], strides = [1, 1]} : vector<8x96xf32> to vector<8x8xf32>
    %50 = vector.shape_cast %49 : vector<8x8xf32> to vector<1x8x8xf32>
    %51 = vector.extract_strided_slice %6 {offsets = [0, 80], sizes = [8, 8], strides = [1, 1]} : vector<8x96xf32> to vector<8x8xf32>
    %52 = vector.shape_cast %51 : vector<8x8xf32> to vector<1x8x8xf32>
    "tpu.trace_start"() <{level = 10 : i32, message = "bqd,bkd->bqk"}> : () -> ()
    %cst_21 = arith.constant dense<0.000000e+00> : vector<1x8x8xf32>
    %53 = tpu.matmul %48, %50, %cst_21 {dimension_numbers = #tpu.dot_dimension_numbers<[2], [2], [1], [1], [0, 0, 0, 1, 1, 1], [0], [0]>} : vector<1x8x8xf32>, vector<1x8x8xf32>, vector<1x8x8xf32> -> vector<1x8x8xf32>
    "tpu.trace_stop"() : () -> ()
    %cst_22 = arith.constant dense<0xFF800000> : vector<1x8xf32>
    %54 = vector.multi_reduction <maximumf>, %53, %cst_22 [2] : vector<1x8x8xf32> to vector<1x8xf32>
    %55 = vector.shape_cast %54 : vector<1x8xf32> to vector<1x8x1xf32>
    %56 = vector.broadcast %55 : vector<1x8x1xf32> to vector<1x8x8xf32>
    %57 = arith.subf %53, %56 : vector<1x8x8xf32>
    %58 = math.exp %57 : vector<1x8x8xf32>
    %cst_23 = arith.constant dense<0.000000e+00> : vector<1x8xf32>
    %59 = vector.multi_reduction <add>, %58, %cst_23 [2] : vector<1x8x8xf32> to vector<1x8xf32>
    %60 = vector.shape_cast %59 : vector<1x8xf32> to vector<1x8x1xf32>
    %61 = vector.broadcast %60 : vector<1x8x1xf32> to vector<1x8x8xf32>
    %62 = arith.divf %58, %61 : vector<1x8x8xf32>
    %c0_24 = arith.constant 0 : index
    %c2 = arith.constant 2 : index
    %c0_25 = arith.constant 0 : index
    %c0_26 = arith.constant 0 : index
    %63 = vector.load %arg7[%c0_24, %c2, %c0_25, %c0_26] : memref<1x4x8x8xf32, #tpu.memory_space<vmem>>, vector<1x1x8x8xf32>
    %64 = vector.shape_cast %63 : vector<1x1x8x8xf32> to vector<1x8x8xf32>
    %65 = vector.shape_cast %62 : vector<1x8x8xf32> to vector<1x1x8x8xf32>
    tpu.vector_store %arg7[%c0_24, %c2, %c0_25, %c0_26], %65 {strides = array<i32>} : memref<1x4x8x8xf32, #tpu.memory_space<vmem>>, vector<1x1x8x8xf32>,
    "tpu.trace_start"() <{level = 10 : i32, message = "bqk,bkd->bqd"}> : () -> ()
    %cst_27 = arith.constant dense<0.000000e+00> : vector<1x8x8xf32>
    %66 = tpu.matmul %62, %52, %cst_27 {dimension_numbers = #tpu.dot_dimension_numbers<[2], [1], [1], [2], [0, 0, 0, 1, 1, 2], [0], [0]>} : vector<1x8x8xf32>, vector<1x8x8xf32>, vector<1x8x8xf32> -> vector<1x8x8xf32>
    "tpu.trace_stop"() : () -> ()
    %67 = vector.extract_strided_slice %6 {offsets = [0, 24], sizes = [8, 8], strides = [1, 1]} : vector<8x96xf32> to vector<8x8xf32>
    %68 = vector.shape_cast %67 : vector<8x8xf32> to vector<1x8x8xf32>
    %69 = vector.extract_strided_slice %6 {offsets = [0, 56], sizes = [8, 8], strides = [1, 1]} : vector<8x96xf32> to vector<8x8xf32>
    %70 = vector.shape_cast %69 : vector<8x8xf32> to vector<1x8x8xf32>
    %71 = vector.extract_strided_slice %6 {offsets = [0, 88], sizes = [8, 8], strides = [1, 1]} : vector<8x96xf32> to vector<8x8xf32>
    %72 = vector.shape_cast %71 : vector<8x8xf32> to vector<1x8x8xf32>
    "tpu.trace_start"() <{level = 10 : i32, message = "bqd,bkd->bqk"}> : () -> ()
    %cst_28 = arith.constant dense<0.000000e+00> : vector<1x8x8xf32>
    %73 = tpu.matmul %68, %70, %cst_28 {dimension_numbers = #tpu.dot_dimension_numbers<[2], [2], [1], [1], [0, 0, 0, 1, 1, 1], [0], [0]>} : vector<1x8x8xf32>, vector<1x8x8xf32>, vector<1x8x8xf32> -> vector<1x8x8xf32>
    "tpu.trace_stop"() : () -> ()
    %cst_29 = arith.constant dense<0xFF800000> : vector<1x8xf32>
    %74 = vector.multi_reduction <maximumf>, %73, %cst_29 [2] : vector<1x8x8xf32> to vector<1x8xf32>
    %75 = vector.shape_cast %74 : vector<1x8xf32> to vector<1x8x1xf32>
    %76 = vector.broadcast %75 : vector<1x8x1xf32> to vector<1x8x8xf32>
    %77 = arith.subf %73, %76 : vector<1x8x8xf32>
    %78 = math.exp %77 : vector<1x8x8xf32>
    %cst_30 = arith.constant dense<0.000000e+00> : vector<1x8xf32>
    %79 = vector.multi_reduction <add>, %78, %cst_30 [2] : vector<1x8x8xf32> to vector<1x8xf32>
    %80 = vector.shape_cast %79 : vector<1x8xf32> to vector<1x8x1xf32>
    %81 = vector.broadcast %80 : vector<1x8x1xf32> to vector<1x8x8xf32>
    %82 = arith.divf %78, %81 : vector<1x8x8xf32>
    %c0_31 = arith.constant 0 : index
    %c3 = arith.constant 3 : index
    %c0_32 = arith.constant 0 : index
    %c0_33 = arith.constant 0 : index
    %83 = vector.load %arg7[%c0_31, %c3, %c0_32, %c0_33] : memref<1x4x8x8xf32, #tpu.memory_space<vmem>>, vector<1x1x8x8xf32>
    %84 = vector.shape_cast %83 : vector<1x1x8x8xf32> to vector<1x8x8xf32>
    %85 = vector.shape_cast %82 : vector<1x8x8xf32> to vector<1x1x8x8xf32>
    tpu.vector_store %arg7[%c0_31, %c3, %c0_32, %c0_33], %85 {strides = array<i32>} : memref<1x4x8x8xf32, #tpu.memory_space<vmem>>, vector<1x1x8x8xf32>,
    "tpu.trace_start"() <{level = 10 : i32, message = "bqk,bkd->bqd"}> : () -> ()
    %cst_34 = arith.constant dense<0.000000e+00> : vector<1x8x8xf32>
    %86 = tpu.matmul %82, %72, %cst_34 {dimension_numbers = #tpu.dot_dimension_numbers<[2], [1], [1], [2], [0, 0, 0, 1, 1, 2], [0], [0]>} : vector<1x8x8xf32>, vector<1x8x8xf32>, vector<1x8x8xf32> -> vector<1x8x8xf32>
    "tpu.trace_stop"() : () -> ()
    %87 = tpu.concatenate %26, %46, %66, %86 in 2 : vector<1x8x8xf32>, vector<1x8x8xf32>, vector<1x8x8xf32>, vector<1x8x8xf32> -> vector<1x8x32xf32>
    %88 = vector.shape_cast %87 : vector<1x8x32xf32> to vector<8x32xf32>
    %c0_35 = arith.constant 0 : index
    %c0_36 = arith.constant 0 : index
    %89 = vector.load %arg4[%c0_35, %c0_36] : memref<32x32xf32, #tpu.memory_space<vmem>>, vector<32x32xf32>
    %cst_37 = arith.constant dense<0.000000e+00> : vector<8x32xf32>
    %90 = tpu.matmul %88, %89, %cst_37 {dimension_numbers = #tpu.dot_dimension_numbers<[1], [0], [0], [1], [0, 0, 1, 1], [], []>} : vector<8x32xf32>, vector<32x32xf32>, vector<8x32xf32> -> vector<8x32xf32>
    %c0_38 = arith.constant 0 : index
    %c0_39 = arith.constant 0 : index
    %91 = vector.load %arg5[%c0_38, %c0_39] : memref<1x32xf32, #tpu.memory_space<vmem>>, vector<1x32xf32>
    %92 = vector.broadcast %91 : vector<1x32xf32> to vector<8x32xf32>
    %93 = arith.addf %90, %92 : vector<8x32xf32>
    %94 = vector.shape_cast %93 : vector<8x32xf32> to vector<1x8x32xf32>
    %c0_40 = arith.constant 0 : index
    %c0_41 = arith.constant 0 : index
    %c0_42 = arith.constant 0 : index
    %95 = vector.load %arg6[%c0_40, %c0_41, %c0_42] : memref<1x8x32xf32, #tpu.memory_space<vmem>>, vector<1x8x32xf32>
    tpu.vector_store %arg6[%c0_40, %c0_41, %c0_42], %94 {strides = array<i32>} : memref<1x8x32xf32, #tpu.memory_space<vmem>>, vector<1x8x32xf32>,
    return
  }
  func.func @transform_0(%arg0: i32) -> (i32, i32, i32) {
    %c0_i32 = arith.constant 0 : i32
    %c0_i32_0 = arith.constant 0 : i32
    %c0_i32_1 = arith.constant 0 : i32
    return %arg0, %c0_i32, %c0_i32_0 : i32, i32, i32
  }
  func.func @transform_1(%arg0: i32) -> (i32, i32) {
    %c0_i32 = arith.constant 0 : i32
    %c0_i32_0 = arith.constant 0 : i32
    %c0_i32_1 = arith.constant 0 : i32
    return %c0_i32, %c0_i32_0 : i32, i32
  }
  func.func @transform_2(%arg0: i32) -> (i32, i32) {
    %c0_i32 = arith.constant 0 : i32
    %c0_i32_0 = arith.constant 0 : i32
    %c0_i32_1 = arith.constant 0 : i32
    return %c0_i32, %c0_i32_0 : i32, i32
  }
  func.func @transform_3(%arg0: i32) -> (i32, i32) {
    %c0_i32 = arith.constant 0 : i32
    %c0_i32_0 = arith.constant 0 : i32
    %c0_i32_1 = arith.constant 0 : i32
    return %c0_i32, %c0_i32_0 : i32, i32
  }
  func.func @transform_4(%arg0: i32) -> (i32, i32) {
    %c0_i32 = arith.constant 0 : i32
    %c0_i32_0 = arith.constant 0 : i32
    %c0_i32_1 = arith.constant 0 : i32
    return %c0_i32, %c0_i32_0 : i32, i32
  }
  func.func @transform_5(%arg0: i32) -> (i32, i32, i32) {
    %c0_i32 = arith.constant 0 : i32
    %c0_i32_0 = arith.constant 0 : i32
    %c0_i32_1 = arith.constant 0 : i32
    return %arg0, %c0_i32, %c0_i32_0 : i32, i32, i32
  }
  func.func @transform_6(%arg0: i32) -> (i32, i32, i32, i32) {
    %c0_i32 = arith.constant 0 : i32
    %c0_i32_0 = arith.constant 0 : i32
    %c0_i32_1 = arith.constant 0 : i32
    %c0_i32_2 = arith.constant 0 : i32
    return %arg0, %c0_i32, %c0_i32_0, %c0_i32_1 : i32, i32, i32, i32
  }
}

module attributes {stable_mosaic.version = 11 : i64} {
  func.func @kernel(%arg0: i32, %arg1: memref<1x8x32xf32, #tpu.memory_space<vmem>>, %arg2: memref<32x96xf32, #tpu.memory_space<vmem>>, %arg3: memref<1x96xf32, #tpu.memory_space<vmem>>, %arg4: memref<32x32xf32, #tpu.memory_space<vmem>>, %arg5: memref<1x32xf32, #tpu.memory_space<vmem>>, %arg6: memref<1x8x32xf32, #tpu.memory_space<vmem>>, %arg7: memref<1x4x8x8xf32, #tpu.memory_space<vmem>>) attributes {dimension_semantics = [#tpu.dimension_semantics<parallel>], iteration_bounds = array<i64: 2>, scalar_prefetch = 0 : i64, scratch_operands = 0 : i64, tpu.core_type = #tpu.core_type<tc>, window_params = [{transform_indices = @transform_0, window_bounds = array<i64: 1, 8, 32>}, {pipeline_mode = #tpu.pipeline_mode<synchronous>, transform_indices = @transform_1, window_bounds = array<i64: 32, 96>}, {pipeline_mode = #tpu.pipeline_mode<synchronous>, transform_indices = @transform_2, window_bounds = array<i64: 1, 96>}, {pipeline_mode = #tpu.pipeline_mode<synchronous>, transform_indices = @transform_3, window_bounds = array<i64: 32, 32>}, {pipeline_mode = #tpu.pipeline_mode<synchronous>, transform_indices = @transform_4, window_bounds = array<i64: 1, 32>}, {transform_indices = @transform_5, window_bounds = array<i64: 1, 8, 32>}, {transform_indices = @transform_6, window_bounds = array<i64: 1, 4, 8, 8>}]} {
    %c0 = arith.constant 0 : index
    %c0_0 = arith.constant 0 : index
    %c0_1 = arith.constant 0 : index
    %0 = vector.load %arg1[%c0, %c0_0, %c0_1] : memref<1x8x32xf32, #tpu.memory_space<vmem>>, vector<1x8x32xf32>
    %1 = vector.shape_cast %0 : vector<1x8x32xf32> to vector<8x32xf32>
    %c0_2 = arith.constant 0 : index
    %c0_3 = arith.constant 0 : index
    %2 = vector.load %arg2[%c0_2, %c0_3] : memref<32x96xf32, #tpu.memory_space<vmem>>, vector<32x96xf32>
    %cst = arith.constant dense<0.000000e+00> : vector<8x96xf32>
    %3 = tpu.matmul %1, %2, %cst {dimension_numbers = #tpu.dot_dimension_numbers<[1], [0], [0], [1], [0, 0, 1, 1], [], []>} : vector<8x32xf32>, vector<32x96xf32>, vector<8x96xf32> -> vector<8x96xf32>
    %c0_4 = arith.constant 0 : index
    %c0_5 = arith.constant 0 : index
    %4 = vector.load %arg3[%c0_4, %c0_5] : memref<1x96xf32, #tpu.memory_space<vmem>>, vector<1x96xf32>
    %5 = vector.broadcast %4 : vector<1x96xf32> to vector<8x96xf32>
    %6 = arith.addf %3, %5 : vector<8x96xf32>
    %7 = vector.extract_strided_slice %6 {offsets = [0, 0], sizes = [8, 8], strides = [1, 1]} : vector<8x96xf32> to vector<8x8xf32>
    %8 = vector.shape_cast %7 : vector<8x8xf32> to vector<1x8x8xf32>
    %9 = vector.extract_strided_slice %6 {offsets = [0, 32], sizes = [8, 8], strides = [1, 1]} : vector<8x96xf32> to vector<8x8xf32>
    %10 = vector.shape_cast %9 : vector<8x8xf32> to vector<1x8x8xf32>
    %11 = vector.extract_strided_slice %6 {offsets = [0, 64], sizes = [8, 8], strides = [1, 1]} : vector<8x96xf32> to vector<8x8xf32>
    %12 = vector.shape_cast %11 : vector<8x8xf32> to vector<1x8x8xf32>
    "tpu.trace_start"() <{level = 10 : i32, message = "bqd,bkd->bqk"}> : () -> ()
    %cst_6 = arith.constant dense<0.000000e+00> : vector<1x8x8xf32>
    %13 = tpu.matmul %8, %10, %cst_6 {dimension_numbers = #tpu.dot_dimension_numbers<[2], [2], [1], [1], [0, 0, 0, 1, 1, 1], [0], [0]>} : vector<1x8x8xf32>, vector<1x8x8xf32>, vector<1x8x8xf32> -> vector<1x8x8xf32>
    "tpu.trace_stop"() : () -> ()
    %cst_7 = arith.constant dense<0xFF800000> : vector<1x8xf32>
    %14 = vector.multi_reduction <maximumf>, %13, %cst_7 [2] : vector<1x8x8xf32> to vector<1x8xf32>
    %15 = vector.shape_cast %14 : vector<1x8xf32> to vector<1x8x1xf32>
    %16 = vector.broadcast %15 : vector<1x8x1xf32> to vector<1x8x8xf32>
    %17 = arith.subf %13, %16 : vector<1x8x8xf32>
    %18 = math.exp %17 : vector<1x8x8xf32>
    %cst_8 = arith.constant dense<0.000000e+00> : vector<1x8xf32>
    %19 = vector.multi_reduction <add>, %18, %cst_8 [2] : vector<1x8x8xf32> to vector<1x8xf32>
    %20 = vector.shape_cast %19 : vector<1x8xf32> to vector<1x8x1xf32>
    %21 = vector.broadcast %20 : vector<1x8x1xf32> to vector<1x8x8xf32>
    %22 = arith.divf %18, %21 : vector<1x8x8xf32>
    %c0_9 = arith.constant 0 : index
    %c0_10 = arith.constant 0 : index
    %c0_11 = arith.constant 0 : index
    %c0_12 = arith.constant 0 : index
    %23 = vector.load %arg7[%c0_9, %c0_10, %c0_11, %c0_12] : memref<1x4x8x8xf32, #tpu.memory_space<vmem>>, vector<1x1x8x8xf32>
    %24 = vector.shape_cast %23 : vector<1x1x8x8xf32> to vector<1x8x8xf32>
    %25 = vector.shape_cast %22 : vector<1x8x8xf32> to vector<1x1x8x8xf32>
    tpu.vector_store %arg7[%c0_9, %c0_10, %c0_11, %c0_12], %25 {strides = array<i32>} : memref<1x4x8x8xf32, #tpu.memory_space<vmem>>, vector<1x1x8x8xf32>,
    "tpu.trace_start"() <{level = 10 : i32, message = "bqk,bkd->bqd"}> : () -> ()
    %cst_13 = arith.constant dense<0.000000e+00> : vector<1x8x8xf32>
    %26 = tpu.matmul %22, %12, %cst_13 {dimension_numbers = #tpu.dot_dimension_numbers<[2], [1], [1], [2], [0, 0, 0, 1, 1, 2], [0], [0]>} : vector<1x8x8xf32>, vector<1x8x8xf32>, vector<1x8x8xf32> -> vector<1x8x8xf32>
    "tpu.trace_stop"() : () -> ()
    %27 = vector.extract_strided_slice %6 {offsets = [0, 8], sizes = [8, 8], strides = [1, 1]} : vector<8x96xf32> to vector<8x8xf32>
    %28 = vector.shape_cast %27 : vector<8x8xf32> to vector<1x8x8xf32>
    %29 = vector.extract_strided_slice %6 {offsets = [0, 40], sizes = [8, 8], strides = [1, 1]} : vector<8x96xf32> to vector<8x8xf32>
    %30 = vector.shape_cast %29 : vector<8x8xf32> to vector<1x8x8xf32>
    %31 = vector.extract_strided_slice %6 {offsets = [0, 72], sizes = [8, 8], strides = [1, 1]} : vector<8x96xf32> to vector<8x8xf32>
    %32 = vector.shape_cast %31 : vector<8x8xf32> to vector<1x8x8xf32>
    "tpu.trace_start"() <{level = 10 : i32, message = "bqd,bkd->bqk"}> : () -> ()
    %cst_14 = arith.constant dense<0.000000e+00> : vector<1x8x8xf32>
    %33 = tpu.matmul %28, %30, %cst_14 {dimension_numbers = #tpu.dot_dimension_numbers<[2], [2], [1], [1], [0, 0, 0, 1, 1, 1], [0], [0]>} : vector<1x8x8xf32>, vector<1x8x8xf32>, vector<1x8x8xf32> -> vector<1x8x8xf32>
    "tpu.trace_stop"() : () -> ()
    %cst_15 = arith.constant dense<0xFF800000> : vector<1x8xf32>
    %34 = vector.multi_reduction <maximumf>, %33, %cst_15 [2] : vector<1x8x8xf32> to vector<1x8xf32>
    %35 = vector.shape_cast %34 : vector<1x8xf32> to vector<1x8x1xf32>
    %36 = vector.broadcast %35 : vector<1x8x1xf32> to vector<1x8x8xf32>
    %37 = arith.subf %33, %36 : vector<1x8x8xf32>
    %38 = math.exp %37 : vector<1x8x8xf32>
    %cst_16 = arith.constant dense<0.000000e+00> : vector<1x8xf32>
    %39 = vector.multi_reduction <add>, %38, %cst_16 [2] : vector<1x8x8xf32> to vector<1x8xf32>
    %40 = vector.shape_cast %39 : vector<1x8xf32> to vector<1x8x1xf32>
    %41 = vector.broadcast %40 : vector<1x8x1xf32> to vector<1x8x8xf32>
    %42 = arith.divf %38, %41 : vector<1x8x8xf32>
    %c0_17 = arith.constant 0 : index
    %c1 = arith.constant 1 : index
    %c0_18 = arith.constant 0 : index
    %c0_19 = arith.constant 0 : index
    %43 = vector.load %arg7[%c0_17, %c1, %c0_18, %c0_19] : memref<1x4x8x8xf32, #tpu.memory_space<vmem>>, vector<1x1x8x8xf32>
    %44 = vector.shape_cast %43 : vector<1x1x8x8xf32> to vector<1x8x8xf32>
    %45 = vector.shape_cast %42 : vector<1x8x8xf32> to vector<1x1x8x8xf32>
    tpu.vector_store %arg7[%c0_17, %c1, %c0_18, %c0_19], %45 {strides = array<i32>} : memref<1x4x8x8xf32, #tpu.memory_space<vmem>>, vector<1x1x8x8xf32>,
    "tpu.trace_start"() <{level = 10 : i32, message = "bqk,bkd->bqd"}> : () -> ()
    %cst_20 = arith.constant dense<0.000000e+00> : vector<1x8x8xf32>
    %46 = tpu.matmul %42, %32, %cst_20 {dimension_numbers = #tpu.dot_dimension_numbers<[2], [1], [1], [2], [0, 0, 0, 1, 1, 2], [0], [0]>} : vector<1x8x8xf32>, vector<1x8x8xf32>, vector<1x8x8xf32> -> vector<1x8x8xf32>
    "tpu.trace_stop"() : () -> ()
    %47 = vector.extract_strided_slice %6 {offsets = [0, 16], sizes = [8, 8], strides = [1, 1]} : vector<8x96xf32> to vector<8x8xf32>
    %48 = vector.shape_cast %47 : vector<8x8xf32> to vector<1x8x8xf32>
    %49 = vector.extract_strided_slice %6 {offsets = [0, 48], sizes = [8, 8], strides = [1, 1]} : vector<8x96xf32> to vector<8x8xf32>
    %50 = vector.shape_cast %49 : vector<8x8xf32> to vector<1x8x8xf32>
    %51 = vector.extract_strided_slice %6 {offsets = [0, 80], sizes = [8, 8], strides = [1, 1]} : vector<8x96xf32> to vector<8x8xf32>
    %52 = vector.shape_cast %51 : vector<8x8xf32> to vector<1x8x8xf32>
    "tpu.trace_start"() <{level = 10 : i32, message = "bqd,bkd->bqk"}> : () -> ()
    %cst_21 = arith.constant dense<0.000000e+00> : vector<1x8x8xf32>
    %53 = tpu.matmul %48, %50, %cst_21 {dimension_numbers = #tpu.dot_dimension_numbers<[2], [2], [1], [1], [0, 0, 0, 1, 1, 1], [0], [0]>} : vector<1x8x8xf32>, vector<1x8x8xf32>, vector<1x8x8xf32> -> vector<1x8x8xf32>
    "tpu.trace_stop"() : () -> ()
    %cst_22 = arith.constant dense<0xFF800000> : vector<1x8xf32>
    %54 = vector.multi_reduction <maximumf>, %53, %cst_22 [2] : vector<1x8x8xf32> to vector<1x8xf32>
    %55 = vector.shape_cast %54 : vector<1x8xf32> to vector<1x8x1xf32>
    %56 = vector.broadcast %55 : vector<1x8x1xf32> to vector<1x8x8xf32>
    %57 = arith.subf %53, %56 : vector<1x8x8xf32>
    %58 = math.exp %57 : vector<1x8x8xf32>
    %cst_23 = arith.constant dense<0.000000e+00> : vector<1x8xf32>
    %59 = vector.multi_reduction <add>, %58, %cst_23 [2] : vector<1x8x8xf32> to vector<1x8xf32>
    %60 = vector.shape_cast %59 : vector<1x8xf32> to vector<1x8x1xf32>
    %61 = vector.broadcast %60 : vector<1x8x1xf32> to vector<1x8x8xf32>
    %62 = arith.divf %58, %61 : vector<1x8x8xf32>
    %c0_24 = arith.constant 0 : index
    %c2 = arith.constant 2 : index
    %c0_25 = arith.constant 0 : index
    %c0_26 = arith.constant 0 : index
    %63 = vector.load %arg7[%c0_24, %c2, %c0_25, %c0_26] : memref<1x4x8x8xf32, #tpu.memory_space<vmem>>, vector<1x1x8x8xf32>
    %64 = vector.shape_cast %63 : vector<1x1x8x8xf32> to vector<1x8x8xf32>
    %65 = vector.shape_cast %62 : vector<1x8x8xf32> to vector<1x1x8x8xf32>
    tpu.vector_store %arg7[%c0_24, %c2, %c0_25, %c0_26], %65 {strides = array<i32>} : memref<1x4x8x8xf32, #tpu.memory_space<vmem>>, vector<1x1x8x8xf32>,
    "tpu.trace_start"() <{level = 10 : i32, message = "bqk,bkd->bqd"}> : () -> ()
    %cst_27 = arith.constant dense<0.000000e+00> : vector<1x8x8xf32>
    %66 = tpu.matmul %62, %52, %cst_27 {dimension_numbers = #tpu.dot_dimension_numbers<[2], [1], [1], [2], [0, 0, 0, 1, 1, 2], [0], [0]>} : vector<1x8x8xf32>, vector<1x8x8xf32>, vector<1x8x8xf32> -> vector<1x8x8xf32>
    "tpu.trace_stop"() : () -> ()
    %67 = vector.extract_strided_slice %6 {offsets = [0, 24], sizes = [8, 8], strides = [1, 1]} : vector<8x96xf32> to vector<8x8xf32>
    %68 = vector.shape_cast %67 : vector<8x8xf32> to vector<1x8x8xf32>
    %69 = vector.extract_strided_slice %6 {offsets = [0, 56], sizes = [8, 8], strides = [1, 1]} : vector<8x96xf32> to vector<8x8xf32>
    %70 = vector.shape_cast %69 : vector<8x8xf32> to vector<1x8x8xf32>
    %71 = vector.extract_strided_slice %6 {offsets = [0, 88], sizes = [8, 8], strides = [1, 1]} : vector<8x96xf32> to vector<8x8xf32>
    %72 = vector.shape_cast %71 : vector<8x8xf32> to vector<1x8x8xf32>
    "tpu.trace_start"() <{level = 10 : i32, message = "bqd,bkd->bqk"}> : () -> ()
    %cst_28 = arith.constant dense<0.000000e+00> : vector<1x8x8xf32>
    %73 = tpu.matmul %68, %70, %cst_28 {dimension_numbers = #tpu.dot_dimension_numbers<[2], [2], [1], [1], [0, 0, 0, 1, 1, 1], [0], [0]>} : vector<1x8x8xf32>, vector<1x8x8xf32>, vector<1x8x8xf32> -> vector<1x8x8xf32>
    "tpu.trace_stop"() : () -> ()
    %cst_29 = arith.constant dense<0xFF800000> : vector<1x8xf32>
    %74 = vector.multi_reduction <maximumf>, %73, %cst_29 [2] : vector<1x8x8xf32> to vector<1x8xf32>
    %75 = vector.shape_cast %74 : vector<1x8xf32> to vector<1x8x1xf32>
    %76 = vector.broadcast %75 : vector<1x8x1xf32> to vector<1x8x8xf32>
    %77 = arith.subf %73, %76 : vector<1x8x8xf32>
    %78 = math.exp %77 : vector<1x8x8xf32>
    %cst_30 = arith.constant dense<0.000000e+00> : vector<1x8xf32>
    %79 = vector.multi_reduction <add>, %78, %cst_30 [2] : vector<1x8x8xf32> to vector<1x8xf32>
    %80 = vector.shape_cast %79 : vector<1x8xf32> to vector<1x8x1xf32>
    %81 = vector.broadcast %80 : vector<1x8x1xf32> to vector<1x8x8xf32>
    %82 = arith.divf %78, %81 : vector<1x8x8xf32>
    %c0_31 = arith.constant 0 : index
    %c3 = arith.constant 3 : index
    %c0_32 = arith.constant 0 : index
    %c0_33 = arith.constant 0 : index
    %83 = vector.load %arg7[%c0_31, %c3, %c0_32, %c0_33] : memref<1x4x8x8xf32, #tpu.memory_space<vmem>>, vector<1x1x8x8xf32>
    %84 = vector.shape_cast %83 : vector<1x1x8x8xf32> to vector<1x8x8xf32>
    %85 = vector.shape_cast %82 : vector<1x8x8xf32> to vector<1x1x8x8xf32>
    tpu.vector_store %arg7[%c0_31, %c3, %c0_32, %c0_33], %85 {strides = array<i32>} : memref<1x4x8x8xf32, #tpu.memory_space<vmem>>, vector<1x1x8x8xf32>,
    "tpu.trace_start"() <{level = 10 : i32, message = "bqk,bkd->bqd"}> : () -> ()
    %cst_34 = arith.constant dense<0.000000e+00> : vector<1x8x8xf32>
    %86 = tpu.matmul %82, %72, %cst_34 {dimension_numbers = #tpu.dot_dimension_numbers<[2], [1], [1], [2], [0, 0, 0, 1, 1, 2], [0], [0]>} : vector<1x8x8xf32>, vector<1x8x8xf32>, vector<1x8x8xf32> -> vector<1x8x8xf32>
    "tpu.trace_stop"() : () -> ()
    %87 = tpu.concatenate %26, %46, %66, %86 in 2 : vector<1x8x8xf32>, vector<1x8x8xf32>, vector<1x8x8xf32>, vector<1x8x8xf32> -> vector<1x8x32xf32>
    %88 = vector.shape_cast %87 : vector<1x8x32xf32> to vector<8x32xf32>
    %c0_35 = arith.constant 0 : index
    %c0_36 = arith.constant 0 : index
    %89 = vector.load %arg4[%c0_35, %c0_36] : memref<32x32xf32, #tpu.memory_space<vmem>>, vector<32x32xf32>
    %cst_37 = arith.constant dense<0.000000e+00> : vector<8x32xf32>
    %90 = tpu.matmul %88, %89, %cst_37 {dimension_numbers = #tpu.dot_dimension_numbers<[1], [0], [0], [1], [0, 0, 1, 1], [], []>} : vector<8x32xf32>, vector<32x32xf32>, vector<8x32xf32> -> vector<8x32xf32>
    %c0_38 = arith.constant 0 : index
    %c0_39 = arith.constant 0 : index
    %91 = vector.load %arg5[%c0_38, %c0_39] : memref<1x32xf32, #tpu.memory_space<vmem>>, vector<1x32xf32>
    %92 = vector.broadcast %91 : vector<1x32xf32> to vector<8x32xf32>
    %93 = arith.addf %90, %92 : vector<8x32xf32>
    %94 = vector.shape_cast %93 : vector<8x32xf32> to vector<1x8x32xf32>
    %c0_40 = arith.constant 0 : index
    %c0_41 = arith.constant 0 : index
    %c0_42 = arith.constant 0 : index
    %95 = vector.load %arg6[%c0_40, %c0_41, %c0_42] : memref<1x8x32xf32, #tpu.memory_space<vmem>>, vector<1x8x32xf32>
    tpu.vector_store %arg6[%c0_40, %c0_41, %c0_42], %94 {strides = array<i32>} : memref<1x8x32xf32, #tpu.memory_space<vmem>>, vector<1x8x32xf32>,
    return
  }
  func.func @transform_0(%arg0: i32) -> (i32, i32, i32) {
    %c0_i32 = arith.constant 0 : i32
    %c0_i32_0 = arith.constant 0 : i32
    %c0_i32_1 = arith.constant 0 : i32
    return %arg0, %c0_i32, %c0_i32_0 : i32, i32, i32
  }
  func.func @transform_1(%arg0: i32) -> (i32, i32) {
    %c0_i32 = arith.constant 0 : i32
    %c0_i32_0 = arith.constant 0 : i32
    %c0_i32_1 = arith.constant 0 : i32
    return %c0_i32, %c0_i32_0 : i32, i32
  }
  func.func @transform_2(%arg0: i32) -> (i32, i32) {
    %c0_i32 = arith.constant 0 : i32
    %c0_i32_0 = arith.constant 0 : i32
    %c0_i32_1 = arith.constant 0 : i32
    return %c0_i32, %c0_i32_0 : i32, i32
  }
  func.func @transform_3(%arg0: i32) -> (i32, i32) {
    %c0_i32 = arith.constant 0 : i32
    %c0_i32_0 = arith.constant 0 : i32
    %c0_i32_1 = arith.constant 0 : i32
    return %c0_i32, %c0_i32_0 : i32, i32
  }
  func.func @transform_4(%arg0: i32) -> (i32, i32) {
    %c0_i32 = arith.constant 0 : i32
    %c0_i32_0 = arith.constant 0 : i32
    %c0_i32_1 = arith.constant 0 : i32
    return %c0_i32, %c0_i32_0 : i32, i32
  }
  func.func @transform_5(%arg0: i32) -> (i32, i32, i32) {
    %c0_i32 = arith.constant 0 : i32
    %c0_i32_0 = arith.constant 0 : i32
    %c0_i32_1 = arith.constant 0 : i32
    return %arg0, %c0_i32, %c0_i32_0 : i32, i32, i32
  }
  func.func @transform_6(%arg0: i32) -> (i32, i32, i32, i32) {
    %c0_i32 = arith.constant 0 : i32
    %c0_i32_0 = arith.constant 0 : i32
    %c0_i32_1 = arith.constant 0 : i32
    %c0_i32_2 = arith.constant 0 : i32
    return %arg0, %c0_i32, %c0_i32_0, %c0_i32_1 : i32, i32, i32, i32
  }
}

module attributes {stable_mosaic.version = 11 : i64} {
  func.func @kernel(%arg0: i32, %arg1: memref<1x8x32xf32, #tpu.memory_space<vmem>>, %arg2: memref<32x96xf32, #tpu.memory_space<vmem>>, %arg3: memref<1x96xf32, #tpu.memory_space<vmem>>, %arg4: memref<32x32xf32, #tpu.memory_space<vmem>>, %arg5: memref<1x32xf32, #tpu.memory_space<vmem>>, %arg6: memref<1x8x32xf32, #tpu.memory_space<vmem>>, %arg7: memref<1x4x8x8xf32, #tpu.memory_space<vmem>>, %arg8: memref<8x32xf32, #tpu.memory_space<vmem>>) attributes {dimension_semantics = [#tpu.dimension_semantics<parallel>], iteration_bounds = array<i64: 2>, scalar_prefetch = 0 : i64, scratch_operands = 1 : i64, tpu.core_type = #tpu.core_type<tc>, window_params = [{transform_indices = @transform_0, window_bounds = array<i64: 1, 8, 32>}, {pipeline_mode = #tpu.pipeline_mode<synchronous>, transform_indices = @transform_1, window_bounds = array<i64: 32, 96>}, {pipeline_mode = #tpu.pipeline_mode<synchronous>, transform_indices = @transform_2, window_bounds = array<i64: 1, 96>}, {pipeline_mode = #tpu.pipeline_mode<synchronous>, transform_indices = @transform_3, window_bounds = array<i64: 32, 32>}, {pipeline_mode = #tpu.pipeline_mode<synchronous>, transform_indices = @transform_4, window_bounds = array<i64: 1, 32>}, {transform_indices = @transform_5, window_bounds = array<i64: 1, 8, 32>}, {transform_indices = @transform_6, window_bounds = array<i64: 1, 4, 8, 8>}]} {
    %c0 = arith.constant 0 : index
    %c0_0 = arith.constant 0 : index
    %c0_1 = arith.constant 0 : index
    %0 = vector.load %arg1[%c0, %c0_0, %c0_1] : memref<1x8x32xf32, #tpu.memory_space<vmem>>, vector<1x8x32xf32>
    %1 = vector.shape_cast %0 : vector<1x8x32xf32> to vector<8x32xf32>
    %c0_2 = arith.constant 0 : index
    %c0_3 = arith.constant 0 : index
    %2 = vector.load %arg2[%c0_2, %c0_3] : memref<32x96xf32, #tpu.memory_space<vmem>>, vector<32x96xf32>
    %cst = arith.constant dense<0.000000e+00> : vector<8x96xf32>
    %3 = tpu.matmul %1, %2, %cst {dimension_numbers = #tpu.dot_dimension_numbers<[1], [0], [0], [1], [0, 0, 1, 1], [], []>} : vector<8x32xf32>, vector<32x96xf32>, vector<8x96xf32> -> vector<8x96xf32>
    %c0_4 = arith.constant 0 : index
    %c0_5 = arith.constant 0 : index
    %4 = vector.load %arg3[%c0_4, %c0_5] : memref<1x96xf32, #tpu.memory_space<vmem>>, vector<1x96xf32>
    %5 = vector.broadcast %4 : vector<1x96xf32> to vector<8x96xf32>
    %6 = arith.addf %3, %5 : vector<8x96xf32>
    %7 = vector.extract_strided_slice %6 {offsets = [0, 0], sizes = [8, 8], strides = [1, 1]} : vector<8x96xf32> to vector<8x8xf32>
    %8 = vector.shape_cast %7 : vector<8x8xf32> to vector<1x8x8xf32>
    %9 = vector.extract_strided_slice %6 {offsets = [0, 32], sizes = [8, 8], strides = [1, 1]} : vector<8x96xf32> to vector<8x8xf32>
    %10 = vector.shape_cast %9 : vector<8x8xf32> to vector<1x8x8xf32>
    %11 = vector.extract_strided_slice %6 {offsets = [0, 64], sizes = [8, 8], strides = [1, 1]} : vector<8x96xf32> to vector<8x8xf32>
    %12 = vector.shape_cast %11 : vector<8x8xf32> to vector<1x8x8xf32>
    "tpu.trace_start"() <{level = 10 : i32, message = "bqd,bkd->bqk"}> : () -> ()
    %cst_6 = arith.constant dense<0.000000e+00> : vector<1x8x8xf32>
    %13 = tpu.matmul %8, %10, %cst_6 {dimension_numbers = #tpu.dot_dimension_numbers<[2], [2], [1], [1], [0, 0, 0, 1, 1, 1], [0], [0]>} : vector<1x8x8xf32>, vector<1x8x8xf32>, vector<1x8x8xf32> -> vector<1x8x8xf32>
    "tpu.trace_stop"() : () -> ()
    %cst_7 = arith.constant dense<0xFF800000> : vector<1x8xf32>
    %14 = vector.multi_reduction <maximumf>, %13, %cst_7 [2] : vector<1x8x8xf32> to vector<1x8xf32>
    %15 = vector.shape_cast %14 : vector<1x8xf32> to vector<1x8x1xf32>
    %16 = vector.broadcast %15 : vector<1x8x1xf32> to vector<1x8x8xf32>
    %17 = arith.subf %13, %16 : vector<1x8x8xf32>
    %18 = math.exp %17 : vector<1x8x8xf32>
    %cst_8 = arith.constant dense<0.000000e+00> : vector<1x8xf32>
    %19 = vector.multi_reduction <add>, %18, %cst_8 [2] : vector<1x8x8xf32> to vector<1x8xf32>
    %20 = vector.shape_cast %19 : vector<1x8xf32> to vector<1x8x1xf32>
    %21 = vector.broadcast %20 : vector<1x8x1xf32> to vector<1x8x8xf32>
    %22 = arith.divf %18, %21 : vector<1x8x8xf32>
    %c0_9 = arith.constant 0 : index
    %c0_10 = arith.constant 0 : index
    %c0_11 = arith.constant 0 : index
    %c0_12 = arith.constant 0 : index
    %23 = vector.load %arg7[%c0_9, %c0_10, %c0_11, %c0_12] : memref<1x4x8x8xf32, #tpu.memory_space<vmem>>, vector<1x1x8x8xf32>
    %24 = vector.shape_cast %23 : vector<1x1x8x8xf32> to vector<1x8x8xf32>
    %25 = vector.shape_cast %22 : vector<1x8x8xf32> to vector<1x1x8x8xf32>
    tpu.vector_store %arg7[%c0_9, %c0_10, %c0_11, %c0_12], %25 {strides = array<i32>} : memref<1x4x8x8xf32, #tpu.memory_space<vmem>>, vector<1x1x8x8xf32>,
    "tpu.trace_start"() <{level = 10 : i32, message = "bqk,bkd->bqd"}> : () -> ()
    %cst_13 = arith.constant dense<0.000000e+00> : vector<1x8x8xf32>
    %26 = tpu.matmul %22, %12, %cst_13 {dimension_numbers = #tpu.dot_dimension_numbers<[2], [1], [1], [2], [0, 0, 0, 1, 1, 2], [0], [0]>} : vector<1x8x8xf32>, vector<1x8x8xf32>, vector<1x8x8xf32> -> vector<1x8x8xf32>
    "tpu.trace_stop"() : () -> ()
    %27 = vector.shape_cast %26 : vector<1x8x8xf32> to vector<8x8xf32>
    %c0_14 = arith.constant 0 : index
    %c0_15 = arith.constant 0 : index
    %28 = vector.load %arg8[%c0_14, %c0_15] : memref<8x32xf32, #tpu.memory_space<vmem>>, vector<8x8xf32>
    tpu.vector_store %arg8[%c0_14, %c0_15], %27 {strides = array<i32>} : memref<8x32xf32, #tpu.memory_space<vmem>>, vector<8x8xf32>,
    %29 = vector.extract_strided_slice %6 {offsets = [0, 8], sizes = [8, 8], strides = [1, 1]} : vector<8x96xf32> to vector<8x8xf32>
    %30 = vector.shape_cast %29 : vector<8x8xf32> to vector<1x8x8xf32>
    %31 = vector.extract_strided_slice %6 {offsets = [0, 40], sizes = [8, 8], strides = [1, 1]} : vector<8x96xf32> to vector<8x8xf32>
    %32 = vector.shape_cast %31 : vector<8x8xf32> to vector<1x8x8xf32>
    %33 = vector.extract_strided_slice %6 {offsets = [0, 72], sizes = [8, 8], strides = [1, 1]} : vector<8x96xf32> to vector<8x8xf32>
    %34 = vector.shape_cast %33 : vector<8x8xf32> to vector<1x8x8xf32>
    "tpu.trace_start"() <{level = 10 : i32, message = "bqd,bkd->bqk"}> : () -> ()
    %cst_16 = arith.constant dense<0.000000e+00> : vector<1x8x8xf32>
    %35 = tpu.matmul %30, %32, %cst_16 {dimension_numbers = #tpu.dot_dimension_numbers<[2], [2], [1], [1], [0, 0, 0, 1, 1, 1], [0], [0]>} : vector<1x8x8xf32>, vector<1x8x8xf32>, vector<1x8x8xf32> -> vector<1x8x8xf32>
    "tpu.trace_stop"() : () -> ()
    %cst_17 = arith.constant dense<0xFF800000> : vector<1x8xf32>
    %36 = vector.multi_reduction <maximumf>, %35, %cst_17 [2] : vector<1x8x8xf32> to vector<1x8xf32>
    %37 = vector.shape_cast %36 : vector<1x8xf32> to vector<1x8x1xf32>
    %38 = vector.broadcast %37 : vector<1x8x1xf32> to vector<1x8x8xf32>
    %39 = arith.subf %35, %38 : vector<1x8x8xf32>
    %40 = math.exp %39 : vector<1x8x8xf32>
    %cst_18 = arith.constant dense<0.000000e+00> : vector<1x8xf32>
    %41 = vector.multi_reduction <add>, %40, %cst_18 [2] : vector<1x8x8xf32> to vector<1x8xf32>
    %42 = vector.shape_cast %41 : vector<1x8xf32> to vector<1x8x1xf32>
    %43 = vector.broadcast %42 : vector<1x8x1xf32> to vector<1x8x8xf32>
    %44 = arith.divf %40, %43 : vector<1x8x8xf32>
    %c0_19 = arith.constant 0 : index
    %c1 = arith.constant 1 : index
    %c0_20 = arith.constant 0 : index
    %c0_21 = arith.constant 0 : index
    %45 = vector.load %arg7[%c0_19, %c1, %c0_20, %c0_21] : memref<1x4x8x8xf32, #tpu.memory_space<vmem>>, vector<1x1x8x8xf32>
    %46 = vector.shape_cast %45 : vector<1x1x8x8xf32> to vector<1x8x8xf32>
    %47 = vector.shape_cast %44 : vector<1x8x8xf32> to vector<1x1x8x8xf32>
    tpu.vector_store %arg7[%c0_19, %c1, %c0_20, %c0_21], %47 {strides = array<i32>} : memref<1x4x8x8xf32, #tpu.memory_space<vmem>>, vector<1x1x8x8xf32>,
    "tpu.trace_start"() <{level = 10 : i32, message = "bqk,bkd->bqd"}> : () -> ()
    %cst_22 = arith.constant dense<0.000000e+00> : vector<1x8x8xf32>
    %48 = tpu.matmul %44, %34, %cst_22 {dimension_numbers = #tpu.dot_dimension_numbers<[2], [1], [1], [2], [0, 0, 0, 1, 1, 2], [0], [0]>} : vector<1x8x8xf32>, vector<1x8x8xf32>, vector<1x8x8xf32> -> vector<1x8x8xf32>
    "tpu.trace_stop"() : () -> ()
    %49 = vector.shape_cast %48 : vector<1x8x8xf32> to vector<8x8xf32>
    %c0_23 = arith.constant 0 : index
    %c8 = arith.constant 8 : index
    %50 = vector.load %arg8[%c0_23, %c8] : memref<8x32xf32, #tpu.memory_space<vmem>>, vector<8x8xf32>
    tpu.vector_store %arg8[%c0_23, %c8], %49 {strides = array<i32>} : memref<8x32xf32, #tpu.memory_space<vmem>>, vector<8x8xf32>,
    %51 = vector.extract_strided_slice %6 {offsets = [0, 16], sizes = [8, 8], strides = [1, 1]} : vector<8x96xf32> to vector<8x8xf32>
    %52 = vector.shape_cast %51 : vector<8x8xf32> to vector<1x8x8xf32>
    %53 = vector.extract_strided_slice %6 {offsets = [0, 48], sizes = [8, 8], strides = [1, 1]} : vector<8x96xf32> to vector<8x8xf32>
    %54 = vector.shape_cast %53 : vector<8x8xf32> to vector<1x8x8xf32>
    %55 = vector.extract_strided_slice %6 {offsets = [0, 80], sizes = [8, 8], strides = [1, 1]} : vector<8x96xf32> to vector<8x8xf32>
    %56 = vector.shape_cast %55 : vector<8x8xf32> to vector<1x8x8xf32>
    "tpu.trace_start"() <{level = 10 : i32, message = "bqd,bkd->bqk"}> : () -> ()
    %cst_24 = arith.constant dense<0.000000e+00> : vector<1x8x8xf32>
    %57 = tpu.matmul %52, %54, %cst_24 {dimension_numbers = #tpu.dot_dimension_numbers<[2], [2], [1], [1], [0, 0, 0, 1, 1, 1], [0], [0]>} : vector<1x8x8xf32>, vector<1x8x8xf32>, vector<1x8x8xf32> -> vector<1x8x8xf32>
    "tpu.trace_stop"() : () -> ()
    %cst_25 = arith.constant dense<0xFF800000> : vector<1x8xf32>
    %58 = vector.multi_reduction <maximumf>, %57, %cst_25 [2] : vector<1x8x8xf32> to vector<1x8xf32>
    %59 = vector.shape_cast %58 : vector<1x8xf32> to vector<1x8x1xf32>
    %60 = vector.broadcast %59 : vector<1x8x1xf32> to vector<1x8x8xf32>
    %61 = arith.subf %57, %60 : vector<1x8x8xf32>
    %62 = math.exp %61 : vector<1x8x8xf32>
    %cst_26 = arith.constant dense<0.000000e+00> : vector<1x8xf32>
    %63 = vector.multi_reduction <add>, %62, %cst_26 [2] : vector<1x8x8xf32> to vector<1x8xf32>
    %64 = vector.shape_cast %63 : vector<1x8xf32> to vector<1x8x1xf32>
    %65 = vector.broadcast %64 : vector<1x8x1xf32> to vector<1x8x8xf32>
    %66 = arith.divf %62, %65 : vector<1x8x8xf32>
    %c0_27 = arith.constant 0 : index
    %c2 = arith.constant 2 : index
    %c0_28 = arith.constant 0 : index
    %c0_29 = arith.constant 0 : index
    %67 = vector.load %arg7[%c0_27, %c2, %c0_28, %c0_29] : memref<1x4x8x8xf32, #tpu.memory_space<vmem>>, vector<1x1x8x8xf32>
    %68 = vector.shape_cast %67 : vector<1x1x8x8xf32> to vector<1x8x8xf32>
    %69 = vector.shape_cast %66 : vector<1x8x8xf32> to vector<1x1x8x8xf32>
    tpu.vector_store %arg7[%c0_27, %c2, %c0_28, %c0_29], %69 {strides = array<i32>} : memref<1x4x8x8xf32, #tpu.memory_space<vmem>>, vector<1x1x8x8xf32>,
    "tpu.trace_start"() <{level = 10 : i32, message = "bqk,bkd->bqd"}> : () -> ()
    %cst_30 = arith.constant dense<0.000000e+00> : vector<1x8x8xf32>
    %70 = tpu.matmul %66, %56, %cst_30 {dimension_numbers = #tpu.dot_dimension_numbers<[2], [1], [1], [2], [0, 0, 0, 1, 1, 2], [0], [0]>} : vector<1x8x8xf32>, vector<1x8x8xf32>, vector<1x8x8xf32> -> vector<1x8x8xf32>
    "tpu.trace_stop"() : () -> ()
    %71 = vector.shape_cast %70 : vector<1x8x8xf32> to vector<8x8xf32>
    %c0_31 = arith.constant 0 : index
    %c16 = arith.constant 16 : index
    %72 = vector.load %arg8[%c0_31, %c16] : memref<8x32xf32, #tpu.memory_space<vmem>>, vector<8x8xf32>
    tpu.vector_store %arg8[%c0_31, %c16], %71 {strides = array<i32>} : memref<8x32xf32, #tpu.memory_space<vmem>>, vector<8x8xf32>,
    %73 = vector.extract_strided_slice %6 {offsets = [0, 24], sizes = [8, 8], strides = [1, 1]} : vector<8x96xf32> to vector<8x8xf32>
    %74 = vector.shape_cast %73 : vector<8x8xf32> to vector<1x8x8xf32>
    %75 = vector.extract_strided_slice %6 {offsets = [0, 56], sizes = [8, 8], strides = [1, 1]} : vector<8x96xf32> to vector<8x8xf32>
    %76 = vector.shape_cast %75 : vector<8x8xf32> to vector<1x8x8xf32>
    %77 = vector.extract_strided_slice %6 {offsets = [0, 88], sizes = [8, 8], strides = [1, 1]} : vector<8x96xf32> to vector<8x8xf32>
    %78 = vector.shape_cast %77 : vector<8x8xf32> to vector<1x8x8xf32>
    "tpu.trace_start"() <{level = 10 : i32, message = "bqd,bkd->bqk"}> : () -> ()
    %cst_32 = arith.constant dense<0.000000e+00> : vector<1x8x8xf32>
    %79 = tpu.matmul %74, %76, %cst_32 {dimension_numbers = #tpu.dot_dimension_numbers<[2], [2], [1], [1], [0, 0, 0, 1, 1, 1], [0], [0]>} : vector<1x8x8xf32>, vector<1x8x8xf32>, vector<1x8x8xf32> -> vector<1x8x8xf32>
    "tpu.trace_stop"() : () -> ()
    %cst_33 = arith.constant dense<0xFF800000> : vector<1x8xf32>
    %80 = vector.multi_reduction <maximumf>, %79, %cst_33 [2] : vector<1x8x8xf32> to vector<1x8xf32>
    %81 = vector.shape_cast %80 : vector<1x8xf32> to vector<1x8x1xf32>
    %82 = vector.broadcast %81 : vector<1x8x1xf32> to vector<1x8x8xf32>
    %83 = arith.subf %79, %82 : vector<1x8x8xf32>
    %84 = math.exp %83 : vector<1x8x8xf32>
    %cst_34 = arith.constant dense<0.000000e+00> : vector<1x8xf32>
    %85 = vector.multi_reduction <add>, %84, %cst_34 [2] : vector<1x8x8xf32> to vector<1x8xf32>
    %86 = vector.shape_cast %85 : vector<1x8xf32> to vector<1x8x1xf32>
    %87 = vector.broadcast %86 : vector<1x8x1xf32> to vector<1x8x8xf32>
    %88 = arith.divf %84, %87 : vector<1x8x8xf32>
    %c0_35 = arith.constant 0 : index
    %c3 = arith.constant 3 : index
    %c0_36 = arith.constant 0 : index
    %c0_37 = arith.constant 0 : index
    %89 = vector.load %arg7[%c0_35, %c3, %c0_36, %c0_37] : memref<1x4x8x8xf32, #tpu.memory_space<vmem>>, vector<1x1x8x8xf32>
    %90 = vector.shape_cast %89 : vector<1x1x8x8xf32> to vector<1x8x8xf32>
    %91 = vector.shape_cast %88 : vector<1x8x8xf32> to vector<1x1x8x8xf32>
    tpu.vector_store %arg7[%c0_35, %c3, %c0_36, %c0_37], %91 {strides = array<i32>} : memref<1x4x8x8xf32, #tpu.memory_space<vmem>>, vector<1x1x8x8xf32>,
    "tpu.trace_start"() <{level = 10 : i32, message = "bqk,bkd->bqd"}> : () -> ()
    %cst_38 = arith.constant dense<0.000000e+00> : vector<1x8x8xf32>
    %92 = tpu.matmul %88, %78, %cst_38 {dimension_numbers = #tpu.dot_dimension_numbers<[2], [1], [1], [2], [0, 0, 0, 1, 1, 2], [0], [0]>} : vector<1x8x8xf32>, vector<1x8x8xf32>, vector<1x8x8xf32> -> vector<1x8x8xf32>
    "tpu.trace_stop"() : () -> ()
    %93 = vector.shape_cast %92 : vector<1x8x8xf32> to vector<8x8xf32>
    %c0_39 = arith.constant 0 : index
    %c24 = arith.constant 24 : index
    %94 = vector.load %arg8[%c0_39, %c24] : memref<8x32xf32, #tpu.memory_space<vmem>>, vector<8x8xf32>
    tpu.vector_store %arg8[%c0_39, %c24], %93 {strides = array<i32>} : memref<8x32xf32, #tpu.memory_space<vmem>>, vector<8x8xf32>,
    %c0_40 = arith.constant 0 : index
    %c0_41 = arith.constant 0 : index
    %95 = vector.load %arg8[%c0_40, %c0_41] : memref<8x32xf32, #tpu.memory_space<vmem>>, vector<8x32xf32>
    %c0_42 = arith.constant 0 : index
    %c0_43 = arith.constant 0 : index
    %96 = vector.load %arg4[%c0_42, %c0_43] : memref<32x32xf32, #tpu.memory_space<vmem>>, vector<32x32xf32>
    %cst_44 = arith.constant dense<0.000000e+00> : vector<8x32xf32>
    %97 = tpu.matmul %95, %96, %cst_44 {dimension_numbers = #tpu.dot_dimension_numbers<[1], [0], [0], [1], [0, 0, 1, 1], [], []>} : vector<8x32xf32>, vector<32x32xf32>, vector<8x32xf32> -> vector<8x32xf32>
    %c0_45 = arith.constant 0 : index
    %c0_46 = arith.constant 0 : index
    %98 = vector.load %arg5[%c0_45, %c0_46] : memref<1x32xf32, #tpu.memory_space<vmem>>, vector<1x32xf32>
    %99 = vector.broadcast %98 : vector<1x32xf32> to vector<8x32xf32>
    %100 = arith.addf %97, %99 : vector<8x32xf32>
    %101 = vector.shape_cast %100 : vector<8x32xf32> to vector<1x8x32xf32>
    %c0_47 = arith.constant 0 : index
    %c0_48 = arith.constant 0 : index
    %c0_49 = arith.constant 0 : index
    %102 = vector.load %arg6[%c0_47, %c0_48, %c0_49] : memref<1x8x32xf32, #tpu.memory_space<vmem>>, vector<1x8x32xf32>
    tpu.vector_store %arg6[%c0_47, %c0_48, %c0_49], %101 {strides = array<i32>} : memref<1x8x32xf32, #tpu.memory_space<vmem>>, vector<1x8x32xf32>,
    return
  }
  func.func @transform_0(%arg0: i32) -> (i32, i32, i32) {
    %c0_i32 = arith.constant 0 : i32
    %c0_i32_0 = arith.constant 0 : i32
    %c0_i32_1 = arith.constant 0 : i32
    return %arg0, %c0_i32, %c0_i32_0 : i32, i32, i32
  }
  func.func @transform_1(%arg0: i32) -> (i32, i32) {
    %c0_i32 = arith.constant 0 : i32
    %c0_i32_0 = arith.constant 0 : i32
    %c0_i32_1 = arith.constant 0 : i32
    return %c0_i32, %c0_i32_0 : i32, i32
  }
  func.func @transform_2(%arg0: i32) -> (i32, i32) {
    %c0_i32 = arith.constant 0 : i32
    %c0_i32_0 = arith.constant 0 : i32
    %c0_i32_1 = arith.constant 0 : i32
    return %c0_i32, %c0_i32_0 : i32, i32
  }
  func.func @transform_3(%arg0: i32) -> (i32, i32) {
    %c0_i32 = arith.constant 0 : i32
    %c0_i32_0 = arith.constant 0 : i32
    %c0_i32_1 = arith.constant 0 : i32
    return %c0_i32, %c0_i32_0 : i32, i32
  }
  func.func @transform_4(%arg0: i32) -> (i32, i32) {
    %c0_i32 = arith.constant 0 : i32
    %c0_i32_0 = arith.constant 0 : i32
    %c0_i32_1 = arith.constant 0 : i32
    return %c0_i32, %c0_i32_0 : i32, i32
  }
  func.func @transform_5(%arg0: i32) -> (i32, i32, i32) {
    %c0_i32 = arith.constant 0 : i32
    %c0_i32_0 = arith.constant 0 : i32
    %c0_i32_1 = arith.constant 0 : i32
    return %arg0, %c0_i32, %c0_i32_0 : i32, i32, i32
  }
  func.func @transform_6(%arg0: i32) -> (i32, i32, i32, i32) {
    %c0_i32 = arith.constant 0 : i32
    %c0_i32_0 = arith.constant 0 : i32
    %c0_i32_1 = arith.constant 0 : i32
    %c0_i32_2 = arith.constant 0 : i32
    return %arg0, %c0_i32, %c0_i32_0, %c0_i32_1 : i32, i32, i32, i32
  }
}

module attributes {stable_mosaic.version = 11 : i64} {
  func.func @kernel(%arg0: i32, %arg1: memref<1x8x32xf32, #tpu.memory_space<vmem>>, %arg2: memref<32x96xf32, #tpu.memory_space<vmem>>, %arg3: memref<1x96xf32, #tpu.memory_space<vmem>>, %arg4: memref<32x32xf32, #tpu.memory_space<vmem>>, %arg5: memref<1x32xf32, #tpu.memory_space<vmem>>, %arg6: memref<1x8x32xf32, #tpu.memory_space<vmem>>, %arg7: memref<1x4x8x8xf32, #tpu.memory_space<vmem>>, %arg8: memref<8x32xf32, #tpu.memory_space<vmem>>) attributes {dimension_semantics = [#tpu.dimension_semantics<parallel>], iteration_bounds = array<i64: 2>, scalar_prefetch = 0 : i64, scratch_operands = 1 : i64, tpu.core_type = #tpu.core_type<tc>, window_params = [{transform_indices = @transform_0, window_bounds = array<i64: 1, 8, 32>}, {pipeline_mode = #tpu.pipeline_mode<synchronous>, transform_indices = @transform_1, window_bounds = array<i64: 32, 96>}, {pipeline_mode = #tpu.pipeline_mode<synchronous>, transform_indices = @transform_2, window_bounds = array<i64: 1, 96>}, {pipeline_mode = #tpu.pipeline_mode<synchronous>, transform_indices = @transform_3, window_bounds = array<i64: 32, 32>}, {pipeline_mode = #tpu.pipeline_mode<synchronous>, transform_indices = @transform_4, window_bounds = array<i64: 1, 32>}, {transform_indices = @transform_5, window_bounds = array<i64: 1, 8, 32>}, {transform_indices = @transform_6, window_bounds = array<i64: 1, 4, 8, 8>}]} {
    %c0 = arith.constant 0 : index
    %c0_0 = arith.constant 0 : index
    %c0_1 = arith.constant 0 : index
    %0 = vector.load %arg1[%c0, %c0_0, %c0_1] : memref<1x8x32xf32, #tpu.memory_space<vmem>>, vector<1x8x32xf32>
    %1 = vector.shape_cast %0 : vector<1x8x32xf32> to vector<8x32xf32>
    %c0_2 = arith.constant 0 : index
    %c0_3 = arith.constant 0 : index
    %2 = vector.load %arg2[%c0_2, %c0_3] : memref<32x96xf32, #tpu.memory_space<vmem>>, vector<32x96xf32>
    %cst = arith.constant dense<0.000000e+00> : vector<8x96xf32>
    %3 = tpu.matmul %1, %2, %cst {dimension_numbers = #tpu.dot_dimension_numbers<[1], [0], [0], [1], [0, 0, 1, 1], [], []>} : vector<8x32xf32>, vector<32x96xf32>, vector<8x96xf32> -> vector<8x96xf32>
    %c0_4 = arith.constant 0 : index
    %c0_5 = arith.constant 0 : index
    %4 = vector.load %arg3[%c0_4, %c0_5] : memref<1x96xf32, #tpu.memory_space<vmem>>, vector<1x96xf32>
    %5 = vector.broadcast %4 : vector<1x96xf32> to vector<8x96xf32>
    %6 = arith.addf %3, %5 : vector<8x96xf32>
    %7 = vector.extract_strided_slice %6 {offsets = [0, 0], sizes = [8, 8], strides = [1, 1]} : vector<8x96xf32> to vector<8x8xf32>
    %8 = vector.shape_cast %7 : vector<8x8xf32> to vector<1x8x8xf32>
    %9 = vector.extract_strided_slice %6 {offsets = [0, 32], sizes = [8, 8], strides = [1, 1]} : vector<8x96xf32> to vector<8x8xf32>
    %10 = vector.shape_cast %9 : vector<8x8xf32> to vector<1x8x8xf32>
    %11 = vector.extract_strided_slice %6 {offsets = [0, 64], sizes = [8, 8], strides = [1, 1]} : vector<8x96xf32> to vector<8x8xf32>
    %12 = vector.shape_cast %11 : vector<8x8xf32> to vector<1x8x8xf32>
    "tpu.trace_start"() <{level = 10 : i32, message = "bqd,bkd->bqk"}> : () -> ()
    %cst_6 = arith.constant dense<0.000000e+00> : vector<1x8x8xf32>
    %13 = tpu.matmul %8, %10, %cst_6 {dimension_numbers = #tpu.dot_dimension_numbers<[2], [2], [1], [1], [0, 0, 0, 1, 1, 1], [0], [0]>} : vector<1x8x8xf32>, vector<1x8x8xf32>, vector<1x8x8xf32> -> vector<1x8x8xf32>
    "tpu.trace_stop"() : () -> ()
    %cst_7 = arith.constant dense<0xFF800000> : vector<1x8xf32>
    %14 = vector.multi_reduction <maximumf>, %13, %cst_7 [2] : vector<1x8x8xf32> to vector<1x8xf32>
    %15 = vector.shape_cast %14 : vector<1x8xf32> to vector<1x8x1xf32>
    %16 = vector.broadcast %15 : vector<1x8x1xf32> to vector<1x8x8xf32>
    %17 = arith.subf %13, %16 : vector<1x8x8xf32>
    %18 = math.exp %17 : vector<1x8x8xf32>
    %cst_8 = arith.constant dense<0.000000e+00> : vector<1x8xf32>
    %19 = vector.multi_reduction <add>, %18, %cst_8 [2] : vector<1x8x8xf32> to vector<1x8xf32>
    %20 = vector.shape_cast %19 : vector<1x8xf32> to vector<1x8x1xf32>
    %21 = vector.broadcast %20 : vector<1x8x1xf32> to vector<1x8x8xf32>
    %22 = arith.divf %18, %21 : vector<1x8x8xf32>
    %c0_9 = arith.constant 0 : index
    %c0_10 = arith.constant 0 : index
    %c0_11 = arith.constant 0 : index
    %c0_12 = arith.constant 0 : index
    %23 = vector.load %arg7[%c0_9, %c0_10, %c0_11, %c0_12] : memref<1x4x8x8xf32, #tpu.memory_space<vmem>>, vector<1x1x8x8xf32>
    %24 = vector.shape_cast %23 : vector<1x1x8x8xf32> to vector<1x8x8xf32>
    %25 = vector.shape_cast %22 : vector<1x8x8xf32> to vector<1x1x8x8xf32>
    tpu.vector_store %arg7[%c0_9, %c0_10, %c0_11, %c0_12], %25 {strides = array<i32>} : memref<1x4x8x8xf32, #tpu.memory_space<vmem>>, vector<1x1x8x8xf32>,
    "tpu.trace_start"() <{level = 10 : i32, message = "bqk,bkd->bqd"}> : () -> ()
    %cst_13 = arith.constant dense<0.000000e+00> : vector<1x8x8xf32>
    %26 = tpu.matmul %22, %12, %cst_13 {dimension_numbers = #tpu.dot_dimension_numbers<[2], [1], [1], [2], [0, 0, 0, 1, 1, 2], [0], [0]>} : vector<1x8x8xf32>, vector<1x8x8xf32>, vector<1x8x8xf32> -> vector<1x8x8xf32>
    "tpu.trace_stop"() : () -> ()
    %27 = vector.shape_cast %26 : vector<1x8x8xf32> to vector<8x8xf32>
    %c0_14 = arith.constant 0 : index
    %c0_15 = arith.constant 0 : index
    %28 = vector.load %arg8[%c0_14, %c0_15] : memref<8x32xf32, #tpu.memory_space<vmem>>, vector<8x8xf32>
    tpu.vector_store %arg8[%c0_14, %c0_15], %27 {strides = array<i32>} : memref<8x32xf32, #tpu.memory_space<vmem>>, vector<8x8xf32>,
    %29 = vector.extract_strided_slice %6 {offsets = [0, 8], sizes = [8, 8], strides = [1, 1]} : vector<8x96xf32> to vector<8x8xf32>
    %30 = vector.shape_cast %29 : vector<8x8xf32> to vector<1x8x8xf32>
    %31 = vector.extract_strided_slice %6 {offsets = [0, 40], sizes = [8, 8], strides = [1, 1]} : vector<8x96xf32> to vector<8x8xf32>
    %32 = vector.shape_cast %31 : vector<8x8xf32> to vector<1x8x8xf32>
    %33 = vector.extract_strided_slice %6 {offsets = [0, 72], sizes = [8, 8], strides = [1, 1]} : vector<8x96xf32> to vector<8x8xf32>
    %34 = vector.shape_cast %33 : vector<8x8xf32> to vector<1x8x8xf32>
    "tpu.trace_start"() <{level = 10 : i32, message = "bqd,bkd->bqk"}> : () -> ()
    %cst_16 = arith.constant dense<0.000000e+00> : vector<1x8x8xf32>
    %35 = tpu.matmul %30, %32, %cst_16 {dimension_numbers = #tpu.dot_dimension_numbers<[2], [2], [1], [1], [0, 0, 0, 1, 1, 1], [0], [0]>} : vector<1x8x8xf32>, vector<1x8x8xf32>, vector<1x8x8xf32> -> vector<1x8x8xf32>
    "tpu.trace_stop"() : () -> ()
    %cst_17 = arith.constant dense<0xFF800000> : vector<1x8xf32>
    %36 = vector.multi_reduction <maximumf>, %35, %cst_17 [2] : vector<1x8x8xf32> to vector<1x8xf32>
    %37 = vector.shape_cast %36 : vector<1x8xf32> to vector<1x8x1xf32>
    %38 = vector.broadcast %37 : vector<1x8x1xf32> to vector<1x8x8xf32>
    %39 = arith.subf %35, %38 : vector<1x8x8xf32>
    %40 = math.exp %39 : vector<1x8x8xf32>
    %cst_18 = arith.constant dense<0.000000e+00> : vector<1x8xf32>
    %41 = vector.multi_reduction <add>, %40, %cst_18 [2] : vector<1x8x8xf32> to vector<1x8xf32>
    %42 = vector.shape_cast %41 : vector<1x8xf32> to vector<1x8x1xf32>
    %43 = vector.broadcast %42 : vector<1x8x1xf32> to vector<1x8x8xf32>
    %44 = arith.divf %40, %43 : vector<1x8x8xf32>
    %c0_19 = arith.constant 0 : index
    %c1 = arith.constant 1 : index
    %c0_20 = arith.constant 0 : index
    %c0_21 = arith.constant 0 : index
    %45 = vector.load %arg7[%c0_19, %c1, %c0_20, %c0_21] : memref<1x4x8x8xf32, #tpu.memory_space<vmem>>, vector<1x1x8x8xf32>
    %46 = vector.shape_cast %45 : vector<1x1x8x8xf32> to vector<1x8x8xf32>
    %47 = vector.shape_cast %44 : vector<1x8x8xf32> to vector<1x1x8x8xf32>
    tpu.vector_store %arg7[%c0_19, %c1, %c0_20, %c0_21], %47 {strides = array<i32>} : memref<1x4x8x8xf32, #tpu.memory_space<vmem>>, vector<1x1x8x8xf32>,
    "tpu.trace_start"() <{level = 10 : i32, message = "bqk,bkd->bqd"}> : () -> ()
    %cst_22 = arith.constant dense<0.000000e+00> : vector<1x8x8xf32>
    %48 = tpu.matmul %44, %34, %cst_22 {dimension_numbers = #tpu.dot_dimension_numbers<[2], [1], [1], [2], [0, 0, 0, 1, 1, 2], [0], [0]>} : vector<1x8x8xf32>, vector<1x8x8xf32>, vector<1x8x8xf32> -> vector<1x8x8xf32>
    "tpu.trace_stop"() : () -> ()
    %49 = vector.shape_cast %48 : vector<1x8x8xf32> to vector<8x8xf32>
    %c0_23 = arith.constant 0 : index
    %c8 = arith.constant 8 : index
    %50 = vector.load %arg8[%c0_23, %c8] : memref<8x32xf32, #tpu.memory_space<vmem>>, vector<8x8xf32>
    tpu.vector_store %arg8[%c0_23, %c8], %49 {strides = array<i32>} : memref<8x32xf32, #tpu.memory_space<vmem>>, vector<8x8xf32>,
    %51 = vector.extract_strided_slice %6 {offsets = [0, 16], sizes = [8, 8], strides = [1, 1]} : vector<8x96xf32> to vector<8x8xf32>
    %52 = vector.shape_cast %51 : vector<8x8xf32> to vector<1x8x8xf32>
    %53 = vector.extract_strided_slice %6 {offsets = [0, 48], sizes = [8, 8], strides = [1, 1]} : vector<8x96xf32> to vector<8x8xf32>
    %54 = vector.shape_cast %53 : vector<8x8xf32> to vector<1x8x8xf32>
    %55 = vector.extract_strided_slice %6 {offsets = [0, 80], sizes = [8, 8], strides = [1, 1]} : vector<8x96xf32> to vector<8x8xf32>
    %56 = vector.shape_cast %55 : vector<8x8xf32> to vector<1x8x8xf32>
    "tpu.trace_start"() <{level = 10 : i32, message = "bqd,bkd->bqk"}> : () -> ()
    %cst_24 = arith.constant dense<0.000000e+00> : vector<1x8x8xf32>
    %57 = tpu.matmul %52, %54, %cst_24 {dimension_numbers = #tpu.dot_dimension_numbers<[2], [2], [1], [1], [0, 0, 0, 1, 1, 1], [0], [0]>} : vector<1x8x8xf32>, vector<1x8x8xf32>, vector<1x8x8xf32> -> vector<1x8x8xf32>
    "tpu.trace_stop"() : () -> ()
    %cst_25 = arith.constant dense<0xFF800000> : vector<1x8xf32>
    %58 = vector.multi_reduction <maximumf>, %57, %cst_25 [2] : vector<1x8x8xf32> to vector<1x8xf32>
    %59 = vector.shape_cast %58 : vector<1x8xf32> to vector<1x8x1xf32>
    %60 = vector.broadcast %59 : vector<1x8x1xf32> to vector<1x8x8xf32>
    %61 = arith.subf %57, %60 : vector<1x8x8xf32>
    %62 = math.exp %61 : vector<1x8x8xf32>
    %cst_26 = arith.constant dense<0.000000e+00> : vector<1x8xf32>
    %63 = vector.multi_reduction <add>, %62, %cst_26 [2] : vector<1x8x8xf32> to vector<1x8xf32>
    %64 = vector.shape_cast %63 : vector<1x8xf32> to vector<1x8x1xf32>
    %65 = vector.broadcast %64 : vector<1x8x1xf32> to vector<1x8x8xf32>
    %66 = arith.divf %62, %65 : vector<1x8x8xf32>
    %c0_27 = arith.constant 0 : index
    %c2 = arith.constant 2 : index
    %c0_28 = arith.constant 0 : index
    %c0_29 = arith.constant 0 : index
    %67 = vector.load %arg7[%c0_27, %c2, %c0_28, %c0_29] : memref<1x4x8x8xf32, #tpu.memory_space<vmem>>, vector<1x1x8x8xf32>
    %68 = vector.shape_cast %67 : vector<1x1x8x8xf32> to vector<1x8x8xf32>
    %69 = vector.shape_cast %66 : vector<1x8x8xf32> to vector<1x1x8x8xf32>
    tpu.vector_store %arg7[%c0_27, %c2, %c0_28, %c0_29], %69 {strides = array<i32>} : memref<1x4x8x8xf32, #tpu.memory_space<vmem>>, vector<1x1x8x8xf32>,
    "tpu.trace_start"() <{level = 10 : i32, message = "bqk,bkd->bqd"}> : () -> ()
    %cst_30 = arith.constant dense<0.000000e+00> : vector<1x8x8xf32>
    %70 = tpu.matmul %66, %56, %cst_30 {dimension_numbers = #tpu.dot_dimension_numbers<[2], [1], [1], [2], [0, 0, 0, 1, 1, 2], [0], [0]>} : vector<1x8x8xf32>, vector<1x8x8xf32>, vector<1x8x8xf32> -> vector<1x8x8xf32>
    "tpu.trace_stop"() : () -> ()
    %71 = vector.shape_cast %70 : vector<1x8x8xf32> to vector<8x8xf32>
    %c0_31 = arith.constant 0 : index
    %c16 = arith.constant 16 : index
    %72 = vector.load %arg8[%c0_31, %c16] : memref<8x32xf32, #tpu.memory_space<vmem>>, vector<8x8xf32>
    tpu.vector_store %arg8[%c0_31, %c16], %71 {strides = array<i32>} : memref<8x32xf32, #tpu.memory_space<vmem>>, vector<8x8xf32>,
    %73 = vector.extract_strided_slice %6 {offsets = [0, 24], sizes = [8, 8], strides = [1, 1]} : vector<8x96xf32> to vector<8x8xf32>
    %74 = vector.shape_cast %73 : vector<8x8xf32> to vector<1x8x8xf32>
    %75 = vector.extract_strided_slice %6 {offsets = [0, 56], sizes = [8, 8], strides = [1, 1]} : vector<8x96xf32> to vector<8x8xf32>
    %76 = vector.shape_cast %75 : vector<8x8xf32> to vector<1x8x8xf32>
    %77 = vector.extract_strided_slice %6 {offsets = [0, 88], sizes = [8, 8], strides = [1, 1]} : vector<8x96xf32> to vector<8x8xf32>
    %78 = vector.shape_cast %77 : vector<8x8xf32> to vector<1x8x8xf32>
    "tpu.trace_start"() <{level = 10 : i32, message = "bqd,bkd->bqk"}> : () -> ()
    %cst_32 = arith.constant dense<0.000000e+00> : vector<1x8x8xf32>
    %79 = tpu.matmul %74, %76, %cst_32 {dimension_numbers = #tpu.dot_dimension_numbers<[2], [2], [1], [1], [0, 0, 0, 1, 1, 1], [0], [0]>} : vector<1x8x8xf32>, vector<1x8x8xf32>, vector<1x8x8xf32> -> vector<1x8x8xf32>
    "tpu.trace_stop"() : () -> ()
    %cst_33 = arith.constant dense<0xFF800000> : vector<1x8xf32>
    %80 = vector.multi_reduction <maximumf>, %79, %cst_33 [2] : vector<1x8x8xf32> to vector<1x8xf32>
    %81 = vector.shape_cast %80 : vector<1x8xf32> to vector<1x8x1xf32>
    %82 = vector.broadcast %81 : vector<1x8x1xf32> to vector<1x8x8xf32>
    %83 = arith.subf %79, %82 : vector<1x8x8xf32>
    %84 = math.exp %83 : vector<1x8x8xf32>
    %cst_34 = arith.constant dense<0.000000e+00> : vector<1x8xf32>
    %85 = vector.multi_reduction <add>, %84, %cst_34 [2] : vector<1x8x8xf32> to vector<1x8xf32>
    %86 = vector.shape_cast %85 : vector<1x8xf32> to vector<1x8x1xf32>
    %87 = vector.broadcast %86 : vector<1x8x1xf32> to vector<1x8x8xf32>
    %88 = arith.divf %84, %87 : vector<1x8x8xf32>
    %c0_35 = arith.constant 0 : index
    %c3 = arith.constant 3 : index
    %c0_36 = arith.constant 0 : index
    %c0_37 = arith.constant 0 : index
    %89 = vector.load %arg7[%c0_35, %c3, %c0_36, %c0_37] : memref<1x4x8x8xf32, #tpu.memory_space<vmem>>, vector<1x1x8x8xf32>
    %90 = vector.shape_cast %89 : vector<1x1x8x8xf32> to vector<1x8x8xf32>
    %91 = vector.shape_cast %88 : vector<1x8x8xf32> to vector<1x1x8x8xf32>
    tpu.vector_store %arg7[%c0_35, %c3, %c0_36, %c0_37], %91 {strides = array<i32>} : memref<1x4x8x8xf32, #tpu.memory_space<vmem>>, vector<1x1x8x8xf32>,
    "tpu.trace_start"() <{level = 10 : i32, message = "bqk,bkd->bqd"}> : () -> ()
    %cst_38 = arith.constant dense<0.000000e+00> : vector<1x8x8xf32>
    %92 = tpu.matmul %88, %78, %cst_38 {dimension_numbers = #tpu.dot_dimension_numbers<[2], [1], [1], [2], [0, 0, 0, 1, 1, 2], [0], [0]>} : vector<1x8x8xf32>, vector<1x8x8xf32>, vector<1x8x8xf32> -> vector<1x8x8xf32>
    "tpu.trace_stop"() : () -> ()
    %93 = vector.shape_cast %92 : vector<1x8x8xf32> to vector<8x8xf32>
    %c0_39 = arith.constant 0 : index
    %c24 = arith.constant 24 : index
    %94 = vector.load %arg8[%c0_39, %c24] : memref<8x32xf32, #tpu.memory_space<vmem>>, vector<8x8xf32>
    tpu.vector_store %arg8[%c0_39, %c24], %93 {strides = array<i32>} : memref<8x32xf32, #tpu.memory_space<vmem>>, vector<8x8xf32>,
    %c0_40 = arith.constant 0 : index
    %c0_41 = arith.constant 0 : index
    %95 = vector.load %arg8[%c0_40, %c0_41] : memref<8x32xf32, #tpu.memory_space<vmem>>, vector<8x32xf32>
    %c0_42 = arith.constant 0 : index
    %c0_43 = arith.constant 0 : index
    %96 = vector.load %arg4[%c0_42, %c0_43] : memref<32x32xf32, #tpu.memory_space<vmem>>, vector<32x32xf32>
    %cst_44 = arith.constant dense<0.000000e+00> : vector<8x32xf32>
    %97 = tpu.matmul %95, %96, %cst_44 {dimension_numbers = #tpu.dot_dimension_numbers<[1], [0], [0], [1], [0, 0, 1, 1], [], []>} : vector<8x32xf32>, vector<32x32xf32>, vector<8x32xf32> -> vector<8x32xf32>
    %c0_45 = arith.constant 0 : index
    %c0_46 = arith.constant 0 : index
    %98 = vector.load %arg5[%c0_45, %c0_46] : memref<1x32xf32, #tpu.memory_space<vmem>>, vector<1x32xf32>
    %99 = vector.broadcast %98 : vector<1x32xf32> to vector<8x32xf32>
    %100 = arith.addf %97, %99 : vector<8x32xf32>
    %101 = vector.shape_cast %100 : vector<8x32xf32> to vector<1x8x32xf32>
    %c0_47 = arith.constant 0 : index
    %c0_48 = arith.constant 0 : index
    %c0_49 = arith.constant 0 : index
    %102 = vector.load %arg6[%c0_47, %c0_48, %c0_49] : memref<1x8x32xf32, #tpu.memory_space<vmem>>, vector<1x8x32xf32>
    tpu.vector_store %arg6[%c0_47, %c0_48, %c0_49], %101 {strides = array<i32>} : memref<1x8x32xf32, #tpu.memory_space<vmem>>, vector<1x8x32xf32>,
    return
  }
  func.func @transform_0(%arg0: i32) -> (i32, i32, i32) {
    %c0_i32 = arith.constant 0 : i32
    %c0_i32_0 = arith.constant 0 : i32
    %c0_i32_1 = arith.constant 0 : i32
    return %arg0, %c0_i32, %c0_i32_0 : i32, i32, i32
  }
  func.func @transform_1(%arg0: i32) -> (i32, i32) {
    %c0_i32 = arith.constant 0 : i32
    %c0_i32_0 = arith.constant 0 : i32
    %c0_i32_1 = arith.constant 0 : i32
    return %c0_i32, %c0_i32_0 : i32, i32
  }
  func.func @transform_2(%arg0: i32) -> (i32, i32) {
    %c0_i32 = arith.constant 0 : i32
    %c0_i32_0 = arith.constant 0 : i32
    %c0_i32_1 = arith.constant 0 : i32
    return %c0_i32, %c0_i32_0 : i32, i32
  }
  func.func @transform_3(%arg0: i32) -> (i32, i32) {
    %c0_i32 = arith.constant 0 : i32
    %c0_i32_0 = arith.constant 0 : i32
    %c0_i32_1 = arith.constant 0 : i32
    return %c0_i32, %c0_i32_0 : i32, i32
  }
  func.func @transform_4(%arg0: i32) -> (i32, i32) {
    %c0_i32 = arith.constant 0 : i32
    %c0_i32_0 = arith.constant 0 : i32
    %c0_i32_1 = arith.constant 0 : i32
    return %c0_i32, %c0_i32_0 : i32, i32
  }
  func.func @transform_5(%arg0: i32) -> (i32, i32, i32) {
    %c0_i32 = arith.constant 0 : i32
    %c0_i32_0 = arith.constant 0 : i32
    %c0_i32_1 = arith.constant 0 : i32
    return %arg0, %c0_i32, %c0_i32_0 : i32, i32, i32
  }
  func.func @transform_6(%arg0: i32) -> (i32, i32, i32, i32) {
    %c0_i32 = arith.constant 0 : i32
    %c0_i32_0 = arith.constant 0 : i32
    %c0_i32_1 = arith.constant 0 : i32
    %c0_i32_2 = arith.constant 0 : i32
    return %arg0, %c0_i32, %c0_i32_0, %c0_i32_1 : i32, i32, i32, i32
  }
}

</mosaic_0001>

<bundles_post_ra>
// kernel: tpu_custom_call.1
= control target key start
LH: loop header
LB: loop body
LE: loop exit
PB: predicated region body
PF: predicated region fallthrough
CT: control target
= control target key end

     0   :  { %s2095_s0 = inlined_call_operand.hbm [shape: f32[2,8,32], index: 0, kind: input, shape index: {}]   ;;  %s2096_s1 = inlined_call_operand.hbm [shape: f32[32,96], index: 1, kind: input, shape index: {}]   ;;  %s2097_s2 = inlined_call_operand.vmem [shape: f32[1,96], index: 2, kind: input, shape index: {}]   ;;  %s2098_s3 = inlined_call_operand.hbm [shape: f32[32,32], index: 3, kind: input, shape index: {}]   ;;  %s2099_s4 = inlined_call_operand.vmem [shape: f32[1,32], index: 4, kind: input, shape index: {}]   ;;  %s2100_s5 = inlined_call_operand.hbm [shape: f32[2,8,32], index: 5, kind: output, shape index: {0}]   ;;  %s2101_s6 = inlined_call_operand.hbm [shape: f32[2,4,8,8], index: 6, kind: output, shape index: {1}]  }
   0x1   :  { %2106 = sst [smem:[#allocation15_spill]] %s2096_s1 }
   0x2   :  { %12 = vsyncpa [#allocation3], 0 }
   0x3   :  { %14 = vsyncpa [#allocation3 + $0x1], 0 }
   0x4   :  { %15 = vsyncpa [#allocation6], 0 }
   0x5   :  { %16 = vsyncpa [#allocation4], 0 }
   0x6   :  { %18 = vsyncpa [#allocation4 + $0x1], 0 }
   0x7   :  { %19 = vsyncpa [#allocation10], 0 }
   0x8   :  { %21 = vsyncpa [#allocation10 + $0x1], 0  ;;  %s1792_s21 = smov 0   ;;  %s1794_s22 = smov 0  }
   0x9   :  { %s1796_s23 = smov 0   ;;  %s1798_s24 = smov 0  }
   0xa LB: > { %s1813_s25 = sadd.s32 4294967295, %s1731_s24   ;;  %s1318_s26 = sadd.s32 4294967294, %s1731_s24   ;;  %s1731_s24 = sphi %s1798_s24, %s2125_s24   ;;  %s1727_s23 = sphi %s1796_s23, %s2124_s23   ;;  %s1723_s22 = sphi %s1794_s22, %s2123_s22   ;;  %s1719_s21 = sphi %s1792_s21, %s2122_s21  }
   0xb   : > { %p47_p0 = scmp.ne.s32.totalorder %s1723_s22, %s1719_s21  ;;  %p2102_p1 = scmp.eq.s32.totalorder %s1813_s25, 0 }
   0xc   : > { %p161_p3 = scmp.eq.s32.totalorder %s1318_s26, 1  ;;  %p1319_p5 = scmp.ge.s32.totalorder %s1731_s24, 1 }
   0xd   : > { %p1822_p4 = por %p2102_p1, %p47_p0  ;;  %p194_p7 = scmp.lt.s32.totalorder %s1731_s24, 3 }
   0xe   : > { %p1827_p6 = por %p161_p3, %p47_p0  ;;  %s1733_s30 = smov [#allocation5]  }
   0xf   : > { %s2107_s27 = scalar_select %p1822_p4, 1, 0 }
  0x10   : > { %s2108_s28 = scalar_select %p1827_p6, 1, 0 }
  0x11   : > { %p1832_p8 = pnand %p1319_p5, %p194_p7  ;;  %s206_s7 = sshll.u32 %s1733_s30, 4  ;;  %s207_s7 = int_to_ptr.vmem [resolvable:$true] %s206_s7 }
  0x12   : > { %s1734_s9 = smov [#allocation7]   ;;  %s1564_s11 = scalar_lea.vmem %s207_s7, 512 }
  0x13   : > { %s2109_s29 = scalar_select %p1832_p8, 1, 0 }
  0x14   : > { %p1460_p9 = pneg %p1832_p8  ;;  %s222_s10 = sshll.u32 %s1734_s9, 4  ;;  %s223_s10 = int_to_ptr.vmem [resolvable:$true] %s222_s10 }
  0x15   : > { %p1565_p13 = scmp.ne.s32.totalorder %s207_s7, %s1564_s11  ;;  %p1572_p5 = scmp.lt.s32.totalorder %s207_s7, %s207_s7 }
  0x16   : > { %p1841_p11 = pnand %p1460_p9, %p2102_p1  ;;  %p1573_p7 = scmp.lt.s32.totalorder %s1564_s11, %s1564_s11 }
  0x18   : > { %p1555_p12 = pneg %p1841_p11  ;;  %p1574_p10 = por %p1573_p7, %p1572_p5 }
  0x1a   : > { %p1567_p0 = pnand %p1565_p13, %p1555_p12 }
  0x1c   : > { %p1568_p3 = pneg %p1567_p0 }
  0x1e   : > { %p1575_p9 = pnand %p1574_p10, %p1568_p3 }
  0x20   : > { %1578 = shalt.err (!%p1575_p9)
}
  0x21   : > { %s1735_s12 = smov 128   ;;  %s1736_s13 = smov 8  }
  0x22   : > { %s2111_s1 = sld [smem:[#allocation15_spill]]  ;;  %s1590_s16 = scalar_lea.vmem %s223_s10, 512 }
  0x23   : > { %p1591_p1 = scmp.ne.s32.totalorder %s223_s10, %s1590_s16  ;;  %p1598_p2 = scmp.lt.s32.totalorder %s223_s10, %s223_s10 }
  0x24   : > { %p1599_p6 = scmp.lt.s32.totalorder %s1590_s16, %s1590_s16 }
  0x25   : > { %p1593_p13 = pnand %p1591_p1, %p1555_p12 }
  0x26   : > { %p1600_p5 = por %p1599_p6, %p1598_p2 }
  0x27   : > { %p1594_p0 = pneg %p1593_p13 }
  0x28   : > { %1463 = dma.hbm_to_vmem [thread:$0]  (!%p1841_p11), %s2111_s1, 512, %s207_s7, [#allocation6], %s1735_s12, %s1735_s12, %s1736_s13  }
  0x29   : > { %p1601_p10 = pnand %p1600_p5, %p1594_p0 }
  0x2b   : > { %1604 = shalt.err (!%p1601_p10)
}
  0x2c   : > { %1466 = dma.hbm_to_vmem [thread:$0]  (!%p1841_p11), %s2098_s3, 512, %s223_s10, [#allocation6], %s1735_s12, %s1735_s12, %s1736_s13  }
  0x2d   : > { %s1864_s19 = sadd.s32 1, %s1731_s24   ;;  %s34_s20 = sadd.s32 1, %s1727_s23 }
  0x2e   : > { %s31_s26 = ssub.s32 %s1731_s24, %s1864_s19  ;;  %p41_p1 = scmp.ne.s32.totalorder %s1727_s23, %s1723_s22 }
  0x2f   : > { %p32_p2 = scmp.eq.s32.totalorder %s31_s26, 0  ;;  %p42_p6 = scmp.eq.s32.totalorder %s1731_s24, 0 }
  0x30   : > { %p2112_p12 = scmp.eq.s32.totalorder %s1813_s25, 1  ;;  %p1480_p7 = scmp.lt.s32.totalorder %s1731_s24, 2 }
  0x31   : > { %s1880_s7 = scalar_select %p32_p2, %s1727_s23, %s34_s20  }
  0x32   : > { %p1874_p3 = por %p2112_p12, %p41_p1  ;;  %p43_p9 = por %p42_p6, %p41_p1 }
  0x33   : > { %s239_s8 = sand.u32 1, %s1727_s23   ;;  %s1324_s10 = sshll.u32 %s1731_s24, 7 }
  0x34   : > { %s2113_s30 = scalar_select %p1874_p3, 1, 0 }
  0x35   : > { %s1323_s9 = sshll.u32 %s239_s8, 3  ;;  %s1887_s13 = scalar_lea.hbm %s2095_s0, %s1324_s10 }
  0x36   : > { %s243_s14 = scalar_lea.vmem [#allocation2], %s1323_s9  ;;  %p1889_p11 = pnand %p1480_p7, %p43_p9 }
  0x37   : > { %s250_s15 = sshll.u32 %s243_s14, 4  ;;  %s240_s17 = scalar_lea.sflag [#allocation3], %s239_s8  ;;  %s251_s15 = int_to_ptr.vmem [resolvable:$true] %s250_s15 }
  0x38   : > { %s1605_s18 = scalar_lea.hbm %s1887_s13, 128  ;;  %p1607_p0 = pneg %p1889_p11 }
  0x39   : > { %p1606_p13 = scmp.ne.s32.totalorder %s1887_s13, %s1605_s18  ;;  %s1610_s10 = scalar_lea.hbm %s2095_s0, 256 }
  0x3a   : > { %p1611_p1 = scmp.lt.s32.totalorder %s1887_s13, %s2095_s0  ;;  %p1612_p2 = scmp.lt.s32.totalorder %s1610_s10, %s1605_s18 }
  0x3b   : > { %p1608_p5 = pnand %p1607_p0, %p1606_p13 }
  0x3c   : > { %p1613_p6 = por %p1612_p2, %p1611_p1 }
  0x3d   : > { %p1609_p10 = pneg %p1608_p5 }
  0x3f   : > { %p1614_p12 = pnand %p1613_p6, %p1609_p10 }
  0x41   : > { %1617 = shalt.err (!%p1614_p12)
}
  0x42   : > { %s1618_s12 = scalar_lea.vmem %s251_s15, 128  ;;  %s1737_s8 = smov [#allocation2]  }
  0x43   : > { %p1619_p7 = scmp.ne.s32.totalorder %s251_s15, %s1618_s12  ;;  %s1623_s14 = sshll.u32 %s1737_s8, 4  ;;  %s1624_s14 = int_to_ptr.vmem [resolvable:$false] %s1623_s14 }
  0x44   : > { %s1625_s1 = scalar_lea.vmem %s1624_s14, 256  ;;  %p1626_p13 = scmp.lt.s32.totalorder %s251_s15, %s1624_s14 }
  0x45   : > { %p1621_p9 = pnand %p1619_p7, %p1607_p0  ;;  %p1627_p5 = scmp.lt.s32.totalorder %s1625_s1, %s1618_s12 }
  0x47   : > { %p1622_p3 = pneg %p1621_p9  ;;  %p1628_p4 = por %p1627_p5, %p1626_p13 }
  0x49   : > { %p1629_p8 = pnand %p1628_p4, %p1622_p3 }
  0x4b   : > { %1632 = shalt.err (!%p1629_p8)
}
  0x4c   : > { %1470 = dma.hbm_to_vmem [thread:$0]  (!%p1889_p11), %s1887_s13, 128, %s251_s15, %s240_s17  }
  0x4d   : > { %p2115_p10 = scmp.ne.s32.totalorder %s2109_s29, 0 }
  0x4e   : > { %s1910_s18 = sand.u32 (!%p2115_p10), 1, %s1723_s22   ;;  %p2116_p4 = scmp.ne.s32.totalorder (!%p2115_p10), %s2107_s27, 0 }
  0x4f   : > { %259 = sbr.rel (%p2115_p10) target bundleno = 1987 (0x7c3), region = 40  ;;  %s1326_s20 = sshll.u32 (!%p2115_p10), %s1910_s18, 3 }
  0x50   : > { %s262_s26 = scalar_lea.sflag (!%p2115_p10), [#allocation3], %s1910_s18  ;;  %s265_s1 = scalar_lea.vmem (!%p2115_p10), [#allocation2], %s1326_s20 }
  0x54   : > { %1702 = dma.done.wait (%p2116_p4), %s262_s26, 128  }
  0x55   : > { %1704 = vsyncadd (%p2116_p4), %s262_s26, 4294967168  ;;  %p2117_p8 = scmp.eq.s32.totalorder %s1813_s25, 0 }
  0x57   : > { %1706 = dma.done.wait (%p2117_p8), [#allocation6], 1024   ;;  %p2118_p3 = pmov %p2117_p8 }
  0x58   : > { %v1738_v0 = vmov 0.0   ;;  %vm1739_vm0 = vmmov 0   ;;  %v311_v1 = vld [vmem:[#allocation5 + $0x18] sm:$0xff]  ;;  %v310_v2 = vld [vmem:[#allocation5 + $0x10] sm:$0xff]  ;;  %v309_v3 = vld [vmem:[#allocation5 + $0x8] sm:$0xff]  ;;  %vm319_vm1 = vcmask 261120  }
  0x59   : > { %1708 = vsyncadd (%p2118_p3), [#allocation6], 4294966272  ;;  %1384 = vmatprep.subr.mxu0 %v1738_v0  ;;  %1392 = vmatprep.mubr.msk.f32.mxu0 %vm1739_vm0, %v1738_v0  ;;  %v308_v4 = vld [vmem:[#allocation5] sm:$0xff]  ;;  %v307_v5 = vld [vmem:[%s265_s1] sm:$0xff]  ;;  %s1740_s13 = smov 64   ;;  %s1741_s15 = smov 96  }
  0x5a   : > { %1395 = vmatprep.subr.mxu1 %v1738_v0  ;;  %1397 = vmatprep.mubr.msk.f32.mxu1 %vm1739_vm0, %v1738_v0  ;;  %v1331_v6 = vld [vmem:[%s2097_s2] ss:$0 sm:$0xff]  ;;  %s1742_s16 = smov 88   ;;  %s1743_s17 = smov 120   ;;  %vm396_vm2 = vcmask 64512   ;;  %vm1073_vm3 = vcmask 130048  }
  0x5b   : > { %1385 = vmatpush3.msra.mxu0 %v311_v1  ;;  %s1744_s10 = smov 80   ;;  %s1745_s11 = smov 72   ;;  %vm1075_vm4 = vcmask 195584  }
  0x5c   : > { %1386 = vmatprep.subr.mxu0 %v1738_v0  ;;  %s1746_s9 = smov 112   ;;  %s1747_s12 = smov 104  }
  0x5d   : > { %1387 = vmatpush3.msra.mxu0 %v310_v2  ;;  %s1330_s8 = sshll.u32 %s1910_s18, 5  ;;  %s1748_s26 = smov 56  }
  0x5e   : > { %1388 = vmatprep.subr.mxu0 %v1738_v0  ;;  %s1970_s14 = scalar_lea.vmem [#allocation9], %s1330_s8  ;;  %s1749_s1 = smov 48  }
  0x5f   : > { %1389 = vmatpush3.msra.mxu0 %v309_v3  ;;  %s1750_s27 = smov 40   ;;  %s1751_s29 = smov 8  }
  0x60   : > { %1390 = vmatprep.subr.mxu0 %v1738_v0  ;;  %p2119_p0 = scmp.ne.s32.totalorder %s2113_s30, 0 }
  0x61   : > { %1391 = vmatpush3.msra.mxu0 %v308_v4  ;;  %v1080_v4 = vld [vmem:[#allocation7 + $0x18] sm:$0xff] }
  0x62   : > { %1393 = vmatmul.mubr.msk.f32.vlgmr.msra.gmra.mxu0 %vm319_vm1, %v307_v5  ;;  %1415 = vmatprep.subr.mxu0 %v1738_v0  ;;  %v1079_v5 = vld [vmem:[#allocation7 + $0x10] sm:$0xff] }
  0x63   : > { %1417 = vmatprep.mubr.msk.f32.mxu0 %vm1739_vm0, %v1738_v0 }
 0x122   : > { %v389_v7 = vpop.f32.mrf.mxu0 }
 0x123   : > { %v1940_v8 = vadd.f32 %v1331_v6, %v389_v7  ;;  %v1078_v6 = vld [vmem:[#allocation7 + $0x8] sm:$0xff]  ;;  %v1077_v7 = vld [vmem:[#allocation7] sm:$0xff] }
 0x124   : > { %v1394_v9 = vpop.f32.mrf.mxu0 }
 0x125   : > { %483 = vrot.lane.b32.xlu1 %v1940_v8, %s1740_s13  ;;  %394 = vrot.lane.b32.xlu0 %v1940_v8, %s1741_s15  ;;  %s1752_s13 = smov 16   ;;  %s1753_s15 = smov 24  }
 0x129   : > { %561 = vrot.lane.b32.xlu1 %v1940_v8, %s1742_s16  ;;  %s1357_s16 = sshll.u32 %s1813_s25, 9 }
 0x12d   : > { %559 = vrot.lane.b32.xlu1 %v1940_v8, %s1743_s17  ;;  %s1194_s17 = sshll.u32 %s1970_s14, 4  ;;  %s2022_s17 = int_to_ptr.vmem [resolvable:$true] %s1194_s17 }
 0x12e   : > { %s1633_s8 = scalar_lea.vmem %s2022_s17, 512 }
 0x12f   : > { %p1634_p11 = scmp.ne.s32.totalorder %s2022_s17, %s1633_s8 }
 0x131   : > { %728 = vrot.lane.b32.xlu1 %v1940_v8, %s1744_s10  ;;  %p1635_p1 = pnand %p1634_p11, %p2119_p0 }
 0x133   : > { %p1636_p2 = pneg %p1635_p1 }
 0x197   : > { %v484_v10 = vpop.permute.xlu1 %483  ;;  %v395_v11 = vpop.permute.xlu0 %394 }
 0x198   : > { %1396 = vmatpush3.xpose.msk.msra.mxu1 %vm396_vm2, %v395_v11 }
 0x199   : > { %1400 = vmatprep.subr.mxu1 %v1738_v0 }
 0x19b   : > { %v562_v12 = vpop.permute.xlu1 %561  ;;  %1398 = vmatmul.mubr.msk.f32.vlgmr.msra.gmra.mxu1 %vm396_vm2, %v1940_v8 }
 0x19c   : > { %1401 = vmatpush3.msra.mxu1 %v484_v10  ;;  %1402 = vmatprep.mubr.msk.f32.mxu1 %vm1739_vm0, %v1738_v0 }
 0x19d   : > { %1405 = vmatprep.subr.mxu1 %v1738_v0 }
 0x19f   : > { %v560_v13 = vpop.permute.xlu1 %559 }
 0x1a3   : > { %v729_v14 = vpop.permute.xlu1 %728 }
 0x1a4   : > { %1416 = vmatpush3.xpose.msk.msra.mxu0 %vm396_vm2, %v729_v14 }
 0x1a5   : > { %1425 = vmatprep.subr.mxu0 %v1738_v0 }
 0x25b   : > { %v467_v15 = vpop.f32.mrf.mxu1 }
 0x25c   : > { %v471_v16 = vsel %vm396_vm2, %v467_v15, -inf }
 0x25d   : > { %472 = vmax.xlane.f32.xlu0 %v471_v16  ;;  %v1399_v17 = vpop.f32.mrf.mxu1 }
 0x273   : > { %895 = vrot.lane.b32.xlu0 %v1940_v8, %s1745_s11 }
 0x2e6   : > { %v473_v18 = vpop.xlane.xlu0 %472 }
 0x2e7   : > { %v474_v19 = vsub.f32 %v467_v15, %v473_v18 }
 0x2e9   : > { %v475_v20 = vmul.f32 1.442695, %v474_v19 }
 0x2ea   : > { %v896_v25 = vpop.permute.xlu0 %895 }
 0x2eb   : > { %1537 = vpow2.f32 %v475_v20 }
 0x2f8   : > { %v1538_v21 = vpop.eup %1537 }
 0x2f9   : > { %v477_v22 = vsel %vm396_vm2, %v1538_v21, 0.0 }
 0x2fa   : > { %478 = vadd.xlane.f32.xlu1 %v477_v22 }
 0x30b   : > { %726 = vrot.lane.b32.xlu1 %v1940_v8, %s1746_s9  ;;  %s2020_s9 = scalar_lea.hbm %s2101_s6, %s1357_s16 }
 0x30f   : > { %893 = vrot.lane.b32.xlu1 %v1940_v8, %s1747_s12  ;;  %s1168_s12 = scalar_lea.sflag [#allocation10], %s1910_s18 }
 0x383   : > { %v479_v23 = vpop.xlane.xlu1 %478 }
 0x384   : > { %1539 = vrcp.f32 %v479_v23 }
 0x387   : > { %v727_v24 = vpop.permute.xlu1 %726 }
 0x388   : > { %1418 = vmatmul.mubr.msk.f32.vlgmr.msra.gmra.mxu0 %vm396_vm2, %v727_v24 }
 0x389   : > { %1426 = vmatpush3.xpose.msk.msra.mxu0 %vm396_vm2, %v896_v25  ;;  %1427 = vmatprep.mubr.msk.f32.mxu0 %vm1739_vm0, %v1738_v0 }
 0x38a   : > { %1435 = vmatprep.subr.mxu0 %v1738_v0 }
 0x38b   : > { %v894_v26 = vpop.permute.xlu1 %893 }
 0x38c   : > { %1428 = vmatmul.mubr.msk.f32.vlgmr.msra.gmra.mxu0 %vm396_vm2, %v894_v26 }
 0x38d   : > { %1443 = vmatprep.mubr.msk.f32.mxu0 %vm1739_vm0, %v1738_v0  ;;  %1436 = vmatpush3.msra.mxu0 %v1080_v4 }
 0x38e   : > { %1437 = vmatprep.subr.mxu0 %v1738_v0 }
 0x38f   : > { %1438 = vmatpush3.msra.mxu0 %v1079_v5 }
 0x390   : > { %1439 = vmatprep.subr.mxu0 %v1738_v0 }
 0x391   : > { %v1540_v27 = vpop.eup %1539  ;;  %1440 = vmatpush3.msra.mxu0 %v1078_v6 }
 0x392   : > { %v481_v28 = vmul.f32 %v1540_v27, %v1538_v21  ;;  %1441 = vmatprep.subr.mxu0 %v1738_v0 }
 0x393   : > { %1442 = vmatpush3.msra.mxu0 %v1077_v7 }
 0x394   : > { %482 = vst.msk [vmem:[%s1970_s14] sm:$0xff] %vm396_vm2, %v481_v28  ;;  %1403 = vmatmul.mubr.msk.f32.vlgmr.msra.gmra.mxu1 %vm396_vm2, %v481_v28 }
 0x395   : > { %1406 = vmatpush3.xpose.msk.msra.mxu1 %vm396_vm2, %v562_v12  ;;  %1407 = vmatprep.mubr.msk.f32.mxu1 %vm1739_vm0, %v1738_v0 }
 0x396   : > { %1410 = vmatprep.subr.mxu1 %v1738_v0 }
 0x398   : > { %1408 = vmatmul.mubr.msk.f32.vlgmr.msra.gmra.mxu1 %vm396_vm2, %v560_v13 }
 0x399   : > { %1412 = vmatprep.mubr.msk.f32.mxu1 %vm1739_vm0, %v1738_v0 }
 0x448   : > { %v800_v29 = vpop.f32.mrf.mxu0 }
 0x449   : > { %v804_v30 = vsel %vm396_vm2, %v800_v29, -inf }
 0x44a   : > { %805 = vmax.xlane.f32.xlu0 %v804_v30  ;;  %v1419_v31 = vpop.f32.mrf.mxu0 }
 0x44c   : > { %v967_v32 = vpop.f32.mrf.mxu0 }
 0x44d   : > { %v971_v39 = vsel %vm396_vm2, %v967_v32, -inf }
 0x44e   : > { %v1429_v33 = vpop.f32.mrf.mxu0 }
 0x454   : > { %v1983_v34 = vpop.f32.mrf.mxu1 }
 0x456   : > { %v1404_v35 = vpop.f32.mrf.mxu1 }
 0x458   : > { %v633_v36 = vpop.f32.mrf.mxu1 }
 0x459   : > { %v637_v37 = vsel %vm396_vm2, %v633_v36, -inf }
 0x45a   : > { %638 = vmax.xlane.f32.xlu1 %v637_v37  ;;  %v1409_v38 = vpop.f32.mrf.mxu1 }
 0x45e   : > { %972 = vmax.xlane.f32.xlu1 %v971_v39 }
 0x4d3   : > { %v806_v40 = vpop.xlane.xlu0 %805 }
 0x4d4   : > { %v807_v41 = vsub.f32 %v800_v29, %v806_v40 }
 0x4d6   : > { %v808_v42 = vmul.f32 1.442695, %v807_v41 }
 0x4d8   : > { %1541 = vpow2.f32 %v808_v42 }
 0x4e3   : > { %v639_v43 = vpop.xlane.xlu1 %638 }
 0x4e4   : > { %v640_v51 = vsub.f32 %v633_v36, %v639_v43 }
 0x4e5   : > { %v1542_v44 = vpop.eup %1541 }
 0x4e6   : > { %v810_v45 = vsel %vm396_vm2, %v1542_v44, 0.0  ;;  %v641_v52 = vmul.f32 1.442695, %v640_v51 }
 0x4e7   : > { %811 = vadd.xlane.f32.xlu1 %v810_v45  ;;  %v973_v46 = vpop.xlane.xlu1 %972 }
 0x4e8   : > { %v974_v47 = vsub.f32 %v967_v32, %v973_v46 }
 0x4ea   : > { %v975_v48 = vmul.f32 1.442695, %v974_v47 }
 0x4ec   : > { %1543 = vpow2.f32 %v975_v48 }
 0x4ed   : > { %1545 = vpow2.f32 %v641_v52 }
 0x4f8   : > { %650 = vrot.lane.b32.xlu1 %v1940_v8, %s1748_s26  ;;  %s1754_s26 = smov [#allocation9]  }
 0x4f9   : > { %v1544_v49 = vpop.eup %1543 }
 0x4fa   : > { %v977_v50 = vsel %vm396_vm2, %v1544_v49, 0.0  ;;  %v1546_v53 = vpop.eup %1545 }
 0x4fb   : > { %978 = vadd.xlane.f32.xlu0 %v977_v50  ;;  %v643_v54 = vsel %vm396_vm2, %v1546_v53, 0.0 }
 0x511   : > { %817 = vrot.lane.b32.xlu0 %v1940_v8, %s1749_s1  ;;  %s1637_s1 = sshll.u32 %s1754_s26, 4  ;;  %s1638_s1 = int_to_ptr.vmem [resolvable:$false] %s1637_s1 }
 0x512   : > { %p1640_p6 = scmp.lt.s32.totalorder %s2022_s17, %s1638_s1 }
 0x51c   : > { %644 = vadd.xlane.f32.xlu1 %v643_v54 }
 0x52d   : > { %984 = vrot.lane.b32.xlu1 %v1940_v8, %s1750_s27 }
 0x570   : > { %v812_v55 = vpop.xlane.xlu1 %811 }
 0x571   : > { %1547 = vrcp.f32 %v812_v55 }
 0x574   : > { %v651_v56 = vpop.permute.xlu1 %650 }
 0x575   : > { %1411 = vmatpush3.msra.mxu1 %v651_v56 }
 0x576   : > { %1420 = vmatprep.subr.mxu1 %v1738_v0 }
 0x57e   : > { %v1548_v57 = vpop.eup %1547 }
 0x57f   : > { %v814_v58 = vmul.f32 %v1548_v57, %v1542_v44 }
 0x581   : > { %1342 = vst.msk [vmem:[%s1970_s14 + $0x10] sm:$0xff] %vm396_vm2, %v814_v58 }
 0x584   : > { %v979_v59 = vpop.xlane.xlu0 %978 }
 0x585   : > { %1549 = vrcp.f32 %v979_v59 }
 0x588   : > { %v818_v2 = vpop.permute.xlu0 %817 }
 0x592   : > { %v1550_v60 = vpop.eup %1549 }
 0x593   : > { %v981_v61 = vmul.f32 %v1550_v60, %v1544_v49 }
 0x595   : > { %1346 = vst.msk [vmem:[%s1970_s14 + $0x18] sm:$0xff] %vm396_vm2, %v981_v61 }
 0x5a5   : > { %v645_v62 = vpop.xlane.xlu1 %644 }
 0x5a6   : > { %1551 = vrcp.f32 %v645_v62 }
 0x5a9   : > { %v985_v3 = vpop.permute.xlu1 %984 }
 0x5b3   : > { %v1552_v63 = vpop.eup %1551 }
 0x5b4   : > { %v647_v1 = vmul.f32 %v1552_v63, %v1546_v53 }
 0x5b6   : > { %1338 = vst.msk [vmem:[%s1970_s14 + $0x8] sm:$0xff] %vm396_vm2, %v647_v1  ;;  %1413 = vmatmul.mubr.msk.f32.vlgmr.msra.gmra.mxu1 %vm396_vm2, %v647_v1  ;;  %s1639_s14 = scalar_lea.vmem %s1638_s1, 1024 }
 0x5b7   : > { %1421 = vmatpush3.msra.mxu1 %v818_v2  ;;  %1422 = vmatprep.mubr.msk.f32.mxu1 %vm1739_vm0, %v1738_v0  ;;  %p1641_p12 = scmp.lt.s32.totalorder %s1639_s14, %s1633_s8 }
 0x5b8   : > { %1430 = vmatprep.subr.mxu1 %v1738_v0 }
 0x5b9   : > { %p1642_p7 = por %p1641_p12, %p1640_p6 }
 0x5ba   : > { %1423 = vmatmul.mubr.msk.f32.vlgmr.msra.gmra.mxu1 %vm396_vm2, %v814_v58 }
 0x5bb   : > { %1431 = vmatpush3.msra.mxu1 %v985_v3  ;;  %1432 = vmatprep.mubr.msk.f32.mxu1 %vm1739_vm0, %v1738_v0  ;;  %p1643_p9 = pnand %p1642_p7, %p1636_p2 }
 0x5be   : > { %1433 = vmatmul.mubr.msk.f32.vlgmr.msra.gmra.mxu1 %vm396_vm2, %v981_v61 }
 0x676   : > { %v722_v8 = vpop.f32.mrf.mxu1 }
 0x677   : > { %1061 = vrot.lane.b32.xlu1 %v722_v8, %s1751_s29 }
 0x678   : > { %v1414_v9 = vpop.f32.mrf.mxu1 }
 0x67a   : > { %v889_v10 = vpop.f32.mrf.mxu1 }
 0x67b   : > { %1065 = vrot.lane.b32.xlu0 %v889_v10, %s1752_s13 }
 0x67c   : > { %v1424_v11 = vpop.f32.mrf.mxu1 }
 0x67e   : > { %v1056_v12 = vpop.f32.mrf.mxu1 }
 0x67f   : > { %1069 = vrot.lane.b32.xlu1 %v1056_v12, %s1753_s15 }
 0x680   : > { %v1434_v13 = vpop.f32.mrf.mxu1 }
 0x6e9   : > { %v1062_v14 = vpop.permute.xlu1 %1061 }
 0x6ea   : > { %v1072_v15 = vsel %vm396_vm2, %v1983_v34, %v1062_v14 }
 0x6ed   : > { %v1066_v0 = vpop.permute.xlu0 %1065 }
 0x6ee   : > { %v1074_v16 = vsel %vm1073_vm3, %v1072_v15, %v1066_v0 }
 0x6f1   : > { %v1070_v17 = vpop.permute.xlu1 %1069 }
 0x6f2   : > { %v1076_v18 = vsel %vm1075_vm4, %v1074_v16, %v1070_v17 }
 0x6f3   : > { %1444 = vmatmul.mubr.msk.f32.vlgmr.msra.gmra.mxu0 %vm319_vm1, %v1076_v18 }
 0x6f4   : > { %1646 = shalt.err (!%p1643_p9)
}
 0x6f5   : > { %s1647_s27 = scalar_lea.hbm %s2020_s9, 512  ;;  %s1651_s16 = scalar_lea.hbm %s2101_s6, 1024 }
 0x6f6   : > { %p1648_p13 = scmp.ne.s32.totalorder %s2020_s9, %s1647_s27  ;;  %p1652_p4 = scmp.lt.s32.totalorder %s2020_s9, %s2101_s6 }
 0x6f7   : > { %p1653_p8 = scmp.lt.s32.totalorder %s1651_s16, %s1647_s27 }
 0x6f8   : > { %p1649_p5 = pnand %p1648_p13, %p2119_p0 }
 0x6f9   : > { %p1654_p3 = por %p1653_p8, %p1652_p4 }
 0x6fa   : > { %p1650_p10 = pneg %p1649_p5 }
 0x6fc   : > { %p1655_p11 = pnand %p1654_p3, %p1650_p10 }
 0x6fe   : > { %1658 = shalt.err (!%p1655_p11)
}
 0x6ff   : > { %s1755_s8 = smov 128   ;;  %v1348_v19 = vld [vmem:[%s2099_s4] ss:$0 sm:$0xff]  ;;  %s1352_s14 = sshll.u32 %s1813_s25, 7 }
 0x700   : > { %1457 = dma.vmem_to_hbm [thread:$0]  (%p2119_p0), %s2022_s17, 512, %s2020_s9, %s1168_s12, %s1755_s8, %s1755_s8, %s1751_s29  }
 0x701   : > { %s299_s27 = scalar_lea.vmem [#allocation8], %s1326_s20  ;;  %s2057_s10 = scalar_lea.hbm %s2100_s5, %s1352_s14 }
 0x702   : > { %s1181_s13 = sshll.u32 %s299_s27, 4  ;;  %s1163_s29 = scalar_lea.sflag [#allocation4], %s1910_s18  ;;  %s1182_s13 = int_to_ptr.vmem [resolvable:$true] %s1181_s13 }
 0x703   : > { %s1659_s17 = scalar_lea.vmem %s1182_s13, 128  ;;  %s1756_s25 = smov [#allocation8]  }
 0x704   : > { %p1660_p1 = scmp.ne.s32.totalorder %s1182_s13, %s1659_s17  ;;  %s1663_s20 = sshll.u32 %s1756_s25, 4  ;;  %s1664_s20 = int_to_ptr.vmem [resolvable:$false] %s1663_s20 }
 0x705   : > { %s1665_s9 = scalar_lea.vmem %s1664_s20, 256  ;;  %p1666_p12 = scmp.lt.s32.totalorder %s1182_s13, %s1664_s20 }
 0x706   : > { %p1661_p2 = pnand %p1660_p1, %p2119_p0  ;;  %p1667_p7 = scmp.lt.s32.totalorder %s1665_s9, %s1659_s17 }
 0x708   : > { %p1662_p6 = pneg %p1661_p2  ;;  %p1668_p9 = por %p1667_p7, %p1666_p12 }
 0x70a   : > { %p1669_p13 = pnand %p1668_p9, %p1662_p6 }
 0x7b3   : > { %v1157_v20 = vpop.f32.mrf.mxu0 }
 0x7b4   : > { %v1158_v21 = vadd.f32 %v1348_v19, %v1157_v20 }
 0x7b5   : > { %v1445_v22 = vpop.f32.mrf.mxu0 }
 0x7b6   : > { %1161 = vst.msk [vmem:[%s299_s27] sm:$0xff] %vm319_vm1, %v1158_v21 }
 0x7b7   : > { %1672 = shalt.err (!%p1669_p13)
}
 0x7b8   : > { %s1673_s12 = scalar_lea.hbm %s2057_s10, 128  ;;  %s1677_s8 = scalar_lea.hbm %s2100_s5, 256 }
 0x7b9   : > { %p1674_p5 = scmp.ne.s32.totalorder %s2057_s10, %s1673_s12  ;;  %p1678_p8 = scmp.lt.s32.totalorder %s2057_s10, %s2100_s5 }
 0x7ba   : > { %p1679_p3 = scmp.lt.s32.totalorder %s1677_s8, %s1673_s12 }
 0x7bb   : > { %p1675_p10 = pnand %p1674_p5, %p2119_p0 }
 0x7bc   : > { %p1680_p11 = por %p1679_p3, %p1678_p8 }
 0x7bd   : > { %p1676_p4 = pneg %p1675_p10 }
 0x7bf   : > { %p1681_p1 = pnand %p1680_p11, %p1676_p4 }
 0x7c1   : > { %1684 = shalt.err (!%p1681_p1)
}
 0x7c2   : > { %1456 = dma.vmem_to_hbm [thread:$0]  (%p2119_p0), %s1182_s13, 128, %s2057_s10, %s1163_s29  }
 0x7c3 PF: > { %s1209_s14 = sand.u32 1, %s1719_s21   ;;  %p2120_p2 = scmp.ne.s32.totalorder %s2108_s28, 0 }
 0x7c4   : > { %p2121_p6 = scmp.ge.s32.totalorder %s1731_s24, 2  ;;  %s1210_s27 = scalar_lea.sflag [#allocation4], %s1209_s14 }
 0x7c6   : > { %p1472_p12 = pnand %p2121_p6, %p2120_p2 }
 0x7c8   : > { %p1473_p7 = pneg %p1472_p12 }
 0x7ca   : > { %1710 = dma.done.wait (%p1473_p7), %s1210_s27, 128  }
 0x7cb   : > { %1712 = vsyncadd (%p1473_p7), %s1210_s27, 4294967168  ;;  %s1219_s15 = scalar_lea.sflag [#allocation10], %s1209_s14 }
 0x7cc   : > { %1714 = dma.done.wait (%p1473_p7), %s1219_s15, 512  }
 0x7cd   : > { %1716 = vsyncadd (%p1473_p7), %s1219_s15, 4294966784  ;;  %p24_p0 = scmp.ge.s32.totalorder %s1864_s19, 4   ;;  %s2122_s21 = smov %s1723_s22 }
 0x7ce   : > { %s2123_s22 = smov %s1727_s23  ;;  %s2124_s23 = smov %s1880_s7 }
 0x7cf   : > { %s2125_s24 = smov %s1864_s19  ;;  %26 = sbr.rel (!%p24_p0) target bundleno = 10 (0xa), region = 113 }
 0x7d4   :  { %1224 = vsyncpa [#allocation3], 1 }
 0x7d5   :  { %1226 = vsyncpa [#allocation3 + $0x1], 1 }
 0x7d6   :  { %1227 = vsyncpa [#allocation6], 1 }
 0x7d7   :  { %1228 = vsyncpa [#allocation4], 1 }
 0x7d8   :  { %1230 = vsyncpa [#allocation4 + $0x1], 1 }
 0x7d9   :  { %1231 = vsyncpa [#allocation10], 1 }
 0x7da   :  { %1233 = vsyncpa [#allocation10 + $0x1], 1 }

// kernel: tpu_custom_call.1
= control target key start
LH: loop header
LB: loop body
LE: loop exit
PB: predicated region body
PF: predicated region fallthrough
CT: control target
= control target key end

     0   :  { %s2095_s0 = inlined_call_operand.hbm [shape: f32[2,8,32], index: 0, kind: input, shape index: {}]   ;;  %s2096_s1 = inlined_call_operand.hbm [shape: f32[32,96], index: 1, kind: input, shape index: {}]   ;;  %s2097_s2 = inlined_call_operand.vmem [shape: f32[1,96], index: 2, kind: input, shape index: {}]   ;;  %s2098_s3 = inlined_call_operand.hbm [shape: f32[32,32], index: 3, kind: input, shape index: {}]   ;;  %s2099_s4 = inlined_call_operand.vmem [shape: f32[1,32], index: 4, kind: input, shape index: {}]   ;;  %s2100_s5 = inlined_call_operand.hbm [shape: f32[2,8,32], index: 5, kind: output, shape index: {0}]   ;;  %s2101_s6 = inlined_call_operand.hbm [shape: f32[2,4,8,8], index: 6, kind: output, shape index: {1}]  }
   0x1   :  { %2106 = sst [smem:[#allocation15_spill]] %s2096_s1 }
   0x2   :  { %12 = vsyncpa [#allocation3], 0 }
   0x3   :  { %14 = vsyncpa [#allocation3 + $0x1], 0 }
   0x4   :  { %15 = vsyncpa [#allocation6], 0 }
   0x5   :  { %16 = vsyncpa [#allocation4], 0 }
   0x6   :  { %18 = vsyncpa [#allocation4 + $0x1], 0 }
   0x7   :  { %19 = vsyncpa [#allocation10], 0 }
   0x8   :  { %21 = vsyncpa [#allocation10 + $0x1], 0  ;;  %s1792_s21 = smov 0   ;;  %s1794_s22 = smov 0  }
   0x9   :  { %s1796_s23 = smov 0   ;;  %s1798_s24 = smov 0  }
   0xa LB: > { %s1813_s25 = sadd.s32 4294967295, %s1731_s24   ;;  %s1318_s26 = sadd.s32 4294967294, %s1731_s24   ;;  %s1731_s24 = sphi %s1798_s24, %s2125_s24   ;;  %s1727_s23 = sphi %s1796_s23, %s2124_s23   ;;  %s1723_s22 = sphi %s1794_s22, %s2123_s22   ;;  %s1719_s21 = sphi %s1792_s21, %s2122_s21  }
   0xb   : > { %p47_p0 = scmp.ne.s32.totalorder %s1723_s22, %s1719_s21  ;;  %p2102_p1 = scmp.eq.s32.totalorder %s1813_s25, 0 }
   0xc   : > { %p161_p3 = scmp.eq.s32.totalorder %s1318_s26, 1  ;;  %p1319_p5 = scmp.ge.s32.totalorder %s1731_s24, 1 }
   0xd   : > { %p1822_p4 = por %p2102_p1, %p47_p0  ;;  %p194_p7 = scmp.lt.s32.totalorder %s1731_s24, 3 }
   0xe   : > { %p1827_p6 = por %p161_p3, %p47_p0  ;;  %s1733_s30 = smov [#allocation5]  }
   0xf   : > { %s2107_s27 = scalar_select %p1822_p4, 1, 0 }
  0x10   : > { %s2108_s28 = scalar_select %p1827_p6, 1, 0 }
  0x11   : > { %p1832_p8 = pnand %p1319_p5, %p194_p7  ;;  %s206_s7 = sshll.u32 %s1733_s30, 4  ;;  %s207_s7 = int_to_ptr.vmem [resolvable:$true] %s206_s7 }
  0x12   : > { %s1734_s9 = smov [#allocation7]   ;;  %s1564_s11 = scalar_lea.vmem %s207_s7, 512 }
  0x13   : > { %s2109_s29 = scalar_select %p1832_p8, 1, 0 }
  0x14   : > { %p1460_p9 = pneg %p1832_p8  ;;  %s222_s10 = sshll.u32 %s1734_s9, 4  ;;  %s223_s10 = int_to_ptr.vmem [resolvable:$true] %s222_s10 }
  0x15   : > { %p1565_p13 = scmp.ne.s32.totalorder %s207_s7, %s1564_s11  ;;  %p1572_p5 = scmp.lt.s32.totalorder %s207_s7, %s207_s7 }
  0x16   : > { %p1841_p11 = pnand %p1460_p9, %p2102_p1  ;;  %p1573_p7 = scmp.lt.s32.totalorder %s1564_s11, %s1564_s11 }
  0x18   : > { %p1555_p12 = pneg %p1841_p11  ;;  %p1574_p10 = por %p1573_p7, %p1572_p5 }
  0x1a   : > { %p1567_p0 = pnand %p1565_p13, %p1555_p12 }
  0x1c   : > { %p1568_p3 = pneg %p1567_p0 }
  0x1e   : > { %p1575_p9 = pnand %p1574_p10, %p1568_p3 }
  0x20   : > { %1578 = shalt.err (!%p1575_p9)
}
  0x21   : > { %s1735_s12 = smov 128   ;;  %s1736_s13 = smov 8  }
  0x22   : > { %s2111_s1 = sld [smem:[#allocation15_spill]]  ;;  %s1590_s16 = scalar_lea.vmem %s223_s10, 512 }
  0x23   : > { %p1591_p1 = scmp.ne.s32.totalorder %s223_s10, %s1590_s16  ;;  %p1598_p2 = scmp.lt.s32.totalorder %s223_s10, %s223_s10 }
  0x24   : > { %p1599_p6 = scmp.lt.s32.totalorder %s1590_s16, %s1590_s16 }
  0x25   : > { %p1593_p13 = pnand %p1591_p1, %p1555_p12 }
  0x26   : > { %p1600_p5 = por %p1599_p6, %p1598_p2 }
  0x27   : > { %p1594_p0 = pneg %p1593_p13 }
  0x28   : > { %1463 = dma.hbm_to_vmem [thread:$0]  (!%p1841_p11), %s2111_s1, 512, %s207_s7, [#allocation6], %s1735_s12, %s1735_s12, %s1736_s13  }
  0x29   : > { %p1601_p10 = pnand %p1600_p5, %p1594_p0 }
  0x2b   : > { %1604 = shalt.err (!%p1601_p10)
}
  0x2c   : > { %1466 = dma.hbm_to_vmem [thread:$0]  (!%p1841_p11), %s2098_s3, 512, %s223_s10, [#allocation6], %s1735_s12, %s1735_s12, %s1736_s13  }
  0x2d   : > { %s1864_s19 = sadd.s32 1, %s1731_s24   ;;  %s34_s20 = sadd.s32 1, %s1727_s23 }
  0x2e   : > { %s31_s26 = ssub.s32 %s1731_s24, %s1864_s19  ;;  %p41_p1 = scmp.ne.s32.totalorder %s1727_s23, %s1723_s22 }
  0x2f   : > { %p32_p2 = scmp.eq.s32.totalorder %s31_s26, 0  ;;  %p42_p6 = scmp.eq.s32.totalorder %s1731_s24, 0 }
  0x30   : > { %p2112_p12 = scmp.eq.s32.totalorder %s1813_s25, 1  ;;  %p1480_p7 = scmp.lt.s32.totalorder %s1731_s24, 2 }
  0x31   : > { %s1880_s7 = scalar_select %p32_p2, %s1727_s23, %s34_s20  }
  0x32   : > { %p1874_p3 = por %p2112_p12, %p41_p1  ;;  %p43_p9 = por %p42_p6, %p41_p1 }
  0x33   : > { %s239_s8 = sand.u32 1, %s1727_s23   ;;  %s1324_s10 = sshll.u32 %s1731_s24, 7 }
  0x34   : > { %s2113_s30 = scalar_select %p1874_p3, 1, 0 }
  0x35   : > { %s1323_s9 = sshll.u32 %s239_s8, 3  ;;  %s1887_s13 = scalar_lea.hbm %s2095_s0, %s1324_s10 }
  0x36   : > { %s243_s14 = scalar_lea.vmem [#allocation2], %s1323_s9  ;;  %p1889_p11 = pnand %p1480_p7, %p43_p9 }
  0x37   : > { %s250_s15 = sshll.u32 %s243_s14, 4  ;;  %s240_s17 = scalar_lea.sflag [#allocation3], %s239_s8  ;;  %s251_s15 = int_to_ptr.vmem [resolvable:$true] %s250_s15 }
  0x38   : > { %s1605_s18 = scalar_lea.hbm %s1887_s13, 128  ;;  %p1607_p0 = pneg %p1889_p11 }
  0x39   : > { %p1606_p13 = scmp.ne.s32.totalorder %s1887_s13, %s1605_s18  ;;  %s1610_s10 = scalar_lea.hbm %s2095_s0, 256 }
  0x3a   : > { %p1611_p1 = scmp.lt.s32.totalorder %s1887_s13, %s2095_s0  ;;  %p1612_p2 = scmp.lt.s32.totalorder %s1610_s10, %s1605_s18 }
  0x3b   : > { %p1608_p5 = pnand %p1607_p0, %p1606_p13 }
  0x3c   : > { %p1613_p6 = por %p1612_p2, %p1611_p1 }
  0x3d   : > { %p1609_p10 = pneg %p1608_p5 }
  0x3f   : > { %p1614_p12 = pnand %p1613_p6, %p1609_p10 }
  0x41   : > { %1617 = shalt.err (!%p1614_p12)
}
  0x42   : > { %s1618_s12 = scalar_lea.vmem %s251_s15, 128  ;;  %s1737_s8 = smov [#allocation2]  }
  0x43   : > { %p1619_p7 = scmp.ne.s32.totalorder %s251_s15, %s1618_s12  ;;  %s1623_s14 = sshll.u32 %s1737_s8, 4  ;;  %s1624_s14 = int_to_ptr.vmem [resolvable:$false] %s1623_s14 }
  0x44   : > { %s1625_s1 = scalar_lea.vmem %s1624_s14, 256  ;;  %p1626_p13 = scmp.lt.s32.totalorder %s251_s15, %s1624_s14 }
  0x45   : > { %p1621_p9 = pnand %p1619_p7, %p1607_p0  ;;  %p1627_p5 = scmp.lt.s32.totalorder %s1625_s1, %s1618_s12 }
  0x47   : > { %p1622_p3 = pneg %p1621_p9  ;;  %p1628_p4 = por %p1627_p5, %p1626_p13 }
  0x49   : > { %p1629_p8 = pnand %p1628_p4, %p1622_p3 }
  0x4b   : > { %1632 = shalt.err (!%p1629_p8)
}
  0x4c   : > { %1470 = dma.hbm_to_vmem [thread:$0]  (!%p1889_p11), %s1887_s13, 128, %s251_s15, %s240_s17  }
  0x4d   : > { %p2115_p10 = scmp.ne.s32.totalorder %s2109_s29, 0 }
  0x4e   : > { %s1910_s18 = sand.u32 (!%p2115_p10), 1, %s1723_s22   ;;  %p2116_p4 = scmp.ne.s32.totalorder (!%p2115_p10), %s2107_s27, 0 }
  0x4f   : > { %259 = sbr.rel (%p2115_p10) target bundleno = 1987 (0x7c3), region = 40  ;;  %s1326_s20 = sshll.u32 (!%p2115_p10), %s1910_s18, 3 }
  0x50   : > { %s262_s26 = scalar_lea.sflag (!%p2115_p10), [#allocation3], %s1910_s18  ;;  %s265_s1 = scalar_lea.vmem (!%p2115_p10), [#allocation2], %s1326_s20 }
  0x54   : > { %1702 = dma.done.wait (%p2116_p4), %s262_s26, 128  }
  0x55   : > { %1704 = vsyncadd (%p2116_p4), %s262_s26, 4294967168  ;;  %p2117_p8 = scmp.eq.s32.totalorder %s1813_s25, 0 }
  0x57   : > { %1706 = dma.done.wait (%p2117_p8), [#allocation6], 1024   ;;  %p2118_p3 = pmov %p2117_p8 }
  0x58   : > { %v1738_v0 = vmov 0.0   ;;  %vm1739_vm0 = vmmov 0   ;;  %v311_v1 = vld [vmem:[#allocation5 + $0x18] sm:$0xff]  ;;  %v310_v2 = vld [vmem:[#allocation5 + $0x10] sm:$0xff]  ;;  %v309_v3 = vld [vmem:[#allocation5 + $0x8] sm:$0xff]  ;;  %vm319_vm1 = vcmask 261120  }
  0x59   : > { %1708 = vsyncadd (%p2118_p3), [#allocation6], 4294966272  ;;  %1384 = vmatprep.subr.mxu0 %v1738_v0  ;;  %1392 = vmatprep.mubr.msk.f32.mxu0 %vm1739_vm0, %v1738_v0  ;;  %v308_v4 = vld [vmem:[#allocation5] sm:$0xff]  ;;  %v307_v5 = vld [vmem:[%s265_s1] sm:$0xff]  ;;  %s1740_s13 = smov 64   ;;  %s1741_s15 = smov 96  }
  0x5a   : > { %1395 = vmatprep.subr.mxu1 %v1738_v0  ;;  %1397 = vmatprep.mubr.msk.f32.mxu1 %vm1739_vm0, %v1738_v0  ;;  %v1331_v6 = vld [vmem:[%s2097_s2] ss:$0 sm:$0xff]  ;;  %s1742_s16 = smov 88   ;;  %s1743_s17 = smov 120   ;;  %vm396_vm2 = vcmask 64512   ;;  %vm1073_vm3 = vcmask 130048  }
  0x5b   : > { %1385 = vmatpush3.msra.mxu0 %v311_v1  ;;  %s1744_s10 = smov 80   ;;  %s1745_s11 = smov 72   ;;  %vm1075_vm4 = vcmask 195584  }
  0x5c   : > { %1386 = vmatprep.subr.mxu0 %v1738_v0  ;;  %s1746_s9 = smov 112   ;;  %s1747_s12 = smov 104  }
  0x5d   : > { %1387 = vmatpush3.msra.mxu0 %v310_v2  ;;  %s1330_s8 = sshll.u32 %s1910_s18, 5  ;;  %s1748_s26 = smov 56  }
  0x5e   : > { %1388 = vmatprep.subr.mxu0 %v1738_v0  ;;  %s1970_s14 = scalar_lea.vmem [#allocation9], %s1330_s8  ;;  %s1749_s1 = smov 48  }
  0x5f   : > { %1389 = vmatpush3.msra.mxu0 %v309_v3  ;;  %s1750_s27 = smov 40   ;;  %s1751_s29 = smov 8  }
  0x60   : > { %1390 = vmatprep.subr.mxu0 %v1738_v0  ;;  %p2119_p0 = scmp.ne.s32.totalorder %s2113_s30, 0 }
  0x61   : > { %1391 = vmatpush3.msra.mxu0 %v308_v4  ;;  %v1080_v4 = vld [vmem:[#allocation7 + $0x18] sm:$0xff] }
  0x62   : > { %1393 = vmatmul.mubr.msk.f32.vlgmr.msra.gmra.mxu0 %vm319_vm1, %v307_v5  ;;  %1415 = vmatprep.subr.mxu0 %v1738_v0  ;;  %v1079_v5 = vld [vmem:[#allocation7 + $0x10] sm:$0xff] }
  0x63   : > { %1417 = vmatprep.mubr.msk.f32.mxu0 %vm1739_vm0, %v1738_v0 }
 0x122   : > { %v389_v7 = vpop.f32.mrf.mxu0 }
 0x123   : > { %v1940_v8 = vadd.f32 %v1331_v6, %v389_v7  ;;  %v1078_v6 = vld [vmem:[#allocation7 + $0x8] sm:$0xff]  ;;  %v1077_v7 = vld [vmem:[#allocation7] sm:$0xff] }
 0x124   : > { %v1394_v9 = vpop.f32.mrf.mxu0 }
 0x125   : > { %483 = vrot.lane.b32.xlu1 %v1940_v8, %s1740_s13  ;;  %394 = vrot.lane.b32.xlu0 %v1940_v8, %s1741_s15  ;;  %s1752_s13 = smov 16   ;;  %s1753_s15 = smov 24  }
 0x129   : > { %561 = vrot.lane.b32.xlu1 %v1940_v8, %s1742_s16  ;;  %s1357_s16 = sshll.u32 %s1813_s25, 9 }
 0x12d   : > { %559 = vrot.lane.b32.xlu1 %v1940_v8, %s1743_s17  ;;  %s1194_s17 = sshll.u32 %s1970_s14, 4  ;;  %s2022_s17 = int_to_ptr.vmem [resolvable:$true] %s1194_s17 }
 0x12e   : > { %s1633_s8 = scalar_lea.vmem %s2022_s17, 512 }
 0x12f   : > { %p1634_p11 = scmp.ne.s32.totalorder %s2022_s17, %s1633_s8 }
 0x131   : > { %728 = vrot.lane.b32.xlu1 %v1940_v8, %s1744_s10  ;;  %p1635_p1 = pnand %p1634_p11, %p2119_p0 }
 0x133   : > { %p1636_p2 = pneg %p1635_p1 }
 0x197   : > { %v484_v10 = vpop.permute.xlu1 %483  ;;  %v395_v11 = vpop.permute.xlu0 %394 }
 0x198   : > { %1396 = vmatpush3.xpose.msk.msra.mxu1 %vm396_vm2, %v395_v11 }
 0x199   : > { %1400 = vmatprep.subr.mxu1 %v1738_v0 }
 0x19b   : > { %v562_v12 = vpop.permute.xlu1 %561  ;;  %1398 = vmatmul.mubr.msk.f32.vlgmr.msra.gmra.mxu1 %vm396_vm2, %v1940_v8 }
 0x19c   : > { %1401 = vmatpush3.msra.mxu1 %v484_v10  ;;  %1402 = vmatprep.mubr.msk.f32.mxu1 %vm1739_vm0, %v1738_v0 }
 0x19d   : > { %1405 = vmatprep.subr.mxu1 %v1738_v0 }
 0x19f   : > { %v560_v13 = vpop.permute.xlu1 %559 }
 0x1a3   : > { %v729_v14 = vpop.permute.xlu1 %728 }
 0x1a4   : > { %1416 = vmatpush3.xpose.msk.msra.mxu0 %vm396_vm2, %v729_v14 }
 0x1a5   : > { %1425 = vmatprep.subr.mxu0 %v1738_v0 }
 0x25b   : > { %v467_v15 = vpop.f32.mrf.mxu1 }
 0x25c   : > { %v471_v16 = vsel %vm396_vm2, %v467_v15, -inf }
 0x25d   : > { %472 = vmax.xlane.f32.xlu0 %v471_v16  ;;  %v1399_v17 = vpop.f32.mrf.mxu1 }
 0x273   : > { %895 = vrot.lane.b32.xlu0 %v1940_v8, %s1745_s11 }
 0x2e6   : > { %v473_v18 = vpop.xlane.xlu0 %472 }
 0x2e7   : > { %v474_v19 = vsub.f32 %v467_v15, %v473_v18 }
 0x2e9   : > { %v475_v20 = vmul.f32 1.442695, %v474_v19 }
 0x2ea   : > { %v896_v25 = vpop.permute.xlu0 %895 }
 0x2eb   : > { %1537 = vpow2.f32 %v475_v20 }
 0x2f8   : > { %v1538_v21 = vpop.eup %1537 }
 0x2f9   : > { %v477_v22 = vsel %vm396_vm2, %v1538_v21, 0.0 }
 0x2fa   : > { %478 = vadd.xlane.f32.xlu1 %v477_v22 }
 0x30b   : > { %726 = vrot.lane.b32.xlu1 %v1940_v8, %s1746_s9  ;;  %s2020_s9 = scalar_lea.hbm %s2101_s6, %s1357_s16 }
 0x30f   : > { %893 = vrot.lane.b32.xlu1 %v1940_v8, %s1747_s12  ;;  %s1168_s12 = scalar_lea.sflag [#allocation10], %s1910_s18 }
 0x383   : > { %v479_v23 = vpop.xlane.xlu1 %478 }
 0x384   : > { %1539 = vrcp.f32 %v479_v23 }
 0x387   : > { %v727_v24 = vpop.permute.xlu1 %726 }
 0x388   : > { %1418 = vmatmul.mubr.msk.f32.vlgmr.msra.gmra.mxu0 %vm396_vm2, %v727_v24 }
 0x389   : > { %1426 = vmatpush3.xpose.msk.msra.mxu0 %vm396_vm2, %v896_v25  ;;  %1427 = vmatprep.mubr.msk.f32.mxu0 %vm1739_vm0, %v1738_v0 }
 0x38a   : > { %1435 = vmatprep.subr.mxu0 %v1738_v0 }
 0x38b   : > { %v894_v26 = vpop.permute.xlu1 %893 }
 0x38c   : > { %1428 = vmatmul.mubr.msk.f32.vlgmr.msra.gmra.mxu0 %vm396_vm2, %v894_v26 }
 0x38d   : > { %1443 = vmatprep.mubr.msk.f32.mxu0 %vm1739_vm0, %v1738_v0  ;;  %1436 = vmatpush3.msra.mxu0 %v1080_v4 }
 0x38e   : > { %1437 = vmatprep.subr.mxu0 %v1738_v0 }
 0x38f   : > { %1438 = vmatpush3.msra.mxu0 %v1079_v5 }
 0x390   : > { %1439 = vmatprep.subr.mxu0 %v1738_v0 }
 0x391   : > { %v1540_v27 = vpop.eup %1539  ;;  %1440 = vmatpush3.msra.mxu0 %v1078_v6 }
 0x392   : > { %v481_v28 = vmul.f32 %v1540_v27, %v1538_v21  ;;  %1441 = vmatprep.subr.mxu0 %v1738_v0 }
 0x393   : > { %1442 = vmatpush3.msra.mxu0 %v1077_v7 }
 0x394   : > { %482 = vst.msk [vmem:[%s1970_s14] sm:$0xff] %vm396_vm2, %v481_v28  ;;  %1403 = vmatmul.mubr.msk.f32.vlgmr.msra.gmra.mxu1 %vm396_vm2, %v481_v28 }
 0x395   : > { %1406 = vmatpush3.xpose.msk.msra.mxu1 %vm396_vm2, %v562_v12  ;;  %1407 = vmatprep.mubr.msk.f32.mxu1 %vm1739_vm0, %v1738_v0 }
 0x396   : > { %1410 = vmatprep.subr.mxu1 %v1738_v0 }
 0x398   : > { %1408 = vmatmul.mubr.msk.f32.vlgmr.msra.gmra.mxu1 %vm396_vm2, %v560_v13 }
 0x399   : > { %1412 = vmatprep.mubr.msk.f32.mxu1 %vm1739_vm0, %v1738_v0 }
 0x448   : > { %v800_v29 = vpop.f32.mrf.mxu0 }
 0x449   : > { %v804_v30 = vsel %vm396_vm2, %v800_v29, -inf }
 0x44a   : > { %805 = vmax.xlane.f32.xlu0 %v804_v30  ;;  %v1419_v31 = vpop.f32.mrf.mxu0 }
 0x44c   : > { %v967_v32 = vpop.f32.mrf.mxu0 }
 0x44d   : > { %v971_v39 = vsel %vm396_vm2, %v967_v32, -inf }
 0x44e   : > { %v1429_v33 = vpop.f32.mrf.mxu0 }
 0x454   : > { %v1983_v34 = vpop.f32.mrf.mxu1 }
 0x456   : > { %v1404_v35 = vpop.f32.mrf.mxu1 }
 0x458   : > { %v633_v36 = vpop.f32.mrf.mxu1 }
 0x459   : > { %v637_v37 = vsel %vm396_vm2, %v633_v36, -inf }
 0x45a   : > { %638 = vmax.xlane.f32.xlu1 %v637_v37  ;;  %v1409_v38 = vpop.f32.mrf.mxu1 }
 0x45e   : > { %972 = vmax.xlane.f32.xlu1 %v971_v39 }
 0x4d3   : > { %v806_v40 = vpop.xlane.xlu0 %805 }
 0x4d4   : > { %v807_v41 = vsub.f32 %v800_v29, %v806_v40 }
 0x4d6   : > { %v808_v42 = vmul.f32 1.442695, %v807_v41 }
 0x4d8   : > { %1541 = vpow2.f32 %v808_v42 }
 0x4e3   : > { %v639_v43 = vpop.xlane.xlu1 %638 }
 0x4e4   : > { %v640_v51 = vsub.f32 %v633_v36, %v639_v43 }
 0x4e5   : > { %v1542_v44 = vpop.eup %1541 }
 0x4e6   : > { %v810_v45 = vsel %vm396_vm2, %v1542_v44, 0.0  ;;  %v641_v52 = vmul.f32 1.442695, %v640_v51 }
 0x4e7   : > { %811 = vadd.xlane.f32.xlu1 %v810_v45  ;;  %v973_v46 = vpop.xlane.xlu1 %972 }
 0x4e8   : > { %v974_v47 = vsub.f32 %v967_v32, %v973_v46 }
 0x4ea   : > { %v975_v48 = vmul.f32 1.442695, %v974_v47 }
 0x4ec   : > { %1543 = vpow2.f32 %v975_v48 }
 0x4ed   : > { %1545 = vpow2.f32 %v641_v52 }
 0x4f8   : > { %650 = vrot.lane.b32.xlu1 %v1940_v8, %s1748_s26  ;;  %s1754_s26 = smov [#allocation9]  }
 0x4f9   : > { %v1544_v49 = vpop.eup %1543 }
 0x4fa   : > { %v977_v50 = vsel %vm396_vm2, %v1544_v49, 0.0  ;;  %v1546_v53 = vpop.eup %1545 }
 0x4fb   : > { %978 = vadd.xlane.f32.xlu0 %v977_v50  ;;  %v643_v54 = vsel %vm396_vm2, %v1546_v53, 0.0 }
 0x511   : > { %817 = vrot.lane.b32.xlu0 %v1940_v8, %s1749_s1  ;;  %s1637_s1 = sshll.u32 %s1754_s26, 4  ;;  %s1638_s1 = int_to_ptr.vmem [resolvable:$false] %s1637_s1 }
 0x512   : > { %p1640_p6 = scmp.lt.s32.totalorder %s2022_s17, %s1638_s1 }
 0x51c   : > { %644 = vadd.xlane.f32.xlu1 %v643_v54 }
 0x52d   : > { %984 = vrot.lane.b32.xlu1 %v1940_v8, %s1750_s27 }
 0x570   : > { %v812_v55 = vpop.xlane.xlu1 %811 }
 0x571   : > { %1547 = vrcp.f32 %v812_v55 }
 0x574   : > { %v651_v56 = vpop.permute.xlu1 %650 }
 0x575   : > { %1411 = vmatpush3.msra.mxu1 %v651_v56 }
 0x576   : > { %1420 = vmatprep.subr.mxu1 %v1738_v0 }
 0x57e   : > { %v1548_v57 = vpop.eup %1547 }
 0x57f   : > { %v814_v58 = vmul.f32 %v1548_v57, %v1542_v44 }
 0x581   : > { %1342 = vst.msk [vmem:[%s1970_s14 + $0x10] sm:$0xff] %vm396_vm2, %v814_v58 }
 0x584   : > { %v979_v59 = vpop.xlane.xlu0 %978 }
 0x585   : > { %1549 = vrcp.f32 %v979_v59 }
 0x588   : > { %v818_v2 = vpop.permute.xlu0 %817 }
 0x592   : > { %v1550_v60 = vpop.eup %1549 }
 0x593   : > { %v981_v61 = vmul.f32 %v1550_v60, %v1544_v49 }
 0x595   : > { %1346 = vst.msk [vmem:[%s1970_s14 + $0x18] sm:$0xff] %vm396_vm2, %v981_v61 }
 0x5a5   : > { %v645_v62 = vpop.xlane.xlu1 %644 }
 0x5a6   : > { %1551 = vrcp.f32 %v645_v62 }
 0x5a9   : > { %v985_v3 = vpop.permute.xlu1 %984 }
 0x5b3   : > { %v1552_v63 = vpop.eup %1551 }
 0x5b4   : > { %v647_v1 = vmul.f32 %v1552_v63, %v1546_v53 }
 0x5b6   : > { %1338 = vst.msk [vmem:[%s1970_s14 + $0x8] sm:$0xff] %vm396_vm2, %v647_v1  ;;  %1413 = vmatmul.mubr.msk.f32.vlgmr.msra.gmra.mxu1 %vm396_vm2, %v647_v1  ;;  %s1639_s14 = scalar_lea.vmem %s1638_s1, 1024 }
 0x5b7   : > { %1421 = vmatpush3.msra.mxu1 %v818_v2  ;;  %1422 = vmatprep.mubr.msk.f32.mxu1 %vm1739_vm0, %v1738_v0  ;;  %p1641_p12 = scmp.lt.s32.totalorder %s1639_s14, %s1633_s8 }
 0x5b8   : > { %1430 = vmatprep.subr.mxu1 %v1738_v0 }
 0x5b9   : > { %p1642_p7 = por %p1641_p12, %p1640_p6 }
 0x5ba   : > { %1423 = vmatmul.mubr.msk.f32.vlgmr.msra.gmra.mxu1 %vm396_vm2, %v814_v58 }
 0x5bb   : > { %1431 = vmatpush3.msra.mxu1 %v985_v3  ;;  %1432 = vmatprep.mubr.msk.f32.mxu1 %vm1739_vm0, %v1738_v0  ;;  %p1643_p9 = pnand %p1642_p7, %p1636_p2 }
 0x5be   : > { %1433 = vmatmul.mubr.msk.f32.vlgmr.msra.gmra.mxu1 %vm396_vm2, %v981_v61 }
 0x676   : > { %v722_v8 = vpop.f32.mrf.mxu1 }
 0x677   : > { %1061 = vrot.lane.b32.xlu1 %v722_v8, %s1751_s29 }
 0x678   : > { %v1414_v9 = vpop.f32.mrf.mxu1 }
 0x67a   : > { %v889_v10 = vpop.f32.mrf.mxu1 }
 0x67b   : > { %1065 = vrot.lane.b32.xlu0 %v889_v10, %s1752_s13 }
 0x67c   : > { %v1424_v11 = vpop.f32.mrf.mxu1 }
 0x67e   : > { %v1056_v12 = vpop.f32.mrf.mxu1 }
 0x67f   : > { %1069 = vrot.lane.b32.xlu1 %v1056_v12, %s1753_s15 }
 0x680   : > { %v1434_v13 = vpop.f32.mrf.mxu1 }
 0x6e9   : > { %v1062_v14 = vpop.permute.xlu1 %1061 }
 0x6ea   : > { %v1072_v15 = vsel %vm396_vm2, %v1983_v34, %v1062_v14 }
 0x6ed   : > { %v1066_v0 = vpop.permute.xlu0 %1065 }
 0x6ee   : > { %v1074_v16 = vsel %vm1073_vm3, %v1072_v15, %v1066_v0 }
 0x6f1   : > { %v1070_v17 = vpop.permute.xlu1 %1069 }
 0x6f2   : > { %v1076_v18 = vsel %vm1075_vm4, %v1074_v16, %v1070_v17 }
 0x6f3   : > { %1444 = vmatmul.mubr.msk.f32.vlgmr.msra.gmra.mxu0 %vm319_vm1, %v1076_v18 }
 0x6f4   : > { %1646 = shalt.err (!%p1643_p9)
}
 0x6f5   : > { %s1647_s27 = scalar_lea.hbm %s2020_s9, 512  ;;  %s1651_s16 = scalar_lea.hbm %s2101_s6, 1024 }
 0x6f6   : > { %p1648_p13 = scmp.ne.s32.totalorder %s2020_s9, %s1647_s27  ;;  %p1652_p4 = scmp.lt.s32.totalorder %s2020_s9, %s2101_s6 }
 0x6f7   : > { %p1653_p8 = scmp.lt.s32.totalorder %s1651_s16, %s1647_s27 }
 0x6f8   : > { %p1649_p5 = pnand %p1648_p13, %p2119_p0 }
 0x6f9   : > { %p1654_p3 = por %p1653_p8, %p1652_p4 }
 0x6fa   : > { %p1650_p10 = pneg %p1649_p5 }
 0x6fc   : > { %p1655_p11 = pnand %p1654_p3, %p1650_p10 }
 0x6fe   : > { %1658 = shalt.err (!%p1655_p11)
}
 0x6ff   : > { %s1755_s8 = smov 128   ;;  %v1348_v19 = vld [vmem:[%s2099_s4] ss:$0 sm:$0xff]  ;;  %s1352_s14 = sshll.u32 %s1813_s25, 7 }
 0x700   : > { %1457 = dma.vmem_to_hbm [thread:$0]  (%p2119_p0), %s2022_s17, 512, %s2020_s9, %s1168_s12, %s1755_s8, %s1755_s8, %s1751_s29  }
 0x701   : > { %s299_s27 = scalar_lea.vmem [#allocation8], %s1326_s20  ;;  %s2057_s10 = scalar_lea.hbm %s2100_s5, %s1352_s14 }
 0x702   : > { %s1181_s13 = sshll.u32 %s299_s27, 4  ;;  %s1163_s29 = scalar_lea.sflag [#allocation4], %s1910_s18  ;;  %s1182_s13 = int_to_ptr.vmem [resolvable:$true] %s1181_s13 }
 0x703   : > { %s1659_s17 = scalar_lea.vmem %s1182_s13, 128  ;;  %s1756_s25 = smov [#allocation8]  }
 0x704   : > { %p1660_p1 = scmp.ne.s32.totalorder %s1182_s13, %s1659_s17  ;;  %s1663_s20 = sshll.u32 %s1756_s25, 4  ;;  %s1664_s20 = int_to_ptr.vmem [resolvable:$false] %s1663_s20 }
 0x705   : > { %s1665_s9 = scalar_lea.vmem %s1664_s20, 256  ;;  %p1666_p12 = scmp.lt.s32.totalorder %s1182_s13, %s1664_s20 }
 0x706   : > { %p1661_p2 = pnand %p1660_p1, %p2119_p0  ;;  %p1667_p7 = scmp.lt.s32.totalorder %s1665_s9, %s1659_s17 }
 0x708   : > { %p1662_p6 = pneg %p1661_p2  ;;  %p1668_p9 = por %p1667_p7, %p1666_p12 }
 0x70a   : > { %p1669_p13 = pnand %p1668_p9, %p1662_p6 }
 0x7b3   : > { %v1157_v20 = vpop.f32.mrf.mxu0 }
 0x7b4   : > { %v1158_v21 = vadd.f32 %v1348_v19, %v1157_v20 }
 0x7b5   : > { %v1445_v22 = vpop.f32.mrf.mxu0 }
 0x7b6   : > { %1161 = vst.msk [vmem:[%s299_s27] sm:$0xff] %vm319_vm1, %v1158_v21 }
 0x7b7   : > { %1672 = shalt.err (!%p1669_p13)
}
 0x7b8   : > { %s1673_s12 = scalar_lea.hbm %s2057_s10, 128  ;;  %s1677_s8 = scalar_lea.hbm %s2100_s5, 256 }
 0x7b9   : > { %p1674_p5 = scmp.ne.s32.totalorder %s2057_s10, %s1673_s12  ;;  %p1678_p8 = scmp.lt.s32.totalorder %s2057_s10, %s2100_s5 }
 0x7ba   : > { %p1679_p3 = scmp.lt.s32.totalorder %s1677_s8, %s1673_s12 }
 0x7bb   : > { %p1675_p10 = pnand %p1674_p5, %p2119_p0 }
 0x7bc   : > { %p1680_p11 = por %p1679_p3, %p1678_p8 }
 0x7bd   : > { %p1676_p4 = pneg %p1675_p10 }
 0x7bf   : > { %p1681_p1 = pnand %p1680_p11, %p1676_p4 }
 0x7c1   : > { %1684 = shalt.err (!%p1681_p1)
}
 0x7c2   : > { %1456 = dma.vmem_to_hbm [thread:$0]  (%p2119_p0), %s1182_s13, 128, %s2057_s10, %s1163_s29  }
 0x7c3 PF: > { %s1209_s14 = sand.u32 1, %s1719_s21   ;;  %p2120_p2 = scmp.ne.s32.totalorder %s2108_s28, 0 }
 0x7c4   : > { %p2121_p6 = scmp.ge.s32.totalorder %s1731_s24, 2  ;;  %s1210_s27 = scalar_lea.sflag [#allocation4], %s1209_s14 }
 0x7c6   : > { %p1472_p12 = pnand %p2121_p6, %p2120_p2 }
 0x7c8   : > { %p1473_p7 = pneg %p1472_p12 }
 0x7ca   : > { %1710 = dma.done.wait (%p1473_p7), %s1210_s27, 128  }
 0x7cb   : > { %1712 = vsyncadd (%p1473_p7), %s1210_s27, 4294967168  ;;  %s1219_s15 = scalar_lea.sflag [#allocation10], %s1209_s14 }
 0x7cc   : > { %1714 = dma.done.wait (%p1473_p7), %s1219_s15, 512  }
 0x7cd   : > { %1716 = vsyncadd (%p1473_p7), %s1219_s15, 4294966784  ;;  %p24_p0 = scmp.ge.s32.totalorder %s1864_s19, 4   ;;  %s2122_s21 = smov %s1723_s22 }
 0x7ce   : > { %s2123_s22 = smov %s1727_s23  ;;  %s2124_s23 = smov %s1880_s7 }
 0x7cf   : > { %s2125_s24 = smov %s1864_s19  ;;  %26 = sbr.rel (!%p24_p0) target bundleno = 10 (0xa), region = 113 }
 0x7d4   :  { %1224 = vsyncpa [#allocation3], 1 }
 0x7d5   :  { %1226 = vsyncpa [#allocation3 + $0x1], 1 }
 0x7d6   :  { %1227 = vsyncpa [#allocation6], 1 }
 0x7d7   :  { %1228 = vsyncpa [#allocation4], 1 }
 0x7d8   :  { %1230 = vsyncpa [#allocation4 + $0x1], 1 }
 0x7d9   :  { %1231 = vsyncpa [#allocation10], 1 }
 0x7da   :  { %1233 = vsyncpa [#allocation10 + $0x1], 1 }

// kernel: tpu_custom_call.1
= control target key start
LH: loop header
LB: loop body
LE: loop exit
PB: predicated region body
PF: predicated region fallthrough
CT: control target
= control target key end

     0   :  { %s2095_s0 = inlined_call_operand.hbm [shape: f32[2,8,32], index: 0, kind: input, shape index: {}]   ;;  %s2096_s1 = inlined_call_operand.hbm [shape: f32[32,96], index: 1, kind: input, shape index: {}]   ;;  %s2097_s2 = inlined_call_operand.vmem [shape: f32[1,96], index: 2, kind: input, shape index: {}]   ;;  %s2098_s3 = inlined_call_operand.hbm [shape: f32[32,32], index: 3, kind: input, shape index: {}]   ;;  %s2099_s4 = inlined_call_operand.vmem [shape: f32[1,32], index: 4, kind: input, shape index: {}]   ;;  %s2100_s5 = inlined_call_operand.hbm [shape: f32[2,8,32], index: 5, kind: output, shape index: {0}]   ;;  %s2101_s6 = inlined_call_operand.hbm [shape: f32[2,4,8,8], index: 6, kind: output, shape index: {1}]  }
   0x1   :  { %2106 = sst [smem:[#allocation16_spill]] %s2096_s1 }
   0x2   :  { %12 = vsyncpa [#allocation4], 0 }
   0x3   :  { %14 = vsyncpa [#allocation4 + $0x1], 0 }
   0x4   :  { %15 = vsyncpa [#allocation7], 0 }
   0x5   :  { %16 = vsyncpa [#allocation5], 0 }
   0x6   :  { %18 = vsyncpa [#allocation5 + $0x1], 0 }
   0x7   :  { %19 = vsyncpa [#allocation11], 0 }
   0x8   :  { %21 = vsyncpa [#allocation11 + $0x1], 0  ;;  %s1795_s21 = smov 0   ;;  %s1797_s22 = smov 0  }
   0x9   :  { %s1799_s23 = smov 0   ;;  %s1801_s24 = smov 0  }
   0xa LB: > { %s1816_s25 = sadd.s32 4294967295, %s1734_s24   ;;  %s1321_s26 = sadd.s32 4294967294, %s1734_s24   ;;  %s1734_s24 = sphi %s1801_s24, %s2125_s24   ;;  %s1730_s23 = sphi %s1799_s23, %s2124_s23   ;;  %s1726_s22 = sphi %s1797_s22, %s2123_s22   ;;  %s1722_s21 = sphi %s1795_s21, %s2122_s21  }
   0xb   : > { %p47_p0 = scmp.ne.s32.totalorder %s1726_s22, %s1722_s21  ;;  %p2102_p1 = scmp.eq.s32.totalorder %s1816_s25, 0 }
   0xc   : > { %p161_p3 = scmp.eq.s32.totalorder %s1321_s26, 1  ;;  %p1322_p5 = scmp.ge.s32.totalorder %s1734_s24, 1 }
   0xd   : > { %p1825_p4 = por %p2102_p1, %p47_p0  ;;  %p194_p7 = scmp.lt.s32.totalorder %s1734_s24, 3 }
   0xe   : > { %p1830_p6 = por %p161_p3, %p47_p0  ;;  %s1736_s30 = smov [#allocation6]  }
   0xf   : > { %s2107_s27 = scalar_select %p1825_p4, 1, 0 }
  0x10   : > { %s2108_s28 = scalar_select %p1830_p6, 1, 0 }
  0x11   : > { %p1835_p8 = pnand %p1322_p5, %p194_p7  ;;  %s206_s7 = sshll.u32 %s1736_s30, 4  ;;  %s207_s7 = int_to_ptr.vmem [resolvable:$true] %s206_s7 }
  0x12   : > { %s1737_s9 = smov [#allocation8]   ;;  %s1567_s11 = scalar_lea.vmem %s207_s7, 512 }
  0x13   : > { %s2109_s29 = scalar_select %p1835_p8, 1, 0 }
  0x14   : > { %p1463_p9 = pneg %p1835_p8  ;;  %s222_s10 = sshll.u32 %s1737_s9, 4  ;;  %s223_s10 = int_to_ptr.vmem [resolvable:$true] %s222_s10 }
  0x15   : > { %p1568_p13 = scmp.ne.s32.totalorder %s207_s7, %s1567_s11  ;;  %p1575_p5 = scmp.lt.s32.totalorder %s207_s7, %s207_s7 }
  0x16   : > { %p1844_p11 = pnand %p1463_p9, %p2102_p1  ;;  %p1576_p7 = scmp.lt.s32.totalorder %s1567_s11, %s1567_s11 }
  0x18   : > { %p1558_p12 = pneg %p1844_p11  ;;  %p1577_p10 = por %p1576_p7, %p1575_p5 }
  0x1a   : > { %p1570_p0 = pnand %p1568_p13, %p1558_p12 }
  0x1c   : > { %p1571_p3 = pneg %p1570_p0 }
  0x1e   : > { %p1578_p9 = pnand %p1577_p10, %p1571_p3 }
  0x20   : > { %1581 = shalt.err (!%p1578_p9)
}
  0x21   : > { %s1738_s12 = smov 128   ;;  %s1739_s13 = smov 8  }
  0x22   : > { %s2111_s1 = sld [smem:[#allocation16_spill]]  ;;  %s1593_s16 = scalar_lea.vmem %s223_s10, 512 }
  0x23   : > { %p1594_p1 = scmp.ne.s32.totalorder %s223_s10, %s1593_s16  ;;  %p1601_p2 = scmp.lt.s32.totalorder %s223_s10, %s223_s10 }
  0x24   : > { %p1602_p6 = scmp.lt.s32.totalorder %s1593_s16, %s1593_s16 }
  0x25   : > { %p1596_p13 = pnand %p1594_p1, %p1558_p12 }
  0x26   : > { %p1603_p5 = por %p1602_p6, %p1601_p2 }
  0x27   : > { %p1597_p0 = pneg %p1596_p13 }
  0x28   : > { %1466 = dma.hbm_to_vmem [thread:$0]  (!%p1844_p11), %s2111_s1, 512, %s207_s7, [#allocation7], %s1738_s12, %s1738_s12, %s1739_s13  }
  0x29   : > { %p1604_p10 = pnand %p1603_p5, %p1597_p0 }
  0x2b   : > { %1607 = shalt.err (!%p1604_p10)
}
  0x2c   : > { %1469 = dma.hbm_to_vmem [thread:$0]  (!%p1844_p11), %s2098_s3, 512, %s223_s10, [#allocation7], %s1738_s12, %s1738_s12, %s1739_s13  }
  0x2d   : > { %s1867_s19 = sadd.s32 1, %s1734_s24   ;;  %s34_s20 = sadd.s32 1, %s1730_s23 }
  0x2e   : > { %s31_s26 = ssub.s32 %s1734_s24, %s1867_s19  ;;  %p41_p1 = scmp.ne.s32.totalorder %s1730_s23, %s1726_s22 }
  0x2f   : > { %p32_p2 = scmp.eq.s32.totalorder %s31_s26, 0  ;;  %p42_p6 = scmp.eq.s32.totalorder %s1734_s24, 0 }
  0x30   : > { %p2112_p12 = scmp.eq.s32.totalorder %s1816_s25, 1  ;;  %p1483_p7 = scmp.lt.s32.totalorder %s1734_s24, 2 }
  0x31   : > { %s1883_s7 = scalar_select %p32_p2, %s1730_s23, %s34_s20  }
  0x32   : > { %p1877_p3 = por %p2112_p12, %p41_p1  ;;  %p43_p9 = por %p42_p6, %p41_p1 }
  0x33   : > { %s239_s8 = sand.u32 1, %s1730_s23   ;;  %s1327_s10 = sshll.u32 %s1734_s24, 7 }
  0x34   : > { %s2113_s30 = scalar_select %p1877_p3, 1, 0 }
  0x35   : > { %s1326_s9 = sshll.u32 %s239_s8, 3  ;;  %s1890_s13 = scalar_lea.hbm %s2095_s0, %s1327_s10 }
  0x36   : > { %s243_s14 = scalar_lea.vmem [#allocation3], %s1326_s9  ;;  %p1892_p11 = pnand %p1483_p7, %p43_p9 }
  0x37   : > { %s250_s15 = sshll.u32 %s243_s14, 4  ;;  %s240_s17 = scalar_lea.sflag [#allocation4], %s239_s8  ;;  %s251_s15 = int_to_ptr.vmem [resolvable:$true] %s250_s15 }
  0x38   : > { %s1608_s18 = scalar_lea.hbm %s1890_s13, 128  ;;  %p1610_p0 = pneg %p1892_p11 }
  0x39   : > { %p1609_p13 = scmp.ne.s32.totalorder %s1890_s13, %s1608_s18  ;;  %s1613_s10 = scalar_lea.hbm %s2095_s0, 256 }
  0x3a   : > { %p1614_p1 = scmp.lt.s32.totalorder %s1890_s13, %s2095_s0  ;;  %p1615_p2 = scmp.lt.s32.totalorder %s1613_s10, %s1608_s18 }
  0x3b   : > { %p1611_p5 = pnand %p1610_p0, %p1609_p13 }
  0x3c   : > { %p1616_p6 = por %p1615_p2, %p1614_p1 }
  0x3d   : > { %p1612_p10 = pneg %p1611_p5 }
  0x3f   : > { %p1617_p12 = pnand %p1616_p6, %p1612_p10 }
  0x41   : > { %1620 = shalt.err (!%p1617_p12)
}
  0x42   : > { %s1621_s12 = scalar_lea.vmem %s251_s15, 128  ;;  %s1740_s8 = smov [#allocation3]  }
  0x43   : > { %p1622_p7 = scmp.ne.s32.totalorder %s251_s15, %s1621_s12  ;;  %s1626_s14 = sshll.u32 %s1740_s8, 4  ;;  %s1627_s14 = int_to_ptr.vmem [resolvable:$false] %s1626_s14 }
  0x44   : > { %s1628_s1 = scalar_lea.vmem %s1627_s14, 256  ;;  %p1629_p13 = scmp.lt.s32.totalorder %s251_s15, %s1627_s14 }
  0x45   : > { %p1624_p9 = pnand %p1622_p7, %p1610_p0  ;;  %p1630_p5 = scmp.lt.s32.totalorder %s1628_s1, %s1621_s12 }
  0x47   : > { %p1625_p3 = pneg %p1624_p9  ;;  %p1631_p4 = por %p1630_p5, %p1629_p13 }
  0x49   : > { %p1632_p8 = pnand %p1631_p4, %p1625_p3 }
  0x4b   : > { %1635 = shalt.err (!%p1632_p8)
}
  0x4c   : > { %1473 = dma.hbm_to_vmem [thread:$0]  (!%p1892_p11), %s1890_s13, 128, %s251_s15, %s240_s17  }
  0x4d   : > { %p2115_p10 = scmp.ne.s32.totalorder %s2109_s29, 0 }
  0x4e   : > { %s1913_s18 = sand.u32 (!%p2115_p10), 1, %s1726_s22   ;;  %p2116_p4 = scmp.ne.s32.totalorder (!%p2115_p10), %s2107_s27, 0 }
  0x4f   : > { %259 = sbr.rel (%p2115_p10) target bundleno = 1994 (0x7ca), region = 40  ;;  %s1329_s20 = sshll.u32 (!%p2115_p10), %s1913_s18, 3 }
  0x50   : > { %s262_s26 = scalar_lea.sflag (!%p2115_p10), [#allocation4], %s1913_s18  ;;  %s265_s1 = scalar_lea.vmem (!%p2115_p10), [#allocation3], %s1329_s20 }
  0x54   : > { %1705 = dma.done.wait (%p2116_p4), %s262_s26, 128  }
  0x55   : > { %1707 = vsyncadd (%p2116_p4), %s262_s26, 4294967168  ;;  %p2117_p8 = scmp.eq.s32.totalorder %s1816_s25, 0 }
  0x57   : > { %1709 = dma.done.wait (%p2117_p8), [#allocation7], 1024   ;;  %p2118_p3 = pmov %p2117_p8 }
  0x58   : > { %v1741_v0 = vmov 0.0   ;;  %vm1742_vm0 = vmmov 0   ;;  %v311_v1 = vld [vmem:[#allocation6 + $0x18] sm:$0xff]  ;;  %v310_v2 = vld [vmem:[#allocation6 + $0x10] sm:$0xff]  ;;  %v309_v3 = vld [vmem:[#allocation6 + $0x8] sm:$0xff]  ;;  %vm319_vm1 = vcmask 261120  }
  0x59   : > { %1711 = vsyncadd (%p2118_p3), [#allocation7], 4294966272  ;;  %1387 = vmatprep.subr.mxu0 %v1741_v0  ;;  %1395 = vmatprep.mubr.msk.f32.mxu0 %vm1742_vm0, %v1741_v0  ;;  %v308_v4 = vld [vmem:[#allocation6] sm:$0xff]  ;;  %v307_v5 = vld [vmem:[%s265_s1] sm:$0xff]  ;;  %s1743_s13 = smov 64   ;;  %s1744_s15 = smov 96  }
  0x5a   : > { %1398 = vmatprep.subr.mxu1 %v1741_v0  ;;  %1400 = vmatprep.mubr.msk.f32.mxu1 %vm1742_vm0, %v1741_v0  ;;  %v1334_v6 = vld [vmem:[%s2097_s2] ss:$0 sm:$0xff]  ;;  %s1745_s16 = smov 88   ;;  %s1746_s17 = smov 120   ;;  %vm396_vm2 = vcmask 64512   ;;  %vm731_vm3 = vcmask 130112  }
  0x5b   : > { %1388 = vmatpush3.msra.mxu0 %v311_v1  ;;  %s1747_s10 = smov 80   ;;  %s1748_s11 = smov 72   ;;  %vm904_vm4 = vcmask 195712   ;;  %vm1077_vm5 = vcmask 261312  }
  0x5c   : > { %1389 = vmatprep.subr.mxu0 %v1741_v0  ;;  %s1749_s9 = smov 112   ;;  %s1750_s12 = smov 104  }
  0x5d   : > { %1390 = vmatpush3.msra.mxu0 %v310_v2  ;;  %s1333_s8 = sshll.u32 %s1913_s18, 5  ;;  %s1751_s26 = smov 56  }
  0x5e   : > { %1391 = vmatprep.subr.mxu0 %v1741_v0  ;;  %s1973_s14 = scalar_lea.vmem [#allocation10], %s1333_s8  ;;  %s1752_s1 = smov 48  }
  0x5f   : > { %1392 = vmatpush3.msra.mxu0 %v309_v3  ;;  %s1753_s27 = smov 40   ;;  %s1754_s29 = smov 8  }
  0x60   : > { %1393 = vmatprep.subr.mxu0 %v1741_v0  ;;  %p2119_p0 = scmp.ne.s32.totalorder %s2113_s30, 0 }
  0x61   : > { %1394 = vmatpush3.msra.mxu0 %v308_v4  ;;  %v1083_v4 = vld [vmem:[#allocation8 + $0x18] sm:$0xff] }
  0x62   : > { %1396 = vmatmul.mubr.msk.f32.vlgmr.msra.gmra.mxu0 %vm319_vm1, %v307_v5  ;;  %1418 = vmatprep.subr.mxu0 %v1741_v0  ;;  %v1082_v5 = vld [vmem:[#allocation8 + $0x10] sm:$0xff] }
  0x63   : > { %1420 = vmatprep.mubr.msk.f32.mxu0 %vm1742_vm0, %v1741_v0 }
 0x122   : > { %v389_v7 = vpop.f32.mrf.mxu0 }
 0x123   : > { %v1943_v8 = vadd.f32 %v1334_v6, %v389_v7  ;;  %v1081_v6 = vld [vmem:[#allocation8 + $0x8] sm:$0xff] }
 0x124   : > { %v1397_v9 = vpop.f32.mrf.mxu0 }
 0x125   : > { %483 = vrot.lane.b32.xlu1 %v1943_v8, %s1743_s13  ;;  %394 = vrot.lane.b32.xlu0 %v1943_v8, %s1744_s15  ;;  %s1755_s13 = smov 16   ;;  %s1756_s15 = smov 24  }
 0x129   : > { %562 = vrot.lane.b32.xlu1 %v1943_v8, %s1745_s16  ;;  %s1360_s16 = sshll.u32 %s1816_s25, 9 }
 0x12d   : > { %560 = vrot.lane.b32.xlu1 %v1943_v8, %s1746_s17  ;;  %s1197_s17 = sshll.u32 %s1973_s14, 4  ;;  %s2022_s17 = int_to_ptr.vmem [resolvable:$true] %s1197_s17 }
 0x12e   : > { %s1636_s8 = scalar_lea.vmem %s2022_s17, 512 }
 0x12f   : > { %p1637_p11 = scmp.ne.s32.totalorder %s2022_s17, %s1636_s8 }
 0x131   : > { %735 = vrot.lane.b32.xlu1 %v1943_v8, %s1747_s10  ;;  %p1638_p1 = pnand %p1637_p11, %p2119_p0 }
 0x133   : > { %p1639_p2 = pneg %p1638_p1 }
 0x197   : > { %v484_v10 = vpop.permute.xlu1 %483  ;;  %v395_v11 = vpop.permute.xlu0 %394 }
 0x198   : > { %1399 = vmatpush3.xpose.msk.msra.mxu1 %vm396_vm2, %v395_v11 }
 0x199   : > { %1403 = vmatprep.subr.mxu1 %v1741_v0 }
 0x19b   : > { %v563_v12 = vpop.permute.xlu1 %562  ;;  %1401 = vmatmul.mubr.msk.f32.vlgmr.msra.gmra.mxu1 %vm396_vm2, %v1943_v8 }
 0x19c   : > { %1404 = vmatpush3.msra.mxu1 %v484_v10  ;;  %1405 = vmatprep.mubr.msk.f32.mxu1 %vm1742_vm0, %v1741_v0 }
 0x19d   : > { %1408 = vmatprep.subr.mxu1 %v1741_v0 }
 0x19f   : > { %v561_v13 = vpop.permute.xlu1 %560 }
 0x1a3   : > { %v736_v14 = vpop.permute.xlu1 %735 }
 0x1a4   : > { %1419 = vmatpush3.xpose.msk.msra.mxu0 %vm396_vm2, %v736_v14 }
 0x1a5   : > { %1428 = vmatprep.subr.mxu0 %v1741_v0 }
 0x25b   : > { %v467_v15 = vpop.f32.mrf.mxu1 }
 0x25c   : > { %v471_v16 = vsel %vm396_vm2, %v467_v15, -inf }
 0x25d   : > { %472 = vmax.xlane.f32.xlu0 %v471_v16  ;;  %v1402_v17 = vpop.f32.mrf.mxu1 }
 0x273   : > { %908 = vrot.lane.b32.xlu0 %v1943_v8, %s1748_s11 }
 0x2e6   : > { %v473_v18 = vpop.xlane.xlu0 %472 }
 0x2e7   : > { %v474_v19 = vsub.f32 %v467_v15, %v473_v18 }
 0x2e9   : > { %v475_v20 = vmul.f32 1.442695, %v474_v19 }
 0x2ea   : > { %v909_v25 = vpop.permute.xlu0 %908 }
 0x2eb   : > { %1540 = vpow2.f32 %v475_v20 }
 0x2f8   : > { %v1541_v21 = vpop.eup %1540 }
 0x2f9   : > { %v477_v22 = vsel %vm396_vm2, %v1541_v21, 0.0 }
 0x2fa   : > { %478 = vadd.xlane.f32.xlu1 %v477_v22 }
 0x30b   : > { %733 = vrot.lane.b32.xlu1 %v1943_v8, %s1749_s9  ;;  %s2020_s9 = scalar_lea.hbm %s2101_s6, %s1360_s16 }
 0x30f   : > { %906 = vrot.lane.b32.xlu1 %v1943_v8, %s1750_s12  ;;  %s1171_s12 = scalar_lea.sflag [#allocation11], %s1913_s18 }
 0x383   : > { %v479_v23 = vpop.xlane.xlu1 %478 }
 0x384   : > { %1542 = vrcp.f32 %v479_v23 }
 0x387   : > { %v734_v24 = vpop.permute.xlu1 %733 }
 0x388   : > { %1421 = vmatmul.mubr.msk.f32.vlgmr.msra.gmra.mxu0 %vm396_vm2, %v734_v24 }
 0x389   : > { %1429 = vmatpush3.xpose.msk.msra.mxu0 %vm396_vm2, %v909_v25  ;;  %1430 = vmatprep.mubr.msk.f32.mxu0 %vm1742_vm0, %v1741_v0 }
 0x38a   : > { %1438 = vmatprep.subr.mxu0 %v1741_v0 }
 0x38b   : > { %v907_v26 = vpop.permute.xlu1 %906 }
 0x38c   : > { %1431 = vmatmul.mubr.msk.f32.vlgmr.msra.gmra.mxu0 %vm396_vm2, %v907_v26 }
 0x38d   : > { %1446 = vmatprep.mubr.msk.f32.mxu0 %vm1742_vm0, %v1741_v0  ;;  %1439 = vmatpush3.msra.mxu0 %v1083_v4 }
 0x38e   : > { %1440 = vmatprep.subr.mxu0 %v1741_v0 }
 0x38f   : > { %1441 = vmatpush3.msra.mxu0 %v1082_v5 }
 0x390   : > { %1442 = vmatprep.subr.mxu0 %v1741_v0 }
 0x391   : > { %v1543_v27 = vpop.eup %1542  ;;  %1443 = vmatpush3.msra.mxu0 %v1081_v6 }
 0x392   : > { %v481_v28 = vmul.f32 %v1543_v27, %v1541_v21  ;;  %1444 = vmatprep.subr.mxu0 %v1741_v0 }
 0x394   : > { %482 = vst.msk [vmem:[%s1973_s14] sm:$0xff] %vm396_vm2, %v481_v28  ;;  %1406 = vmatmul.mubr.msk.f32.vlgmr.msra.gmra.mxu1 %vm396_vm2, %v481_v28 }
 0x395   : > { %1409 = vmatpush3.xpose.msk.msra.mxu1 %vm396_vm2, %v563_v12  ;;  %1410 = vmatprep.mubr.msk.f32.mxu1 %vm1742_vm0, %v1741_v0 }
 0x396   : > { %1413 = vmatprep.subr.mxu1 %v1741_v0 }
 0x398   : > { %1411 = vmatmul.mubr.msk.f32.vlgmr.msra.gmra.mxu1 %vm396_vm2, %v561_v13 }
 0x399   : > { %1415 = vmatprep.mubr.msk.f32.mxu1 %vm1742_vm0, %v1741_v0 }
 0x448   : > { %v807_v29 = vpop.f32.mrf.mxu0 }
 0x449   : > { %v811_v30 = vsel %vm396_vm2, %v807_v29, -inf }
 0x44a   : > { %812 = vmax.xlane.f32.xlu0 %v811_v30  ;;  %v1422_v31 = vpop.f32.mrf.mxu0 }
 0x44c   : > { %v980_v32 = vpop.f32.mrf.mxu0 }
 0x44d   : > { %v984_v39 = vsel %vm396_vm2, %v980_v32, -inf }
 0x44e   : > { %v1432_v33 = vpop.f32.mrf.mxu0 }
 0x454   : > { %v555_v34 = vpop.f32.mrf.mxu1 }
 0x455   : > { %559 = vst.msk [vmem:[#allocation2] sm:$0xff] %vm396_vm2, %v555_v34 }
 0x456   : > { %v1407_v35 = vpop.f32.mrf.mxu1 }
 0x458   : > { %v634_v36 = vpop.f32.mrf.mxu1 }
 0x459   : > { %v638_v37 = vsel %vm396_vm2, %v634_v36, -inf }
 0x45a   : > { %639 = vmax.xlane.f32.xlu1 %v638_v37  ;;  %v1412_v38 = vpop.f32.mrf.mxu1 }
 0x45e   : > { %985 = vmax.xlane.f32.xlu1 %v984_v39 }
 0x4d3   : > { %v813_v40 = vpop.xlane.xlu0 %812 }
 0x4d4   : > { %v814_v41 = vsub.f32 %v807_v29, %v813_v40 }
 0x4d6   : > { %v815_v42 = vmul.f32 1.442695, %v814_v41 }
 0x4d8   : > { %1544 = vpow2.f32 %v815_v42 }
 0x4e3   : > { %v640_v43 = vpop.xlane.xlu1 %639 }
 0x4e4   : > { %v641_v51 = vsub.f32 %v634_v36, %v640_v43 }
 0x4e5   : > { %v1545_v44 = vpop.eup %1544 }
 0x4e6   : > { %v817_v45 = vsel %vm396_vm2, %v1545_v44, 0.0  ;;  %v642_v52 = vmul.f32 1.442695, %v641_v51 }
 0x4e7   : > { %818 = vadd.xlane.f32.xlu1 %v817_v45  ;;  %v986_v46 = vpop.xlane.xlu1 %985 }
 0x4e8   : > { %v987_v47 = vsub.f32 %v980_v32, %v986_v46 }
 0x4ea   : > { %v988_v48 = vmul.f32 1.442695, %v987_v47 }
 0x4ec   : > { %1546 = vpow2.f32 %v988_v48 }
 0x4ed   : > { %1548 = vpow2.f32 %v642_v52 }
 0x4f8   : > { %651 = vrot.lane.b32.xlu1 %v1943_v8, %s1751_s26  ;;  %s1757_s26 = smov [#allocation10]  }
 0x4f9   : > { %v1547_v49 = vpop.eup %1546 }
 0x4fa   : > { %v990_v50 = vsel %vm396_vm2, %v1547_v49, 0.0  ;;  %v1549_v53 = vpop.eup %1548 }
 0x4fb   : > { %991 = vadd.xlane.f32.xlu0 %v990_v50  ;;  %v644_v54 = vsel %vm396_vm2, %v1549_v53, 0.0 }
 0x511   : > { %824 = vrot.lane.b32.xlu0 %v1943_v8, %s1752_s1  ;;  %s1640_s1 = sshll.u32 %s1757_s26, 4  ;;  %s1641_s1 = int_to_ptr.vmem [resolvable:$false] %s1640_s1 }
 0x512   : > { %p1643_p6 = scmp.lt.s32.totalorder %s2022_s17, %s1641_s1 }
 0x51c   : > { %645 = vadd.xlane.f32.xlu1 %v644_v54 }
 0x52d   : > { %997 = vrot.lane.b32.xlu1 %v1943_v8, %s1753_s27  ;;  %v1080_v8 = vld [vmem:[#allocation8] sm:$0xff] }
 0x52e   : > { %1445 = vmatpush3.msra.mxu0 %v1080_v8 }
 0x570   : > { %v819_v55 = vpop.xlane.xlu1 %818 }
 0x571   : > { %1550 = vrcp.f32 %v819_v55 }
 0x574   : > { %v652_v56 = vpop.permute.xlu1 %651 }
 0x575   : > { %1414 = vmatpush3.msra.mxu1 %v652_v56 }
 0x576   : > { %1423 = vmatprep.subr.mxu1 %v1741_v0 }
 0x57e   : > { %v1551_v57 = vpop.eup %1550 }
 0x57f   : > { %v821_v58 = vmul.f32 %v1551_v57, %v1545_v44 }
 0x581   : > { %1345 = vst.msk [vmem:[%s1973_s14 + $0x10] sm:$0xff] %vm396_vm2, %v821_v58 }
 0x584   : > { %v992_v59 = vpop.xlane.xlu0 %991 }
 0x585   : > { %1552 = vrcp.f32 %v992_v59 }
 0x588   : > { %v825_v2 = vpop.permute.xlu0 %824 }
 0x592   : > { %v1553_v60 = vpop.eup %1552 }
 0x593   : > { %v994_v61 = vmul.f32 %v1553_v60, %v1547_v49 }
 0x595   : > { %1349 = vst.msk [vmem:[%s1973_s14 + $0x18] sm:$0xff] %vm396_vm2, %v994_v61 }
 0x5a5   : > { %v646_v62 = vpop.xlane.xlu1 %645 }
 0x5a6   : > { %1554 = vrcp.f32 %v646_v62 }
 0x5a9   : > { %v998_v3 = vpop.permute.xlu1 %997 }
 0x5b3   : > { %v1555_v63 = vpop.eup %1554 }
 0x5b4   : > { %v648_v1 = vmul.f32 %v1555_v63, %v1549_v53 }
 0x5b6   : > { %1341 = vst.msk [vmem:[%s1973_s14 + $0x8] sm:$0xff] %vm396_vm2, %v648_v1  ;;  %1416 = vmatmul.mubr.msk.f32.vlgmr.msra.gmra.mxu1 %vm396_vm2, %v648_v1  ;;  %s1642_s14 = scalar_lea.vmem %s1641_s1, 1024 }
 0x5b7   : > { %1424 = vmatpush3.msra.mxu1 %v825_v2  ;;  %1425 = vmatprep.mubr.msk.f32.mxu1 %vm1742_vm0, %v1741_v0  ;;  %p1644_p12 = scmp.lt.s32.totalorder %s1642_s14, %s1636_s8 }
 0x5b8   : > { %1433 = vmatprep.subr.mxu1 %v1741_v0 }
 0x5b9   : > { %p1645_p7 = por %p1644_p12, %p1643_p6 }
 0x5ba   : > { %1426 = vmatmul.mubr.msk.f32.vlgmr.msra.gmra.mxu1 %vm396_vm2, %v821_v58 }
 0x5bb   : > { %1434 = vmatpush3.msra.mxu1 %v998_v3  ;;  %1435 = vmatprep.mubr.msk.f32.mxu1 %vm1742_vm0, %v1741_v0  ;;  %p1646_p9 = pnand %p1645_p7, %p1639_p2 }
 0x5be   : > { %1436 = vmatmul.mubr.msk.f32.vlgmr.msra.gmra.mxu1 %vm396_vm2, %v994_v61 }
 0x676   : > { %v723_v7 = vpop.f32.mrf.mxu1 }
 0x677   : > { %728 = vrot.lane.b32.xlu1 %v723_v7, %s1754_s29 }
 0x678   : > { %v1417_v9 = vpop.f32.mrf.mxu1 }
 0x67a   : > { %v896_v10 = vpop.f32.mrf.mxu1 }
 0x67b   : > { %901 = vrot.lane.b32.xlu0 %v896_v10, %s1755_s13 }
 0x67c   : > { %v1427_v11 = vpop.f32.mrf.mxu1 }
 0x67e   : > { %v1069_v12 = vpop.f32.mrf.mxu1 }
 0x67f   : > { %1074 = vrot.lane.b32.xlu1 %v1069_v12, %s1756_s15 }
 0x680   : > { %v1437_v13 = vpop.f32.mrf.mxu1 }
 0x6e9   : > { %v729_v14 = vpop.permute.xlu1 %728 }
 0x6ea   : > { %732 = vst.msk [vmem:[#allocation2] sm:$0xff] %vm731_vm3, %v729_v14 }
 0x6ed   : > { %v902_v15 = vpop.permute.xlu0 %901 }
 0x6ee   : > { %905 = vst.msk [vmem:[#allocation2] sm:$0xff] %vm904_vm4, %v902_v15 }
 0x6f1   : > { %v1075_v0 = vpop.permute.xlu1 %1074 }
 0x6f2   : > { %1078 = vst.msk [vmem:[#allocation2] sm:$0xff] %vm1077_vm5, %v1075_v0 }
 0x6f9   : > { %v1079_v16 = vld [vmem:[#allocation2] sm:$0xff] }
 0x6fa   : > { %1447 = vmatmul.mubr.msk.f32.vlgmr.msra.gmra.mxu0 %vm319_vm1, %v1079_v16 }
 0x6fb   : > { %1649 = shalt.err (!%p1646_p9)
}
 0x6fc   : > { %s1650_s27 = scalar_lea.hbm %s2020_s9, 512  ;;  %s1654_s16 = scalar_lea.hbm %s2101_s6, 1024 }
 0x6fd   : > { %p1651_p13 = scmp.ne.s32.totalorder %s2020_s9, %s1650_s27  ;;  %p1655_p4 = scmp.lt.s32.totalorder %s2020_s9, %s2101_s6 }
 0x6fe   : > { %p1656_p8 = scmp.lt.s32.totalorder %s1654_s16, %s1650_s27 }
 0x6ff   : > { %p1652_p5 = pnand %p1651_p13, %p2119_p0 }
 0x700   : > { %p1657_p3 = por %p1656_p8, %p1655_p4 }
 0x701   : > { %p1653_p10 = pneg %p1652_p5 }
 0x703   : > { %p1658_p11 = pnand %p1657_p3, %p1653_p10 }
 0x705   : > { %1661 = shalt.err (!%p1658_p11)
}
 0x706   : > { %s1758_s8 = smov 128   ;;  %v1351_v17 = vld [vmem:[%s2099_s4] ss:$0 sm:$0xff]  ;;  %s1355_s14 = sshll.u32 %s1816_s25, 7 }
 0x707   : > { %1460 = dma.vmem_to_hbm [thread:$0]  (%p2119_p0), %s2022_s17, 512, %s2020_s9, %s1171_s12, %s1758_s8, %s1758_s8, %s1754_s29  }
 0x708   : > { %s299_s27 = scalar_lea.vmem [#allocation9], %s1329_s20  ;;  %s2057_s10 = scalar_lea.hbm %s2100_s5, %s1355_s14 }
 0x709   : > { %s1184_s13 = sshll.u32 %s299_s27, 4  ;;  %s1166_s29 = scalar_lea.sflag [#allocation5], %s1913_s18  ;;  %s1185_s13 = int_to_ptr.vmem [resolvable:$true] %s1184_s13 }
 0x70a   : > { %s1662_s17 = scalar_lea.vmem %s1185_s13, 128  ;;  %s1759_s25 = smov [#allocation9]  }
 0x70b   : > { %p1663_p1 = scmp.ne.s32.totalorder %s1185_s13, %s1662_s17  ;;  %s1666_s20 = sshll.u32 %s1759_s25, 4  ;;  %s1667_s20 = int_to_ptr.vmem [resolvable:$false] %s1666_s20 }
 0x70c   : > { %s1668_s9 = scalar_lea.vmem %s1667_s20, 256  ;;  %p1669_p12 = scmp.lt.s32.totalorder %s1185_s13, %s1667_s20 }
 0x70d   : > { %p1664_p2 = pnand %p1663_p1, %p2119_p0  ;;  %p1670_p7 = scmp.lt.s32.totalorder %s1668_s9, %s1662_s17 }
 0x70f   : > { %p1665_p6 = pneg %p1664_p2  ;;  %p1671_p9 = por %p1670_p7, %p1669_p12 }
 0x711   : > { %p1672_p13 = pnand %p1671_p9, %p1665_p6 }
 0x7ba   : > { %v1160_v18 = vpop.f32.mrf.mxu0 }
 0x7bb   : > { %v1161_v19 = vadd.f32 %v1351_v17, %v1160_v18 }
 0x7bc   : > { %v1448_v20 = vpop.f32.mrf.mxu0 }
 0x7bd   : > { %1164 = vst.msk [vmem:[%s299_s27] sm:$0xff] %vm319_vm1, %v1161_v19 }
 0x7be   : > { %1675 = shalt.err (!%p1672_p13)
}
 0x7bf   : > { %s1676_s12 = scalar_lea.hbm %s2057_s10, 128  ;;  %s1680_s8 = scalar_lea.hbm %s2100_s5, 256 }
 0x7c0   : > { %p1677_p5 = scmp.ne.s32.totalorder %s2057_s10, %s1676_s12  ;;  %p1681_p8 = scmp.lt.s32.totalorder %s2057_s10, %s2100_s5 }
 0x7c1   : > { %p1682_p3 = scmp.lt.s32.totalorder %s1680_s8, %s1676_s12 }
 0x7c2   : > { %p1678_p10 = pnand %p1677_p5, %p2119_p0 }
 0x7c3   : > { %p1683_p11 = por %p1682_p3, %p1681_p8 }
 0x7c4   : > { %p1679_p4 = pneg %p1678_p10 }
 0x7c6   : > { %p1684_p1 = pnand %p1683_p11, %p1679_p4 }
 0x7c8   : > { %1687 = shalt.err (!%p1684_p1)
}
 0x7c9   : > { %1459 = dma.vmem_to_hbm [thread:$0]  (%p2119_p0), %s1185_s13, 128, %s2057_s10, %s1166_s29  }
 0x7ca PF: > { %s1212_s14 = sand.u32 1, %s1722_s21   ;;  %p2120_p2 = scmp.ne.s32.totalorder %s2108_s28, 0 }
 0x7cb   : > { %p2121_p6 = scmp.ge.s32.totalorder %s1734_s24, 2  ;;  %s1213_s27 = scalar_lea.sflag [#allocation5], %s1212_s14 }
 0x7cd   : > { %p1475_p12 = pnand %p2121_p6, %p2120_p2 }
 0x7cf   : > { %p1476_p7 = pneg %p1475_p12 }
 0x7d1   : > { %1713 = dma.done.wait (%p1476_p7), %s1213_s27, 128  }
 0x7d2   : > { %1715 = vsyncadd (%p1476_p7), %s1213_s27, 4294967168  ;;  %s1222_s15 = scalar_lea.sflag [#allocation11], %s1212_s14 }
 0x7d3   : > { %1717 = dma.done.wait (%p1476_p7), %s1222_s15, 512  }
 0x7d4   : > { %1719 = vsyncadd (%p1476_p7), %s1222_s15, 4294966784  ;;  %p24_p0 = scmp.ge.s32.totalorder %s1867_s19, 4   ;;  %s2122_s21 = smov %s1726_s22 }
 0x7d5   : > { %s2123_s22 = smov %s1730_s23  ;;  %s2124_s23 = smov %s1883_s7 }
 0x7d6   : > { %s2125_s24 = smov %s1867_s19  ;;  %26 = sbr.rel (!%p24_p0) target bundleno = 10 (0xa), region = 113 }
 0x7db   :  { %1227 = vsyncpa [#allocation4], 1 }
 0x7dc   :  { %1229 = vsyncpa [#allocation4 + $0x1], 1 }
 0x7dd   :  { %1230 = vsyncpa [#allocation7], 1 }
 0x7de   :  { %1231 = vsyncpa [#allocation5], 1 }
 0x7df   :  { %1233 = vsyncpa [#allocation5 + $0x1], 1 }
 0x7e0   :  { %1234 = vsyncpa [#allocation11], 1 }
 0x7e1   :  { %1236 = vsyncpa [#allocation11 + $0x1], 1 }

// kernel: tpu_custom_call.1
= control target key start
LH: loop header
LB: loop body
LE: loop exit
PB: predicated region body
PF: predicated region fallthrough
CT: control target
= control target key end

     0   :  { %s2095_s0 = inlined_call_operand.hbm [shape: f32[2,8,32], index: 0, kind: input, shape index: {}]   ;;  %s2096_s1 = inlined_call_operand.hbm [shape: f32[32,96], index: 1, kind: input, shape index: {}]   ;;  %s2097_s2 = inlined_call_operand.vmem [shape: f32[1,96], index: 2, kind: input, shape index: {}]   ;;  %s2098_s3 = inlined_call_operand.hbm [shape: f32[32,32], index: 3, kind: input, shape index: {}]   ;;  %s2099_s4 = inlined_call_operand.vmem [shape: f32[1,32], index: 4, kind: input, shape index: {}]   ;;  %s2100_s5 = inlined_call_operand.hbm [shape: f32[2,8,32], index: 5, kind: output, shape index: {0}]   ;;  %s2101_s6 = inlined_call_operand.hbm [shape: f32[2,4,8,8], index: 6, kind: output, shape index: {1}]  }
   0x1   :  { %2106 = sst [smem:[#allocation16_spill]] %s2096_s1 }
   0x2   :  { %12 = vsyncpa [#allocation4], 0 }
   0x3   :  { %14 = vsyncpa [#allocation4 + $0x1], 0 }
   0x4   :  { %15 = vsyncpa [#allocation7], 0 }
   0x5   :  { %16 = vsyncpa [#allocation5], 0 }
   0x6   :  { %18 = vsyncpa [#allocation5 + $0x1], 0 }
   0x7   :  { %19 = vsyncpa [#allocation11], 0 }
   0x8   :  { %21 = vsyncpa [#allocation11 + $0x1], 0  ;;  %s1795_s21 = smov 0   ;;  %s1797_s22 = smov 0  }
   0x9   :  { %s1799_s23 = smov 0   ;;  %s1801_s24 = smov 0  }
   0xa LB: > { %s1816_s25 = sadd.s32 4294967295, %s1734_s24   ;;  %s1321_s26 = sadd.s32 4294967294, %s1734_s24   ;;  %s1734_s24 = sphi %s1801_s24, %s2125_s24   ;;  %s1730_s23 = sphi %s1799_s23, %s2124_s23   ;;  %s1726_s22 = sphi %s1797_s22, %s2123_s22   ;;  %s1722_s21 = sphi %s1795_s21, %s2122_s21  }
   0xb   : > { %p47_p0 = scmp.ne.s32.totalorder %s1726_s22, %s1722_s21  ;;  %p2102_p1 = scmp.eq.s32.totalorder %s1816_s25, 0 }
   0xc   : > { %p161_p3 = scmp.eq.s32.totalorder %s1321_s26, 1  ;;  %p1322_p5 = scmp.ge.s32.totalorder %s1734_s24, 1 }
   0xd   : > { %p1825_p4 = por %p2102_p1, %p47_p0  ;;  %p194_p7 = scmp.lt.s32.totalorder %s1734_s24, 3 }
   0xe   : > { %p1830_p6 = por %p161_p3, %p47_p0  ;;  %s1736_s30 = smov [#allocation6]  }
   0xf   : > { %s2107_s27 = scalar_select %p1825_p4, 1, 0 }
  0x10   : > { %s2108_s28 = scalar_select %p1830_p6, 1, 0 }
  0x11   : > { %p1835_p8 = pnand %p1322_p5, %p194_p7  ;;  %s206_s7 = sshll.u32 %s1736_s30, 4  ;;  %s207_s7 = int_to_ptr.vmem [resolvable:$true] %s206_s7 }
  0x12   : > { %s1737_s9 = smov [#allocation8]   ;;  %s1567_s11 = scalar_lea.vmem %s207_s7, 512 }
  0x13   : > { %s2109_s29 = scalar_select %p1835_p8, 1, 0 }
  0x14   : > { %p1463_p9 = pneg %p1835_p8  ;;  %s222_s10 = sshll.u32 %s1737_s9, 4  ;;  %s223_s10 = int_to_ptr.vmem [resolvable:$true] %s222_s10 }
  0x15   : > { %p1568_p13 = scmp.ne.s32.totalorder %s207_s7, %s1567_s11  ;;  %p1575_p5 = scmp.lt.s32.totalorder %s207_s7, %s207_s7 }
  0x16   : > { %p1844_p11 = pnand %p1463_p9, %p2102_p1  ;;  %p1576_p7 = scmp.lt.s32.totalorder %s1567_s11, %s1567_s11 }
  0x18   : > { %p1558_p12 = pneg %p1844_p11  ;;  %p1577_p10 = por %p1576_p7, %p1575_p5 }
  0x1a   : > { %p1570_p0 = pnand %p1568_p13, %p1558_p12 }
  0x1c   : > { %p1571_p3 = pneg %p1570_p0 }
  0x1e   : > { %p1578_p9 = pnand %p1577_p10, %p1571_p3 }
  0x20   : > { %1581 = shalt.err (!%p1578_p9)
}
  0x21   : > { %s1738_s12 = smov 128   ;;  %s1739_s13 = smov 8  }
  0x22   : > { %s2111_s1 = sld [smem:[#allocation16_spill]]  ;;  %s1593_s16 = scalar_lea.vmem %s223_s10, 512 }
  0x23   : > { %p1594_p1 = scmp.ne.s32.totalorder %s223_s10, %s1593_s16  ;;  %p1601_p2 = scmp.lt.s32.totalorder %s223_s10, %s223_s10 }
  0x24   : > { %p1602_p6 = scmp.lt.s32.totalorder %s1593_s16, %s1593_s16 }
  0x25   : > { %p1596_p13 = pnand %p1594_p1, %p1558_p12 }
  0x26   : > { %p1603_p5 = por %p1602_p6, %p1601_p2 }
  0x27   : > { %p1597_p0 = pneg %p1596_p13 }
  0x28   : > { %1466 = dma.hbm_to_vmem [thread:$0]  (!%p1844_p11), %s2111_s1, 512, %s207_s7, [#allocation7], %s1738_s12, %s1738_s12, %s1739_s13  }
  0x29   : > { %p1604_p10 = pnand %p1603_p5, %p1597_p0 }
  0x2b   : > { %1607 = shalt.err (!%p1604_p10)
}
  0x2c   : > { %1469 = dma.hbm_to_vmem [thread:$0]  (!%p1844_p11), %s2098_s3, 512, %s223_s10, [#allocation7], %s1738_s12, %s1738_s12, %s1739_s13  }
  0x2d   : > { %s1867_s19 = sadd.s32 1, %s1734_s24   ;;  %s34_s20 = sadd.s32 1, %s1730_s23 }
  0x2e   : > { %s31_s26 = ssub.s32 %s1734_s24, %s1867_s19  ;;  %p41_p1 = scmp.ne.s32.totalorder %s1730_s23, %s1726_s22 }
  0x2f   : > { %p32_p2 = scmp.eq.s32.totalorder %s31_s26, 0  ;;  %p42_p6 = scmp.eq.s32.totalorder %s1734_s24, 0 }
  0x30   : > { %p2112_p12 = scmp.eq.s32.totalorder %s1816_s25, 1  ;;  %p1483_p7 = scmp.lt.s32.totalorder %s1734_s24, 2 }
  0x31   : > { %s1883_s7 = scalar_select %p32_p2, %s1730_s23, %s34_s20  }
  0x32   : > { %p1877_p3 = por %p2112_p12, %p41_p1  ;;  %p43_p9 = por %p42_p6, %p41_p1 }
  0x33   : > { %s239_s8 = sand.u32 1, %s1730_s23   ;;  %s1327_s10 = sshll.u32 %s1734_s24, 7 }
  0x34   : > { %s2113_s30 = scalar_select %p1877_p3, 1, 0 }
  0x35   : > { %s1326_s9 = sshll.u32 %s239_s8, 3  ;;  %s1890_s13 = scalar_lea.hbm %s2095_s0, %s1327_s10 }
  0x36   : > { %s243_s14 = scalar_lea.vmem [#allocation3], %s1326_s9  ;;  %p1892_p11 = pnand %p1483_p7, %p43_p9 }
  0x37   : > { %s250_s15 = sshll.u32 %s243_s14, 4  ;;  %s240_s17 = scalar_lea.sflag [#allocation4], %s239_s8  ;;  %s251_s15 = int_to_ptr.vmem [resolvable:$true] %s250_s15 }
  0x38   : > { %s1608_s18 = scalar_lea.hbm %s1890_s13, 128  ;;  %p1610_p0 = pneg %p1892_p11 }
  0x39   : > { %p1609_p13 = scmp.ne.s32.totalorder %s1890_s13, %s1608_s18  ;;  %s1613_s10 = scalar_lea.hbm %s2095_s0, 256 }
  0x3a   : > { %p1614_p1 = scmp.lt.s32.totalorder %s1890_s13, %s2095_s0  ;;  %p1615_p2 = scmp.lt.s32.totalorder %s1613_s10, %s1608_s18 }
  0x3b   : > { %p1611_p5 = pnand %p1610_p0, %p1609_p13 }
  0x3c   : > { %p1616_p6 = por %p1615_p2, %p1614_p1 }
  0x3d   : > { %p1612_p10 = pneg %p1611_p5 }
  0x3f   : > { %p1617_p12 = pnand %p1616_p6, %p1612_p10 }
  0x41   : > { %1620 = shalt.err (!%p1617_p12)
}
  0x42   : > { %s1621_s12 = scalar_lea.vmem %s251_s15, 128  ;;  %s1740_s8 = smov [#allocation3]  }
  0x43   : > { %p1622_p7 = scmp.ne.s32.totalorder %s251_s15, %s1621_s12  ;;  %s1626_s14 = sshll.u32 %s1740_s8, 4  ;;  %s1627_s14 = int_to_ptr.vmem [resolvable:$false] %s1626_s14 }
  0x44   : > { %s1628_s1 = scalar_lea.vmem %s1627_s14, 256  ;;  %p1629_p13 = scmp.lt.s32.totalorder %s251_s15, %s1627_s14 }
  0x45   : > { %p1624_p9 = pnand %p1622_p7, %p1610_p0  ;;  %p1630_p5 = scmp.lt.s32.totalorder %s1628_s1, %s1621_s12 }
  0x47   : > { %p1625_p3 = pneg %p1624_p9  ;;  %p1631_p4 = por %p1630_p5, %p1629_p13 }
  0x49   : > { %p1632_p8 = pnand %p1631_p4, %p1625_p3 }
  0x4b   : > { %1635 = shalt.err (!%p1632_p8)
}
  0x4c   : > { %1473 = dma.hbm_to_vmem [thread:$0]  (!%p1892_p11), %s1890_s13, 128, %s251_s15, %s240_s17  }
  0x4d   : > { %p2115_p10 = scmp.ne.s32.totalorder %s2109_s29, 0 }
  0x4e   : > { %s1913_s18 = sand.u32 (!%p2115_p10), 1, %s1726_s22   ;;  %p2116_p4 = scmp.ne.s32.totalorder (!%p2115_p10), %s2107_s27, 0 }
  0x4f   : > { %259 = sbr.rel (%p2115_p10) target bundleno = 1994 (0x7ca), region = 40  ;;  %s1329_s20 = sshll.u32 (!%p2115_p10), %s1913_s18, 3 }
  0x50   : > { %s262_s26 = scalar_lea.sflag (!%p2115_p10), [#allocation4], %s1913_s18  ;;  %s265_s1 = scalar_lea.vmem (!%p2115_p10), [#allocation3], %s1329_s20 }
  0x54   : > { %1705 = dma.done.wait (%p2116_p4), %s262_s26, 128  }
  0x55   : > { %1707 = vsyncadd (%p2116_p4), %s262_s26, 4294967168  ;;  %p2117_p8 = scmp.eq.s32.totalorder %s1816_s25, 0 }
  0x57   : > { %1709 = dma.done.wait (%p2117_p8), [#allocation7], 1024   ;;  %p2118_p3 = pmov %p2117_p8 }
  0x58   : > { %v1741_v0 = vmov 0.0   ;;  %vm1742_vm0 = vmmov 0   ;;  %v311_v1 = vld [vmem:[#allocation6 + $0x18] sm:$0xff]  ;;  %v310_v2 = vld [vmem:[#allocation6 + $0x10] sm:$0xff]  ;;  %v309_v3 = vld [vmem:[#allocation6 + $0x8] sm:$0xff]  ;;  %vm319_vm1 = vcmask 261120  }
  0x59   : > { %1711 = vsyncadd (%p2118_p3), [#allocation7], 4294966272  ;;  %1387 = vmatprep.subr.mxu0 %v1741_v0  ;;  %1395 = vmatprep.mubr.msk.f32.mxu0 %vm1742_vm0, %v1741_v0  ;;  %v308_v4 = vld [vmem:[#allocation6] sm:$0xff]  ;;  %v307_v5 = vld [vmem:[%s265_s1] sm:$0xff]  ;;  %s1743_s13 = smov 64   ;;  %s1744_s15 = smov 96  }
  0x5a   : > { %1398 = vmatprep.subr.mxu1 %v1741_v0  ;;  %1400 = vmatprep.mubr.msk.f32.mxu1 %vm1742_vm0, %v1741_v0  ;;  %v1334_v6 = vld [vmem:[%s2097_s2] ss:$0 sm:$0xff]  ;;  %s1745_s16 = smov 88   ;;  %s1746_s17 = smov 120   ;;  %vm396_vm2 = vcmask 64512   ;;  %vm731_vm3 = vcmask 130112  }
  0x5b   : > { %1388 = vmatpush3.msra.mxu0 %v311_v1  ;;  %s1747_s10 = smov 80   ;;  %s1748_s11 = smov 72   ;;  %vm904_vm4 = vcmask 195712   ;;  %vm1077_vm5 = vcmask 261312  }
  0x5c   : > { %1389 = vmatprep.subr.mxu0 %v1741_v0  ;;  %s1749_s9 = smov 112   ;;  %s1750_s12 = smov 104  }
  0x5d   : > { %1390 = vmatpush3.msra.mxu0 %v310_v2  ;;  %s1333_s8 = sshll.u32 %s1913_s18, 5  ;;  %s1751_s26 = smov 56  }
  0x5e   : > { %1391 = vmatprep.subr.mxu0 %v1741_v0  ;;  %s1973_s14 = scalar_lea.vmem [#allocation10], %s1333_s8  ;;  %s1752_s1 = smov 48  }
  0x5f   : > { %1392 = vmatpush3.msra.mxu0 %v309_v3  ;;  %s1753_s27 = smov 40   ;;  %s1754_s29 = smov 8  }
  0x60   : > { %1393 = vmatprep.subr.mxu0 %v1741_v0  ;;  %p2119_p0 = scmp.ne.s32.totalorder %s2113_s30, 0 }
  0x61   : > { %1394 = vmatpush3.msra.mxu0 %v308_v4  ;;  %v1083_v4 = vld [vmem:[#allocation8 + $0x18] sm:$0xff] }
  0x62   : > { %1396 = vmatmul.mubr.msk.f32.vlgmr.msra.gmra.mxu0 %vm319_vm1, %v307_v5  ;;  %1418 = vmatprep.subr.mxu0 %v1741_v0  ;;  %v1082_v5 = vld [vmem:[#allocation8 + $0x10] sm:$0xff] }
  0x63   : > { %1420 = vmatprep.mubr.msk.f32.mxu0 %vm1742_vm0, %v1741_v0 }
 0x122   : > { %v389_v7 = vpop.f32.mrf.mxu0 }
 0x123   : > { %v1943_v8 = vadd.f32 %v1334_v6, %v389_v7  ;;  %v1081_v6 = vld [vmem:[#allocation8 + $0x8] sm:$0xff] }
 0x124   : > { %v1397_v9 = vpop.f32.mrf.mxu0 }
 0x125   : > { %483 = vrot.lane.b32.xlu1 %v1943_v8, %s1743_s13  ;;  %394 = vrot.lane.b32.xlu0 %v1943_v8, %s1744_s15  ;;  %s1755_s13 = smov 16   ;;  %s1756_s15 = smov 24  }
 0x129   : > { %562 = vrot.lane.b32.xlu1 %v1943_v8, %s1745_s16  ;;  %s1360_s16 = sshll.u32 %s1816_s25, 9 }
 0x12d   : > { %560 = vrot.lane.b32.xlu1 %v1943_v8, %s1746_s17  ;;  %s1197_s17 = sshll.u32 %s1973_s14, 4  ;;  %s2022_s17 = int_to_ptr.vmem [resolvable:$true] %s1197_s17 }
 0x12e   : > { %s1636_s8 = scalar_lea.vmem %s2022_s17, 512 }
 0x12f   : > { %p1637_p11 = scmp.ne.s32.totalorder %s2022_s17, %s1636_s8 }
 0x131   : > { %735 = vrot.lane.b32.xlu1 %v1943_v8, %s1747_s10  ;;  %p1638_p1 = pnand %p1637_p11, %p2119_p0 }
 0x133   : > { %p1639_p2 = pneg %p1638_p1 }
 0x197   : > { %v484_v10 = vpop.permute.xlu1 %483  ;;  %v395_v11 = vpop.permute.xlu0 %394 }
 0x198   : > { %1399 = vmatpush3.xpose.msk.msra.mxu1 %vm396_vm2, %v395_v11 }
 0x199   : > { %1403 = vmatprep.subr.mxu1 %v1741_v0 }
 0x19b   : > { %v563_v12 = vpop.permute.xlu1 %562  ;;  %1401 = vmatmul.mubr.msk.f32.vlgmr.msra.gmra.mxu1 %vm396_vm2, %v1943_v8 }
 0x19c   : > { %1404 = vmatpush3.msra.mxu1 %v484_v10  ;;  %1405 = vmatprep.mubr.msk.f32.mxu1 %vm1742_vm0, %v1741_v0 }
 0x19d   : > { %1408 = vmatprep.subr.mxu1 %v1741_v0 }
 0x19f   : > { %v561_v13 = vpop.permute.xlu1 %560 }
 0x1a3   : > { %v736_v14 = vpop.permute.xlu1 %735 }
 0x1a4   : > { %1419 = vmatpush3.xpose.msk.msra.mxu0 %vm396_vm2, %v736_v14 }
 0x1a5   : > { %1428 = vmatprep.subr.mxu0 %v1741_v0 }
 0x25b   : > { %v467_v15 = vpop.f32.mrf.mxu1 }
 0x25c   : > { %v471_v16 = vsel %vm396_vm2, %v467_v15, -inf }
 0x25d   : > { %472 = vmax.xlane.f32.xlu0 %v471_v16  ;;  %v1402_v17 = vpop.f32.mrf.mxu1 }
 0x273   : > { %908 = vrot.lane.b32.xlu0 %v1943_v8, %s1748_s11 }
 0x2e6   : > { %v473_v18 = vpop.xlane.xlu0 %472 }
 0x2e7   : > { %v474_v19 = vsub.f32 %v467_v15, %v473_v18 }
 0x2e9   : > { %v475_v20 = vmul.f32 1.442695, %v474_v19 }
 0x2ea   : > { %v909_v25 = vpop.permute.xlu0 %908 }
 0x2eb   : > { %1540 = vpow2.f32 %v475_v20 }
 0x2f8   : > { %v1541_v21 = vpop.eup %1540 }
 0x2f9   : > { %v477_v22 = vsel %vm396_vm2, %v1541_v21, 0.0 }
 0x2fa   : > { %478 = vadd.xlane.f32.xlu1 %v477_v22 }
 0x30b   : > { %733 = vrot.lane.b32.xlu1 %v1943_v8, %s1749_s9  ;;  %s2020_s9 = scalar_lea.hbm %s2101_s6, %s1360_s16 }
 0x30f   : > { %906 = vrot.lane.b32.xlu1 %v1943_v8, %s1750_s12  ;;  %s1171_s12 = scalar_lea.sflag [#allocation11], %s1913_s18 }
 0x383   : > { %v479_v23 = vpop.xlane.xlu1 %478 }
 0x384   : > { %1542 = vrcp.f32 %v479_v23 }
 0x387   : > { %v734_v24 = vpop.permute.xlu1 %733 }
 0x388   : > { %1421 = vmatmul.mubr.msk.f32.vlgmr.msra.gmra.mxu0 %vm396_vm2, %v734_v24 }
 0x389   : > { %1429 = vmatpush3.xpose.msk.msra.mxu0 %vm396_vm2, %v909_v25  ;;  %1430 = vmatprep.mubr.msk.f32.mxu0 %vm1742_vm0, %v1741_v0 }
 0x38a   : > { %1438 = vmatprep.subr.mxu0 %v1741_v0 }
 0x38b   : > { %v907_v26 = vpop.permute.xlu1 %906 }
 0x38c   : > { %1431 = vmatmul.mubr.msk.f32.vlgmr.msra.gmra.mxu0 %vm396_vm2, %v907_v26 }
 0x38d   : > { %1446 = vmatprep.mubr.msk.f32.mxu0 %vm1742_vm0, %v1741_v0  ;;  %1439 = vmatpush3.msra.mxu0 %v1083_v4 }
 0x38e   : > { %1440 = vmatprep.subr.mxu0 %v1741_v0 }
 0x38f   : > { %1441 = vmatpush3.msra.mxu0 %v1082_v5 }
 0x390   : > { %1442 = vmatprep.subr.mxu0 %v1741_v0 }
 0x391   : > { %v1543_v27 = vpop.eup %1542  ;;  %1443 = vmatpush3.msra.mxu0 %v1081_v6 }
 0x392   : > { %v481_v28 = vmul.f32 %v1543_v27, %v1541_v21  ;;  %1444 = vmatprep.subr.mxu0 %v1741_v0 }
 0x394   : > { %482 = vst.msk [vmem:[%s1973_s14] sm:$0xff] %vm396_vm2, %v481_v28  ;;  %1406 = vmatmul.mubr.msk.f32.vlgmr.msra.gmra.mxu1 %vm396_vm2, %v481_v28 }
 0x395   : > { %1409 = vmatpush3.xpose.msk.msra.mxu1 %vm396_vm2, %v563_v12  ;;  %1410 = vmatprep.mubr.msk.f32.mxu1 %vm1742_vm0, %v1741_v0 }
 0x396   : > { %1413 = vmatprep.subr.mxu1 %v1741_v0 }
 0x398   : > { %1411 = vmatmul.mubr.msk.f32.vlgmr.msra.gmra.mxu1 %vm396_vm2, %v561_v13 }
 0x399   : > { %1415 = vmatprep.mubr.msk.f32.mxu1 %vm1742_vm0, %v1741_v0 }
 0x448   : > { %v807_v29 = vpop.f32.mrf.mxu0 }
 0x449   : > { %v811_v30 = vsel %vm396_vm2, %v807_v29, -inf }
 0x44a   : > { %812 = vmax.xlane.f32.xlu0 %v811_v30  ;;  %v1422_v31 = vpop.f32.mrf.mxu0 }
 0x44c   : > { %v980_v32 = vpop.f32.mrf.mxu0 }
 0x44d   : > { %v984_v39 = vsel %vm396_vm2, %v980_v32, -inf }
 0x44e   : > { %v1432_v33 = vpop.f32.mrf.mxu0 }
 0x454   : > { %v555_v34 = vpop.f32.mrf.mxu1 }
 0x455   : > { %559 = vst.msk [vmem:[#allocation2] sm:$0xff] %vm396_vm2, %v555_v34 }
 0x456   : > { %v1407_v35 = vpop.f32.mrf.mxu1 }
 0x458   : > { %v634_v36 = vpop.f32.mrf.mxu1 }
 0x459   : > { %v638_v37 = vsel %vm396_vm2, %v634_v36, -inf }
 0x45a   : > { %639 = vmax.xlane.f32.xlu1 %v638_v37  ;;  %v1412_v38 = vpop.f32.mrf.mxu1 }
 0x45e   : > { %985 = vmax.xlane.f32.xlu1 %v984_v39 }
 0x4d3   : > { %v813_v40 = vpop.xlane.xlu0 %812 }
 0x4d4   : > { %v814_v41 = vsub.f32 %v807_v29, %v813_v40 }
 0x4d6   : > { %v815_v42 = vmul.f32 1.442695, %v814_v41 }
 0x4d8   : > { %1544 = vpow2.f32 %v815_v42 }
 0x4e3   : > { %v640_v43 = vpop.xlane.xlu1 %639 }
 0x4e4   : > { %v641_v51 = vsub.f32 %v634_v36, %v640_v43 }
 0x4e5   : > { %v1545_v44 = vpop.eup %1544 }
 0x4e6   : > { %v817_v45 = vsel %vm396_vm2, %v1545_v44, 0.0  ;;  %v642_v52 = vmul.f32 1.442695, %v641_v51 }
 0x4e7   : > { %818 = vadd.xlane.f32.xlu1 %v817_v45  ;;  %v986_v46 = vpop.xlane.xlu1 %985 }
 0x4e8   : > { %v987_v47 = vsub.f32 %v980_v32, %v986_v46 }
 0x4ea   : > { %v988_v48 = vmul.f32 1.442695, %v987_v47 }
 0x4ec   : > { %1546 = vpow2.f32 %v988_v48 }
 0x4ed   : > { %1548 = vpow2.f32 %v642_v52 }
 0x4f8   : > { %651 = vrot.lane.b32.xlu1 %v1943_v8, %s1751_s26  ;;  %s1757_s26 = smov [#allocation10]  }
 0x4f9   : > { %v1547_v49 = vpop.eup %1546 }
 0x4fa   : > { %v990_v50 = vsel %vm396_vm2, %v1547_v49, 0.0  ;;  %v1549_v53 = vpop.eup %1548 }
 0x4fb   : > { %991 = vadd.xlane.f32.xlu0 %v990_v50  ;;  %v644_v54 = vsel %vm396_vm2, %v1549_v53, 0.0 }
 0x511   : > { %824 = vrot.lane.b32.xlu0 %v1943_v8, %s1752_s1  ;;  %s1640_s1 = sshll.u32 %s1757_s26, 4  ;;  %s1641_s1 = int_to_ptr.vmem [resolvable:$false] %s1640_s1 }
 0x512   : > { %p1643_p6 = scmp.lt.s32.totalorder %s2022_s17, %s1641_s1 }
 0x51c   : > { %645 = vadd.xlane.f32.xlu1 %v644_v54 }
 0x52d   : > { %997 = vrot.lane.b32.xlu1 %v1943_v8, %s1753_s27  ;;  %v1080_v8 = vld [vmem:[#allocation8] sm:$0xff] }
 0x52e   : > { %1445 = vmatpush3.msra.mxu0 %v1080_v8 }
 0x570   : > { %v819_v55 = vpop.xlane.xlu1 %818 }
 0x571   : > { %1550 = vrcp.f32 %v819_v55 }
 0x574   : > { %v652_v56 = vpop.permute.xlu1 %651 }
 0x575   : > { %1414 = vmatpush3.msra.mxu1 %v652_v56 }
 0x576   : > { %1423 = vmatprep.subr.mxu1 %v1741_v0 }
 0x57e   : > { %v1551_v57 = vpop.eup %1550 }
 0x57f   : > { %v821_v58 = vmul.f32 %v1551_v57, %v1545_v44 }
 0x581   : > { %1345 = vst.msk [vmem:[%s1973_s14 + $0x10] sm:$0xff] %vm396_vm2, %v821_v58 }
 0x584   : > { %v992_v59 = vpop.xlane.xlu0 %991 }
 0x585   : > { %1552 = vrcp.f32 %v992_v59 }
 0x588   : > { %v825_v2 = vpop.permute.xlu0 %824 }
 0x592   : > { %v1553_v60 = vpop.eup %1552 }
 0x593   : > { %v994_v61 = vmul.f32 %v1553_v60, %v1547_v49 }
 0x595   : > { %1349 = vst.msk [vmem:[%s1973_s14 + $0x18] sm:$0xff] %vm396_vm2, %v994_v61 }
 0x5a5   : > { %v646_v62 = vpop.xlane.xlu1 %645 }
 0x5a6   : > { %1554 = vrcp.f32 %v646_v62 }
 0x5a9   : > { %v998_v3 = vpop.permute.xlu1 %997 }
 0x5b3   : > { %v1555_v63 = vpop.eup %1554 }
 0x5b4   : > { %v648_v1 = vmul.f32 %v1555_v63, %v1549_v53 }
 0x5b6   : > { %1341 = vst.msk [vmem:[%s1973_s14 + $0x8] sm:$0xff] %vm396_vm2, %v648_v1  ;;  %1416 = vmatmul.mubr.msk.f32.vlgmr.msra.gmra.mxu1 %vm396_vm2, %v648_v1  ;;  %s1642_s14 = scalar_lea.vmem %s1641_s1, 1024 }
 0x5b7   : > { %1424 = vmatpush3.msra.mxu1 %v825_v2  ;;  %1425 = vmatprep.mubr.msk.f32.mxu1 %vm1742_vm0, %v1741_v0  ;;  %p1644_p12 = scmp.lt.s32.totalorder %s1642_s14, %s1636_s8 }
 0x5b8   : > { %1433 = vmatprep.subr.mxu1 %v1741_v0 }
 0x5b9   : > { %p1645_p7 = por %p1644_p12, %p1643_p6 }
 0x5ba   : > { %1426 = vmatmul.mubr.msk.f32.vlgmr.msra.gmra.mxu1 %vm396_vm2, %v821_v58 }
 0x5bb   : > { %1434 = vmatpush3.msra.mxu1 %v998_v3  ;;  %1435 = vmatprep.mubr.msk.f32.mxu1 %vm1742_vm0, %v1741_v0  ;;  %p1646_p9 = pnand %p1645_p7, %p1639_p2 }
 0x5be   : > { %1436 = vmatmul.mubr.msk.f32.vlgmr.msra.gmra.mxu1 %vm396_vm2, %v994_v61 }
 0x676   : > { %v723_v7 = vpop.f32.mrf.mxu1 }
 0x677   : > { %728 = vrot.lane.b32.xlu1 %v723_v7, %s1754_s29 }
 0x678   : > { %v1417_v9 = vpop.f32.mrf.mxu1 }
 0x67a   : > { %v896_v10 = vpop.f32.mrf.mxu1 }
 0x67b   : > { %901 = vrot.lane.b32.xlu0 %v896_v10, %s1755_s13 }
 0x67c   : > { %v1427_v11 = vpop.f32.mrf.mxu1 }
 0x67e   : > { %v1069_v12 = vpop.f32.mrf.mxu1 }
 0x67f   : > { %1074 = vrot.lane.b32.xlu1 %v1069_v12, %s1756_s15 }
 0x680   : > { %v1437_v13 = vpop.f32.mrf.mxu1 }
 0x6e9   : > { %v729_v14 = vpop.permute.xlu1 %728 }
 0x6ea   : > { %732 = vst.msk [vmem:[#allocation2] sm:$0xff] %vm731_vm3, %v729_v14 }
 0x6ed   : > { %v902_v15 = vpop.permute.xlu0 %901 }
 0x6ee   : > { %905 = vst.msk [vmem:[#allocation2] sm:$0xff] %vm904_vm4, %v902_v15 }
 0x6f1   : > { %v1075_v0 = vpop.permute.xlu1 %1074 }
 0x6f2   : > { %1078 = vst.msk [vmem:[#allocation2] sm:$0xff] %vm1077_vm5, %v1075_v0 }
 0x6f9   : > { %v1079_v16 = vld [vmem:[#allocation2] sm:$0xff] }
 0x6fa   : > { %1447 = vmatmul.mubr.msk.f32.vlgmr.msra.gmra.mxu0 %vm319_vm1, %v1079_v16 }
 0x6fb   : > { %1649 = shalt.err (!%p1646_p9)
}
 0x6fc   : > { %s1650_s27 = scalar_lea.hbm %s2020_s9, 512  ;;  %s1654_s16 = scalar_lea.hbm %s2101_s6, 1024 }
 0x6fd   : > { %p1651_p13 = scmp.ne.s32.totalorder %s2020_s9, %s1650_s27  ;;  %p1655_p4 = scmp.lt.s32.totalorder %s2020_s9, %s2101_s6 }
 0x6fe   : > { %p1656_p8 = scmp.lt.s32.totalorder %s1654_s16, %s1650_s27 }
 0x6ff   : > { %p1652_p5 = pnand %p1651_p13, %p2119_p0 }
 0x700   : > { %p1657_p3 = por %p1656_p8, %p1655_p4 }
 0x701   : > { %p1653_p10 = pneg %p1652_p5 }
 0x703   : > { %p1658_p11 = pnand %p1657_p3, %p1653_p10 }
 0x705   : > { %1661 = shalt.err (!%p1658_p11)
}
 0x706   : > { %s1758_s8 = smov 128   ;;  %v1351_v17 = vld [vmem:[%s2099_s4] ss:$0 sm:$0xff]  ;;  %s1355_s14 = sshll.u32 %s1816_s25, 7 }
 0x707   : > { %1460 = dma.vmem_to_hbm [thread:$0]  (%p2119_p0), %s2022_s17, 512, %s2020_s9, %s1171_s12, %s1758_s8, %s1758_s8, %s1754_s29  }
 0x708   : > { %s299_s27 = scalar_lea.vmem [#allocation9], %s1329_s20  ;;  %s2057_s10 = scalar_lea.hbm %s2100_s5, %s1355_s14 }
 0x709   : > { %s1184_s13 = sshll.u32 %s299_s27, 4  ;;  %s1166_s29 = scalar_lea.sflag [#allocation5], %s1913_s18  ;;  %s1185_s13 = int_to_ptr.vmem [resolvable:$true] %s1184_s13 }
 0x70a   : > { %s1662_s17 = scalar_lea.vmem %s1185_s13, 128  ;;  %s1759_s25 = smov [#allocation9]  }
 0x70b   : > { %p1663_p1 = scmp.ne.s32.totalorder %s1185_s13, %s1662_s17  ;;  %s1666_s20 = sshll.u32 %s1759_s25, 4  ;;  %s1667_s20 = int_to_ptr.vmem [resolvable:$false] %s1666_s20 }
 0x70c   : > { %s1668_s9 = scalar_lea.vmem %s1667_s20, 256  ;;  %p1669_p12 = scmp.lt.s32.totalorder %s1185_s13, %s1667_s20 }
 0x70d   : > { %p1664_p2 = pnand %p1663_p1, %p2119_p0  ;;  %p1670_p7 = scmp.lt.s32.totalorder %s1668_s9, %s1662_s17 }
 0x70f   : > { %p1665_p6 = pneg %p1664_p2  ;;  %p1671_p9 = por %p1670_p7, %p1669_p12 }
 0x711   : > { %p1672_p13 = pnand %p1671_p9, %p1665_p6 }
 0x7ba   : > { %v1160_v18 = vpop.f32.mrf.mxu0 }
 0x7bb   : > { %v1161_v19 = vadd.f32 %v1351_v17, %v1160_v18 }
 0x7bc   : > { %v1448_v20 = vpop.f32.mrf.mxu0 }
 0x7bd   : > { %1164 = vst.msk [vmem:[%s299_s27] sm:$0xff] %vm319_vm1, %v1161_v19 }
 0x7be   : > { %1675 = shalt.err (!%p1672_p13)
}
 0x7bf   : > { %s1676_s12 = scalar_lea.hbm %s2057_s10, 128  ;;  %s1680_s8 = scalar_lea.hbm %s2100_s5, 256 }
 0x7c0   : > { %p1677_p5 = scmp.ne.s32.totalorder %s2057_s10, %s1676_s12  ;;  %p1681_p8 = scmp.lt.s32.totalorder %s2057_s10, %s2100_s5 }
 0x7c1   : > { %p1682_p3 = scmp.lt.s32.totalorder %s1680_s8, %s1676_s12 }
 0x7c2   : > { %p1678_p10 = pnand %p1677_p5, %p2119_p0 }
 0x7c3   : > { %p1683_p11 = por %p1682_p3, %p1681_p8 }
 0x7c4   : > { %p1679_p4 = pneg %p1678_p10 }
 0x7c6   : > { %p1684_p1 = pnand %p1683_p11, %p1679_p4 }
 0x7c8   : > { %1687 = shalt.err (!%p1684_p1)
}
 0x7c9   : > { %1459 = dma.vmem_to_hbm [thread:$0]  (%p2119_p0), %s1185_s13, 128, %s2057_s10, %s1166_s29  }
 0x7ca PF: > { %s1212_s14 = sand.u32 1, %s1722_s21   ;;  %p2120_p2 = scmp.ne.s32.totalorder %s2108_s28, 0 }
 0x7cb   : > { %p2121_p6 = scmp.ge.s32.totalorder %s1734_s24, 2  ;;  %s1213_s27 = scalar_lea.sflag [#allocation5], %s1212_s14 }
 0x7cd   : > { %p1475_p12 = pnand %p2121_p6, %p2120_p2 }
 0x7cf   : > { %p1476_p7 = pneg %p1475_p12 }
 0x7d1   : > { %1713 = dma.done.wait (%p1476_p7), %s1213_s27, 128  }
 0x7d2   : > { %1715 = vsyncadd (%p1476_p7), %s1213_s27, 4294967168  ;;  %s1222_s15 = scalar_lea.sflag [#allocation11], %s1212_s14 }
 0x7d3   : > { %1717 = dma.done.wait (%p1476_p7), %s1222_s15, 512  }
 0x7d4   : > { %1719 = vsyncadd (%p1476_p7), %s1222_s15, 4294966784  ;;  %p24_p0 = scmp.ge.s32.totalorder %s1867_s19, 4   ;;  %s2122_s21 = smov %s1726_s22 }
 0x7d5   : > { %s2123_s22 = smov %s1730_s23  ;;  %s2124_s23 = smov %s1883_s7 }
 0x7d6   : > { %s2125_s24 = smov %s1867_s19  ;;  %26 = sbr.rel (!%p24_p0) target bundleno = 10 (0xa), region = 113 }
 0x7db   :  { %1227 = vsyncpa [#allocation4], 1 }
 0x7dc   :  { %1229 = vsyncpa [#allocation4 + $0x1], 1 }
 0x7dd   :  { %1230 = vsyncpa [#allocation7], 1 }
 0x7de   :  { %1231 = vsyncpa [#allocation5], 1 }
 0x7df   :  { %1233 = vsyncpa [#allocation5 + $0x1], 1 }
 0x7e0   :  { %1234 = vsyncpa [#allocation11], 1 }
 0x7e1   :  { %1236 = vsyncpa [#allocation11 + $0x1], 1 }

</bundles_post_ra>
